<compile_context>
chip_gen: v7x
topology: tpu7x:2x2x1
jax: 0.10.0
libtpu: 0.0.40
codegen_flags: <defaults>
</compile_context>

<pallas_src>
import functools
import math

import jax
import jax.numpy as jnp
from jax import lax
from jax.experimental import pallas as pl
from jax.experimental.pallas import tpu as pltpu

EPS = 1e-5
NEG_INF = -1e9


# ---------------------------------------------------------------------------
# Fused decoder-layer kernel (one grid step = block_b batch elements)
# ---------------------------------------------------------------------------

def decoder_layer_kernel(
    # activations / masks
    x_ref, mem_ref, skeep_ref,
    # sublayer 0: self-attention
    ln0a_ref, ln0b_ref,
    swq_ref, sbq_ref, swk_ref, sbk_ref, swv_ref, sbv_ref, swo_ref, sbo_ref,
    # sublayer 1: source attention
    ln1a_ref, ln1b_ref,
    cwq_ref, cbq_ref, cwk_ref, cbk_ref, cwv_ref, cbv_ref, cwo_ref, cbo_ref,
    # sublayer 2: position-wise feed-forward
    ln2a_ref, ln2b_ref,
    fw1_ref, fb1_ref, fw2_ref, fb2_ref,
    # output
    o_ref,
    *, h, dk, bb, sq, sk, causal_tgt):
    f32 = jnp.float32
    bf16 = jnp.bfloat16
    d = x_ref.shape[-1]

    def layer_norm(v, a_ref, b_ref):
        # Matches the custom LayerNorm: unbiased std, eps added to std (not var).
        n = v.shape[-1]
        mean = jnp.mean(v, axis=-1, keepdims=True)
        cen = v - mean
        var = jnp.sum(cen * cen, axis=-1, keepdims=True) * (1.0 / (n - 1))
        return a_ref[...] * cen / (jnp.sqrt(var) + EPS) + b_ref[...]

    def mha(y2, kv2, s_kv, bias,
            wq_ref, bq_ref, wk_ref, bk_ref, wv_ref, bv_ref, wo_ref, bo_ref):
        # y2: (bb*sq, D) f32, kv2: (bb*s_kv, D) f32,
        # bias: broadcastable to (bb, sq, s_kv) additive attention bias.
        yb = y2.astype(bf16)     # single cast, reused by every head
        kvb = kv2.astype(bf16)
        out = jnp.zeros((bb * sq, d), f32)
        for i in range(h):       # static unroll; leading-dim weight slice is free
            # 1/sqrt(dk) already folded into wq/bq at prep time.
            q_i = jnp.dot(yb, wq_ref[i], preferred_element_type=f32) + bq_ref[i]
            k_i = jnp.dot(kvb, wk_ref[i], preferred_element_type=f32) + bk_ref[i]
            v_i = jnp.dot(kvb, wv_ref[i], preferred_element_type=f32) + bv_ref[i]
            q_b = q_i.reshape(bb, sq, dk).astype(bf16)
            k_b = k_i.reshape(bb, s_kv, dk).astype(bf16)
            v_b = v_i.reshape(bb, s_kv, dk).astype(bf16)
            s = jnp.einsum('bqd,bkd->bqk', q_b, k_b,
                           preferred_element_type=f32) + bias
            s = s - jnp.max(s, axis=-1, keepdims=True)
            p = jnp.exp(s)
            p = p * pl.reciprocal(jnp.sum(p, axis=-1, keepdims=True), approx=True)
            ctx = jnp.einsum('bqk,bkd->bqd', p.astype(bf16), v_b,
                             preferred_element_type=f32)
            # Per-head accumulation of the output projection (lane-dense width D).
            out = out + jnp.dot(ctx.reshape(bb * sq, dk).astype(bf16), wo_ref[i],
                                preferred_element_type=f32)
        return out + bo_ref[...]

    x = x_ref[...].astype(f32).reshape(bb * sq, d)      # (bb*Sq, D)
    mem = mem_ref[...].astype(f32).reshape(bb * sk, d)  # (bb*Sk, D)

    # Attention biases generated / broadcast in-register (no dense mask DMA).
    if causal_tgt:
        row = lax.broadcasted_iota(jnp.int32, (sq, sq), 0)
        col = lax.broadcasted_iota(jnp.int32, (sq, sq), 1)
        tbias = jnp.where(col <= row, 0.0, NEG_INF).astype(f32)[None]  # (1,sq,sq)
    else:
        tbias = jnp.zeros((1, 1, 1), f32)
    sbias = jnp.where(skeep_ref[...] == 0.0, NEG_INF, 0.0).astype(f32)  # (bb,1,sk)

    # Sublayer 0: pre-LN -> masked self-attention -> residual
    y = layer_norm(x, ln0a_ref, ln0b_ref)
    x = x + mha(y, y, sq, tbias,
                swq_ref, sbq_ref, swk_ref, sbk_ref, swv_ref, sbv_ref,
                swo_ref, sbo_ref)

    # Sublayer 1: pre-LN -> source attention over encoder memory -> residual
    y = layer_norm(x, ln1a_ref, ln1b_ref)
    x = x + mha(y, mem, sk, sbias,
                cwq_ref, cbq_ref, cwk_ref, cbk_ref, cwv_ref, cbv_ref,
                cwo_ref, cbo_ref)

    # Sublayer 2: pre-LN -> position-wise feed-forward -> residual
    y = layer_norm(x, ln2a_ref, ln2b_ref)
    hmid = jnp.dot(y.astype(bf16), fw1_ref[...],
                   preferred_element_type=f32) + fb1_ref[...]
    hmid = jnp.maximum(hmid, 0.0)
    ff = jnp.dot(hmid.astype(bf16), fw2_ref[...],
                 preferred_element_type=f32) + fb2_ref[...]
    o_ref[...] = (x + ff).reshape(bb, sq, d).astype(o_ref.dtype)


# ---------------------------------------------------------------------------
# One-time parameter layout / dtype prep
# ---------------------------------------------------------------------------

def prepare_layer_params(params, h):
    """Weights -> bf16 per-head layout; 1-D params -> (1, dim) f32.

    wq/wk/wv: (h, D, dk)   wo: (h, dk, D)   (leading-dim head slicing is free).
    The 1/sqrt(dk) scale is folded into wq and bq.
    Note: keep an f32 master copy outside this kernel if these weights are
    updated by an optimizer.
    """
    d = jnp.asarray(params['ln0_a']).shape[-1]
    dk = d // h
    scale = 1.0 / math.sqrt(dk)
    bf16, f32 = jnp.bfloat16, jnp.float32

    def vec(p):
        return jnp.asarray(p, f32).reshape(1, -1)

    def per_head_w(w):                       # (D, D) -> (h, D, dk)
        return jnp.asarray(w, f32).reshape(d, h, dk).transpose(1, 0, 2).astype(bf16)

    def per_head_b(b):                       # (D,) -> (h, 1, dk)
        return jnp.asarray(b, f32).reshape(h, 1, dk)

    def attn(p):
        return [
            per_head_w(jnp.asarray(p['wq'], f32) * scale),
            per_head_b(jnp.asarray(p['bq'], f32) * scale),
            per_head_w(p['wk']), per_head_b(p['bk']),
            per_head_w(p['wv']), per_head_b(p['bv']),
            jnp.asarray(p['wo'], f32).reshape(h, dk, d).astype(bf16),
            vec(p['bo']),
        ]

    flat = [vec(params['ln0_a']), vec(params['ln0_b'])]
    flat += attn(params['self_attn'])
    flat += [vec(params['ln1_a']), vec(params['ln1_b'])]
    flat += attn(params['src_attn'])
    flat += [vec(params['ln2_a']), vec(params['ln2_b'])]
    flat += [jnp.asarray(params['ff_w1'], bf16), vec(params['ff_b1']),
             jnp.asarray(params['ff_w2'], bf16), vec(params['ff_b2'])]
    return flat


# ---------------------------------------------------------------------------
# Wrapper
# ---------------------------------------------------------------------------

def decoder_layer(flat_params, x, memory, src_keep, h, *,
                  causal_tgt=True, block_b=None):
    """x: (B, Sq, D); memory: (B, Sk, D); src_keep: (B, Sk) float (1=attend)."""
    B, Sq, D = x.shape
    Sk = memory.shape[1]
    dk = D // h

    if block_b is None:
        # Fill the MXU M-dim: largest divisor of B with ~<=256 rows per step.
        block_b = 1
        for cand in range(1, B + 1):
            if B % cand == 0 and cand * Sq <= max(256, Sq):
                block_b = cand

    skeep = src_keep.reshape(B, 1, Sk).astype(jnp.float32)

    def act_spec(s1, s2):
        return pl.BlockSpec((block_b, s1, s2), lambda b: (b, 0, 0))

    def const_spec(p):
        # Parameters stay resident in VMEM across grid steps (constant index).
        nd = p.ndim
        return pl.BlockSpec(p.shape, lambda b, _nd=nd: (0,) * _nd)

    in_specs = [act_spec(Sq, D), act_spec(Sk, D), act_spec(1, Sk)]
    in_specs += [const_spec(p) for p in flat_params]

    kernel = functools.partial(decoder_layer_kernel, h=h, dk=dk, bb=block_b,
                               sq=Sq, sk=Sk, causal_tgt=causal_tgt)
    return pl.pallas_call(
        kernel,
        out_shape=jax.ShapeDtypeStruct((B, Sq, D), jnp.float32),
        grid=(B // block_b,),
        in_specs=in_specs,
        out_specs=pl.BlockSpec((block_b, Sq, D), lambda b: (b, 0, 0)),
        compiler_params=pltpu.CompilerParams(
            dimension_semantics=("parallel",),
            vmem_limit_bytes=48 * 1024 * 1024),
    )(x, memory, skeep, *flat_params)


# ---------------------------------------------------------------------------
# Pure-JAX f32 reference (matches the PyTorch math)
# ---------------------------------------------------------------------------

def _ref_layernorm(x, a, b):
    n = x.shape[-1]
    mean = jnp.mean(x, axis=-1, keepdims=True)
    var = jnp.sum((x - mean) ** 2, axis=-1, keepdims=True) / (n - 1)
    return a * (x - mean) / (jnp.sqrt(var) + EPS) + b


def _ref_mha(p, q_in, k_in, v_in, mask, h):
    B, Sq, D = q_in.shape
    Sk = k_in.shape[1]
    dk = D // h

    def proj(x, w, b, S):
        return (x.reshape(B * S, D) @ w + b).reshape(B, S, h, dk).transpose(0, 2, 1, 3)

    q = proj(q_in, p['wq'], p['bq'], Sq)
    k = proj(k_in, p['wk'], p['bk'], Sk)
    v = proj(v_in, p['wv'], p['bv'], Sk)
    s = jnp.einsum('bhqd,bhkd->bhqk', q, k) / math.sqrt(dk)
    s = jnp.where(mask == 0.0, NEG_INF, s)
    p_attn = jax.nn.softmax(s, axis=-1)
    out = jnp.einsum('bhqk,bhkd->bhqd', p_attn, v)
    out = out.transpose(0, 2, 1, 3).reshape(B * Sq, D)
    return (out @ p['wo'] + p['bo']).reshape(B, Sq, D)


def _ref_decoder_layer(params, x, memory, src_mask, tgt_mask, h):
    y = _ref_layernorm(x, params['ln0_a'], params['ln0_b'])
    x = x + _ref_mha(params['self_attn'], y, y, y, tgt_mask, h)
    y = _ref_layernorm(x, params['ln1_a'], params['ln1_b'])
    x = x + _ref_mha(params['src_attn'], y, memory, memory, src_mask, h)
    y = _ref_layernorm(x, params['ln2_a'], params['ln2_b'])
    B, S, D = y.shape
    hdd = jnp.maximum(y.reshape(B * S, D) @ params['ff_w1'] + params['ff_b1'], 0.0)
    ff = (hdd @ params['ff_w2'] + params['ff_b2']).reshape(B, S, D)
    return x + ff


# ---------------------------------------------------------------------------
# Parameter construction + main
# ---------------------------------------------------------------------------

def make_params(key, d_model, d_ff):
    keys = jax.random.split(key, 4)
    scale = 1.0 / math.sqrt(d_model)

    def attn_params(k4):
        ks = jax.random.split(k4, 4)
        return {
            'wq': jax.random.normal(ks[0], (d_model, d_model), jnp.float32) * scale,
            'bq': jnp.zeros((d_model,), jnp.float32),
            'wk': jax.random.normal(ks[1], (d_model, d_model), jnp.float32) * scale,
            'bk': jnp.zeros((d_model,), jnp.float32),
            'wv': jax.random.normal(ks[2], (d_model, d_model), jnp.float32) * scale,
            'bv': jnp.zeros((d_model,), jnp.float32),
            'wo': jax.random.normal(ks[3], (d_model, d_model), jnp.float32) * scale,
            'bo': jnp.zeros((d_model,), jnp.float32),
        }

    return {
        'self_attn': attn_params(keys[0]),
        'src_attn': attn_params(keys[1]),
        'ff_w1': jax.random.normal(keys[2], (d_model, d_ff), jnp.float32) * scale,
        'ff_b1': jnp.zeros((d_ff,), jnp.float32),
        'ff_w2': jax.random.normal(keys[3], (d_ff, d_model), jnp.float32) / math.sqrt(d_ff),
        'ff_b2': jnp.zeros((d_model,), jnp.float32),
        'ln0_a': jnp.ones((d_model,), jnp.float32),
        'ln0_b': jnp.zeros((d_model,), jnp.float32),
        'ln1_a': jnp.ones((d_model,), jnp.float32),
        'ln1_b': jnp.zeros((d_model,), jnp.float32),
        'ln2_a': jnp.ones((d_model,), jnp.float32),
        'ln2_b': jnp.zeros((d_model,), jnp.float32),
    }


if __name__ == "__main__":
    B, S_tgt, S_src = 2, 8, 16
    D, H, D_FF = 128, 4, 256          # D = 128 -> lane-dense output stores

    key = jax.random.PRNGKey(0)
    kx, km, kp = jax.random.split(key, 3)

    x = jax.random.normal(kx, (B, S_tgt, D), jnp.float32)
    memory = jax.random.normal(km, (B, S_src, D), jnp.float32)
    params = make_params(kp, D, D_FF)
    flat_params = prepare_layer_params(params, H)

    # Source key-padding mask (1.0 = attend, 0.0 = masked): batch 0 attends to
    # the first 12 memory positions, batch 1 to all 16.
    lens = jnp.array([12, 16], jnp.int32)
    src_keep = (jnp.arange(S_src)[None, :] < lens[:, None]).astype(jnp.float32)

    run = jax.jit(functools.partial(decoder_layer, h=H))
    out = run(flat_params, x, memory, src_keep)
    out = jax.block_until_ready(out)

    # Dense-mask f32 reference.
    causal = jnp.tril(jnp.ones((S_tgt, S_tgt), jnp.float32))
    tgt_mask = jnp.broadcast_to(causal, (B, 1, S_tgt, S_tgt))
    src_mask = jnp.broadcast_to(src_keep[:, None, None, :], (B, 1, S_tgt, S_src))
    ref = _ref_decoder_layer(params, x, memory, src_mask, tgt_mask, H)

    assert out.shape == (B, S_tgt, D)
    max_err = float(jnp.max(jnp.abs(out - ref)))
    # bf16 MXU inputs + approx reciprocal loosen the tolerance vs. the f32 ref.
    assert jnp.allclose(out, ref, rtol=5e-2, atol=5e-2), \
        f"mismatch vs JAX reference (max |err|={max_err})"

    print("KERNEL_OK")
</pallas_src>

<mosaic_0001>
module attributes {stable_mosaic.version = 11 : i64} {
  func.func @decoder_layer_kernel(%arg0: i32, %arg1: memref<2x8x128xf32, #tpu.memory_space<vmem>>, %arg2: memref<2x16x128xf32, #tpu.memory_space<vmem>>, %arg3: memref<2x1x16xf32, #tpu.memory_space<vmem>>, %arg4: memref<1x128xf32, #tpu.memory_space<vmem>>, %arg5: memref<1x128xf32, #tpu.memory_space<vmem>>, %arg6: memref<4x128x32xbf16, #tpu.memory_space<vmem>>, %arg7: memref<4x1x32xf32, #tpu.memory_space<vmem>>, %arg8: memref<4x128x32xbf16, #tpu.memory_space<vmem>>, %arg9: memref<4x1x32xf32, #tpu.memory_space<vmem>>, %arg10: memref<4x128x32xbf16, #tpu.memory_space<vmem>>, %arg11: memref<4x1x32xf32, #tpu.memory_space<vmem>>, %arg12: memref<4x32x128xbf16, #tpu.memory_space<vmem>>, %arg13: memref<1x128xf32, #tpu.memory_space<vmem>>, %arg14: memref<1x128xf32, #tpu.memory_space<vmem>>, %arg15: memref<1x128xf32, #tpu.memory_space<vmem>>, %arg16: memref<4x128x32xbf16, #tpu.memory_space<vmem>>, %arg17: memref<4x1x32xf32, #tpu.memory_space<vmem>>, %arg18: memref<4x128x32xbf16, #tpu.memory_space<vmem>>, %arg19: memref<4x1x32xf32, #tpu.memory_space<vmem>>, %arg20: memref<4x128x32xbf16, #tpu.memory_space<vmem>>, %arg21: memref<4x1x32xf32, #tpu.memory_space<vmem>>, %arg22: memref<4x32x128xbf16, #tpu.memory_space<vmem>>, %arg23: memref<1x128xf32, #tpu.memory_space<vmem>>, %arg24: memref<1x128xf32, #tpu.memory_space<vmem>>, %arg25: memref<1x128xf32, #tpu.memory_space<vmem>>, %arg26: memref<128x256xbf16, #tpu.memory_space<vmem>>, %arg27: memref<1x256xf32, #tpu.memory_space<vmem>>, %arg28: memref<256x128xbf16, #tpu.memory_space<vmem>>, %arg29: memref<1x128xf32, #tpu.memory_space<vmem>>, %arg30: memref<2x8x128xf32, #tpu.memory_space<vmem>>) attributes {dimension_semantics = [#tpu.dimension_semantics<parallel>], iteration_bounds = array<i64: 1>, scalar_prefetch = 0 : i64, scratch_operands = 0 : i64, tpu.core_type = #tpu.core_type<tc>, window_params = [{transform_indices = @transform_0, window_bounds = array<i64: 2, 8, 128>}, {transform_indices = @transform_1, window_bounds = array<i64: 2, 16, 128>}, {transform_indices = @transform_2, window_bounds = array<i64: 2, 1, 16>}, {pipeline_mode = #tpu.pipeline_mode<synchronous>, transform_indices = @transform_3, window_bounds = array<i64: 1, 128>}, {pipeline_mode = #tpu.pipeline_mode<synchronous>, transform_indices = @transform_4, window_bounds = array<i64: 1, 128>}, {pipeline_mode = #tpu.pipeline_mode<synchronous>, transform_indices = @transform_5, window_bounds = array<i64: 4, 128, 32>}, {pipeline_mode = #tpu.pipeline_mode<synchronous>, transform_indices = @transform_6, window_bounds = array<i64: 4, 1, 32>}, {pipeline_mode = #tpu.pipeline_mode<synchronous>, transform_indices = @transform_7, window_bounds = array<i64: 4, 128, 32>}, {pipeline_mode = #tpu.pipeline_mode<synchronous>, transform_indices = @transform_8, window_bounds = array<i64: 4, 1, 32>}, {pipeline_mode = #tpu.pipeline_mode<synchronous>, transform_indices = @transform_9, window_bounds = array<i64: 4, 128, 32>}, {pipeline_mode = #tpu.pipeline_mode<synchronous>, transform_indices = @transform_10, window_bounds = array<i64: 4, 1, 32>}, {pipeline_mode = #tpu.pipeline_mode<synchronous>, transform_indices = @transform_11, window_bounds = array<i64: 4, 32, 128>}, {pipeline_mode = #tpu.pipeline_mode<synchronous>, transform_indices = @transform_12, window_bounds = array<i64: 1, 128>}, {pipeline_mode = #tpu.pipeline_mode<synchronous>, transform_indices = @transform_13, window_bounds = array<i64: 1, 128>}, {pipeline_mode = #tpu.pipeline_mode<synchronous>, transform_indices = @transform_14, window_bounds = array<i64: 1, 128>}, {pipeline_mode = #tpu.pipeline_mode<synchronous>, transform_indices = @transform_15, window_bounds = array<i64: 4, 128, 32>}, {pipeline_mode = #tpu.pipeline_mode<synchronous>, transform_indices = @transform_16, window_bounds = array<i64: 4, 1, 32>}, {pipeline_mode = #tpu.pipeline_mode<synchronous>, transform_indices = @transform_17, window_bounds = array<i64: 4, 128, 32>}, {pipeline_mode = #tpu.pipeline_mode<synchronous>, transform_indices = @transform_18, window_bounds = array<i64: 4, 1, 32>}, {pipeline_mode = #tpu.pipeline_mode<synchronous>, transform_indices = @transform_19, window_bounds = array<i64: 4, 128, 32>}, {pipeline_mode = #tpu.pipeline_mode<synchronous>, transform_indices = @transform_20, window_bounds = array<i64: 4, 1, 32>}, {pipeline_mode = #tpu.pipeline_mode<synchronous>, transform_indices = @transform_21, window_bounds = array<i64: 4, 32, 128>}, {pipeline_mode = #tpu.pipeline_mode<synchronous>, transform_indices = @transform_22, window_bounds = array<i64: 1, 128>}, {pipeline_mode = #tpu.pipeline_mode<synchronous>, transform_indices = @transform_23, window_bounds = array<i64: 1, 128>}, {pipeline_mode = #tpu.pipeline_mode<synchronous>, transform_indices = @transform_24, window_bounds = array<i64: 1, 128>}, {pipeline_mode = #tpu.pipeline_mode<synchronous>, transform_indices = @transform_25, window_bounds = array<i64: 128, 256>}, {pipeline_mode = #tpu.pipeline_mode<synchronous>, transform_indices = @transform_26, window_bounds = array<i64: 1, 256>}, {pipeline_mode = #tpu.pipeline_mode<synchronous>, transform_indices = @transform_27, window_bounds = array<i64: 256, 128>}, {pipeline_mode = #tpu.pipeline_mode<synchronous>, transform_indices = @transform_28, window_bounds = array<i64: 1, 128>}, {transform_indices = @transform_29, window_bounds = array<i64: 2, 8, 128>}]} {
    %c0 = arith.constant 0 : index
    %c0_0 = arith.constant 0 : index
    %c0_1 = arith.constant 0 : index
    %0 = vector.load %arg1[%c0, %c0_0, %c0_1] : memref<2x8x128xf32, #tpu.memory_space<vmem>>, vector<2x8x128xf32>
    %1 = vector.shape_cast %0 : vector<2x8x128xf32> to vector<16x128xf32>
    %c0_2 = arith.constant 0 : index
    %c0_3 = arith.constant 0 : index
    %c0_4 = arith.constant 0 : index
    %2 = vector.load %arg2[%c0_2, %c0_3, %c0_4] : memref<2x16x128xf32, #tpu.memory_space<vmem>>, vector<2x16x128xf32>
    %3 = vector.shape_cast %2 : vector<2x16x128xf32> to vector<32x128xf32>
    %4 = tpu.iota {dimensions = array<i32: 0>} : vector<8x8xi32>
    %5 = tpu.iota {dimensions = array<i32: 1>} : vector<8x8xi32>
    %6 = arith.cmpi sle, %5, %4 : vector<8x8xi32>
    %cst = arith.constant 0.000000e+00 : f32
    %cst_5 = arith.constant -1.000000e+09 : f32
    %7 = vector.broadcast %cst : f32 to vector<8x8xf32>
    %8 = vector.broadcast %cst_5 : f32 to vector<8x8xf32>
    %9 = arith.select %6, %7, %8 : vector<8x8xi1>, vector<8x8xf32>
    %10 = vector.shape_cast %9 : vector<8x8xf32> to vector<1x8x8xf32>
    %c0_6 = arith.constant 0 : index
    %c0_7 = arith.constant 0 : index
    %c0_8 = arith.constant 0 : index
    %11 = vector.load %arg3[%c0_6, %c0_7, %c0_8] : memref<2x1x16xf32, #tpu.memory_space<vmem>>, vector<2x1x16xf32>
    %cst_9 = arith.constant 0.000000e+00 : f32
    %12 = vector.broadcast %cst_9 : f32 to vector<2x1x16xf32>
    %13 = arith.cmpf oeq, %11, %12 : vector<2x1x16xf32>
    %cst_10 = arith.constant -1.000000e+09 : f32
    %cst_11 = arith.constant 0.000000e+00 : f32
    %14 = vector.broadcast %cst_10 : f32 to vector<2x1x16xf32>
    %15 = vector.broadcast %cst_11 : f32 to vector<2x1x16xf32>
    %16 = arith.select %13, %14, %15 : vector<2x1x16xi1>, vector<2x1x16xf32>
    %cst_12 = arith.constant dense<0.000000e+00> : vector<16xf32>
    %17 = vector.multi_reduction <add>, %1, %cst_12 [1] : vector<16x128xf32> to vector<16xf32>
    %18 = vector.shape_cast %17 : vector<16xf32> to vector<16x1xf32>
    %cst_13 = arith.constant 1.280000e+02 : f32
    %19 = vector.broadcast %cst_13 : f32 to vector<16x1xf32>
    %20 = arith.divf %18, %19 : vector<16x1xf32>
    %21 = vector.broadcast %20 : vector<16x1xf32> to vector<16x128xf32>
    %22 = arith.subf %1, %21 : vector<16x128xf32>
    %23 = arith.mulf %22, %22 : vector<16x128xf32>
    %cst_14 = arith.constant dense<0.000000e+00> : vector<16xf32>
    %24 = vector.multi_reduction <add>, %23, %cst_14 [1] : vector<16x128xf32> to vector<16xf32>
    %25 = vector.shape_cast %24 : vector<16xf32> to vector<16x1xf32>
    %cst_15 = arith.constant 0.00787401571 : f32
    %26 = vector.broadcast %cst_15 : f32 to vector<16x1xf32>
    %27 = arith.mulf %25, %26 : vector<16x1xf32>
    %c0_16 = arith.constant 0 : index
    %c0_17 = arith.constant 0 : index
    %28 = vector.load %arg4[%c0_16, %c0_17] : memref<1x128xf32, #tpu.memory_space<vmem>>, vector<1x128xf32>
    %29 = vector.broadcast %28 : vector<1x128xf32> to vector<16x128xf32>
    %30 = arith.mulf %29, %22 : vector<16x128xf32>
    %31 = math.sqrt %27 : vector<16x1xf32>
    %cst_18 = arith.constant 9.99999974E-6 : f32
    %32 = vector.broadcast %cst_18 : f32 to vector<16x1xf32>
    %33 = arith.addf %31, %32 : vector<16x1xf32>
    %34 = vector.broadcast %33 : vector<16x1xf32> to vector<16x128xf32>
    %35 = arith.divf %30, %34 : vector<16x128xf32>
    %c0_19 = arith.constant 0 : index
    %c0_20 = arith.constant 0 : index
    %36 = vector.load %arg5[%c0_19, %c0_20] : memref<1x128xf32, #tpu.memory_space<vmem>>, vector<1x128xf32>
    %37 = vector.broadcast %36 : vector<1x128xf32> to vector<16x128xf32>
    %38 = arith.addf %35, %37 : vector<16x128xf32>
    %39 = arith.truncf %38 : vector<16x128xf32> to vector<16x128xbf16>
    %40 = arith.truncf %38 : vector<16x128xf32> to vector<16x128xbf16>
    %cst_21 = arith.constant 0.000000e+00 : f32
    %41 = vector.broadcast %cst_21 : f32 to vector<16x128xf32>
    %c0_22 = arith.constant 0 : index
    %c0_23 = arith.constant 0 : index
    %c0_24 = arith.constant 0 : index
    %42 = vector.load %arg6[%c0_22, %c0_23, %c0_24] : memref<4x128x32xbf16, #tpu.memory_space<vmem>>, vector<1x128x32xbf16>
    %43 = vector.shape_cast %42 : vector<1x128x32xbf16> to vector<128x32xbf16>
    %cst_25 = arith.constant dense<0.000000e+00> : vector<16x32xf32>
    %44 = tpu.matmul %39, %43, %cst_25 {dimension_numbers = #tpu.dot_dimension_numbers<[1], [0], [0], [1], [0, 0, 1, 1], [], []>} : vector<16x128xbf16>, vector<128x32xbf16>, vector<16x32xf32> -> vector<16x32xf32>
    %c0_26 = arith.constant 0 : index
    %c0_27 = arith.constant 0 : index
    %c0_28 = arith.constant 0 : index
    %45 = vector.load %arg7[%c0_26, %c0_27, %c0_28] : memref<4x1x32xf32, #tpu.memory_space<vmem>>, vector<1x1x32xf32>
    %46 = vector.shape_cast %45 : vector<1x1x32xf32> to vector<1x32xf32>
    %47 = vector.broadcast %46 : vector<1x32xf32> to vector<16x32xf32>
    %48 = arith.addf %44, %47 : vector<16x32xf32>
    %c0_29 = arith.constant 0 : index
    %c0_30 = arith.constant 0 : index
    %c0_31 = arith.constant 0 : index
    %49 = vector.load %arg8[%c0_29, %c0_30, %c0_31] : memref<4x128x32xbf16, #tpu.memory_space<vmem>>, vector<1x128x32xbf16>
    %50 = vector.shape_cast %49 : vector<1x128x32xbf16> to vector<128x32xbf16>
    %cst_32 = arith.constant dense<0.000000e+00> : vector<16x32xf32>
    %51 = tpu.matmul %40, %50, %cst_32 {dimension_numbers = #tpu.dot_dimension_numbers<[1], [0], [0], [1], [0, 0, 1, 1], [], []>} : vector<16x128xbf16>, vector<128x32xbf16>, vector<16x32xf32> -> vector<16x32xf32>
    %c0_33 = arith.constant 0 : index
    %c0_34 = arith.constant 0 : index
    %c0_35 = arith.constant 0 : index
    %52 = vector.load %arg9[%c0_33, %c0_34, %c0_35] : memref<4x1x32xf32, #tpu.memory_space<vmem>>, vector<1x1x32xf32>
    %53 = vector.shape_cast %52 : vector<1x1x32xf32> to vector<1x32xf32>
    %54 = vector.broadcast %53 : vector<1x32xf32> to vector<16x32xf32>
    %55 = arith.addf %51, %54 : vector<16x32xf32>
    %c0_36 = arith.constant 0 : index
    %c0_37 = arith.constant 0 : index
    %c0_38 = arith.constant 0 : index
    %56 = vector.load %arg10[%c0_36, %c0_37, %c0_38] : memref<4x128x32xbf16, #tpu.memory_space<vmem>>, vector<1x128x32xbf16>
    %57 = vector.shape_cast %56 : vector<1x128x32xbf16> to vector<128x32xbf16>
    %cst_39 = arith.constant dense<0.000000e+00> : vector<16x32xf32>
    %58 = tpu.matmul %40, %57, %cst_39 {dimension_numbers = #tpu.dot_dimension_numbers<[1], [0], [0], [1], [0, 0, 1, 1], [], []>} : vector<16x128xbf16>, vector<128x32xbf16>, vector<16x32xf32> -> vector<16x32xf32>
    %c0_40 = arith.constant 0 : index
    %c0_41 = arith.constant 0 : index
    %c0_42 = arith.constant 0 : index
    %59 = vector.load %arg11[%c0_40, %c0_41, %c0_42] : memref<4x1x32xf32, #tpu.memory_space<vmem>>, vector<1x1x32xf32>
    %60 = vector.shape_cast %59 : vector<1x1x32xf32> to vector<1x32xf32>
    %61 = vector.broadcast %60 : vector<1x32xf32> to vector<16x32xf32>
    %62 = arith.addf %58, %61 : vector<16x32xf32>
    %63 = vector.shape_cast %48 : vector<16x32xf32> to vector<2x8x32xf32>
    %64 = arith.truncf %63 : vector<2x8x32xf32> to vector<2x8x32xbf16>
    %65 = vector.shape_cast %55 : vector<16x32xf32> to vector<2x8x32xf32>
    %66 = arith.truncf %65 : vector<2x8x32xf32> to vector<2x8x32xbf16>
    %67 = vector.shape_cast %62 : vector<16x32xf32> to vector<2x8x32xf32>
    %68 = arith.truncf %67 : vector<2x8x32xf32> to vector<2x8x32xbf16>
    "tpu.trace_start"() <{level = 10 : i32, message = "bqd,bkd->bqk"}> : () -> ()
    %cst_43 = arith.constant dense<0.000000e+00> : vector<2x8x8xf32>
    %69 = tpu.matmul %64, %66, %cst_43 {dimension_numbers = #tpu.dot_dimension_numbers<[2], [2], [1], [1], [0, 0, 0, 1, 1, 1], [0], [0]>} : vector<2x8x32xbf16>, vector<2x8x32xbf16>, vector<2x8x8xf32> -> vector<2x8x8xf32>
    "tpu.trace_stop"() : () -> ()
    %70 = vector.broadcast %10 : vector<1x8x8xf32> to vector<2x8x8xf32>
    %71 = arith.addf %69, %70 : vector<2x8x8xf32>
    %cst_44 = arith.constant dense<0xFF800000> : vector<2x8xf32>
    %72 = vector.multi_reduction <maximumf>, %71, %cst_44 [2] : vector<2x8x8xf32> to vector<2x8xf32>
    %73 = vector.shape_cast %72 : vector<2x8xf32> to vector<2x8x1xf32>
    %74 = vector.broadcast %73 : vector<2x8x1xf32> to vector<2x8x8xf32>
    %75 = arith.subf %71, %74 : vector<2x8x8xf32>
    %76 = math.exp %75 : vector<2x8x8xf32>
    %cst_45 = arith.constant dense<0.000000e+00> : vector<2x8xf32>
    %77 = vector.multi_reduction <add>, %76, %cst_45 [2] : vector<2x8x8xf32> to vector<2x8xf32>
    %78 = vector.shape_cast %77 : vector<2x8xf32> to vector<2x8x1xf32>
    %79 = tpu.reciprocal %78 {approx = true} : vector<2x8x1xf32> -> vector<2x8x1xf32>
    %80 = vector.broadcast %79 : vector<2x8x1xf32> to vector<2x8x8xf32>
    %81 = arith.mulf %76, %80 : vector<2x8x8xf32>
    %82 = arith.truncf %81 : vector<2x8x8xf32> to vector<2x8x8xbf16>
    "tpu.trace_start"() <{level = 10 : i32, message = "bqk,bkd->bqd"}> : () -> ()
    %cst_46 = arith.constant dense<0.000000e+00> : vector<2x8x32xf32>
    %83 = tpu.matmul %82, %68, %cst_46 {dimension_numbers = #tpu.dot_dimension_numbers<[2], [1], [1], [2], [0, 0, 0, 1, 1, 2], [0], [0]>} : vector<2x8x8xbf16>, vector<2x8x32xbf16>, vector<2x8x32xf32> -> vector<2x8x32xf32>
    "tpu.trace_stop"() : () -> ()
    %84 = vector.shape_cast %83 : vector<2x8x32xf32> to vector<16x32xf32>
    %85 = arith.truncf %84 : vector<16x32xf32> to vector<16x32xbf16>
    %c0_47 = arith.constant 0 : index
    %c0_48 = arith.constant 0 : index
    %c0_49 = arith.constant 0 : index
    %86 = vector.load %arg12[%c0_47, %c0_48, %c0_49] : memref<4x32x128xbf16, #tpu.memory_space<vmem>>, vector<1x32x128xbf16>
    %87 = vector.shape_cast %86 : vector<1x32x128xbf16> to vector<32x128xbf16>
    %cst_50 = arith.constant dense<0.000000e+00> : vector<16x128xf32>
    %88 = tpu.matmul %85, %87, %cst_50 {dimension_numbers = #tpu.dot_dimension_numbers<[1], [0], [0], [1], [0, 0, 1, 1], [], []>} : vector<16x32xbf16>, vector<32x128xbf16>, vector<16x128xf32> -> vector<16x128xf32>
    %89 = arith.addf %41, %88 : vector<16x128xf32>
    %c1 = arith.constant 1 : index
    %c0_51 = arith.constant 0 : index
    %c0_52 = arith.constant 0 : index
    %90 = vector.load %arg6[%c1, %c0_51, %c0_52] : memref<4x128x32xbf16, #tpu.memory_space<vmem>>, vector<1x128x32xbf16>
    %91 = vector.shape_cast %90 : vector<1x128x32xbf16> to vector<128x32xbf16>
    %cst_53 = arith.constant dense<0.000000e+00> : vector<16x32xf32>
    %92 = tpu.matmul %39, %91, %cst_53 {dimension_numbers = #tpu.dot_dimension_numbers<[1], [0], [0], [1], [0, 0, 1, 1], [], []>} : vector<16x128xbf16>, vector<128x32xbf16>, vector<16x32xf32> -> vector<16x32xf32>
    %c1_54 = arith.constant 1 : index
    %c0_55 = arith.constant 0 : index
    %c0_56 = arith.constant 0 : index
    %93 = vector.load %arg7[%c1_54, %c0_55, %c0_56] : memref<4x1x32xf32, #tpu.memory_space<vmem>>, vector<1x1x32xf32>
    %94 = vector.shape_cast %93 : vector<1x1x32xf32> to vector<1x32xf32>
    %95 = vector.broadcast %94 : vector<1x32xf32> to vector<16x32xf32>
    %96 = arith.addf %92, %95 : vector<16x32xf32>
    %c1_57 = arith.constant 1 : index
    %c0_58 = arith.constant 0 : index
    %c0_59 = arith.constant 0 : index
    %97 = vector.load %arg8[%c1_57, %c0_58, %c0_59] : memref<4x128x32xbf16, #tpu.memory_space<vmem>>, vector<1x128x32xbf16>
    %98 = vector.shape_cast %97 : vector<1x128x32xbf16> to vector<128x32xbf16>
    %cst_60 = arith.constant dense<0.000000e+00> : vector<16x32xf32>
    %99 = tpu.matmul %40, %98, %cst_60 {dimension_numbers = #tpu.dot_dimension_numbers<[1], [0], [0], [1], [0, 0, 1, 1], [], []>} : vector<16x128xbf16>, vector<128x32xbf16>, vector<16x32xf32> -> vector<16x32xf32>
    %c1_61 = arith.constant 1 : index
    %c0_62 = arith.constant 0 : index
    %c0_63 = arith.constant 0 : index
    %100 = vector.load %arg9[%c1_61, %c0_62, %c0_63] : memref<4x1x32xf32, #tpu.memory_space<vmem>>, vector<1x1x32xf32>
    %101 = vector.shape_cast %100 : vector<1x1x32xf32> to vector<1x32xf32>
    %102 = vector.broadcast %101 : vector<1x32xf32> to vector<16x32xf32>
    %103 = arith.addf %99, %102 : vector<16x32xf32>
    %c1_64 = arith.constant 1 : index
    %c0_65 = arith.constant 0 : index
    %c0_66 = arith.constant 0 : index
    %104 = vector.load %arg10[%c1_64, %c0_65, %c0_66] : memref<4x128x32xbf16, #tpu.memory_space<vmem>>, vector<1x128x32xbf16>
    %105 = vector.shape_cast %104 : vector<1x128x32xbf16> to vector<128x32xbf16>
    %cst_67 = arith.constant dense<0.000000e+00> : vector<16x32xf32>
    %106 = tpu.matmul %40, %105, %cst_67 {dimension_numbers = #tpu.dot_dimension_numbers<[1], [0], [0], [1], [0, 0, 1, 1], [], []>} : vector<16x128xbf16>, vector<128x32xbf16>, vector<16x32xf32> -> vector<16x32xf32>
    %c1_68 = arith.constant 1 : index
    %c0_69 = arith.constant 0 : index
    %c0_70 = arith.constant 0 : index
    %107 = vector.load %arg11[%c1_68, %c0_69, %c0_70] : memref<4x1x32xf32, #tpu.memory_space<vmem>>, vector<1x1x32xf32>
    %108 = vector.shape_cast %107 : vector<1x1x32xf32> to vector<1x32xf32>
    %109 = vector.broadcast %108 : vector<1x32xf32> to vector<16x32xf32>
    %110 = arith.addf %106, %109 : vector<16x32xf32>
    %111 = vector.shape_cast %96 : vector<16x32xf32> to vector<2x8x32xf32>
    %112 = arith.truncf %111 : vector<2x8x32xf32> to vector<2x8x32xbf16>
    %113 = vector.shape_cast %103 : vector<16x32xf32> to vector<2x8x32xf32>
    %114 = arith.truncf %113 : vector<2x8x32xf32> to vector<2x8x32xbf16>
    %115 = vector.shape_cast %110 : vector<16x32xf32> to vector<2x8x32xf32>
    %116 = arith.truncf %115 : vector<2x8x32xf32> to vector<2x8x32xbf16>
    "tpu.trace_start"() <{level = 10 : i32, message = "bqd,bkd->bqk"}> : () -> ()
    %cst_71 = arith.constant dense<0.000000e+00> : vector<2x8x8xf32>
    %117 = tpu.matmul %112, %114, %cst_71 {dimension_numbers = #tpu.dot_dimension_numbers<[2], [2], [1], [1], [0, 0, 0, 1, 1, 1], [0], [0]>} : vector<2x8x32xbf16>, vector<2x8x32xbf16>, vector<2x8x8xf32> -> vector<2x8x8xf32>
    "tpu.trace_stop"() : () -> ()
    %118 = vector.broadcast %10 : vector<1x8x8xf32> to vector<2x8x8xf32>
    %119 = arith.addf %117, %118 : vector<2x8x8xf32>
    %cst_72 = arith.constant dense<0xFF800000> : vector<2x8xf32>
    %120 = vector.multi_reduction <maximumf>, %119, %cst_72 [2] : vector<2x8x8xf32> to vector<2x8xf32>
    %121 = vector.shape_cast %120 : vector<2x8xf32> to vector<2x8x1xf32>
    %122 = vector.broadcast %121 : vector<2x8x1xf32> to vector<2x8x8xf32>
    %123 = arith.subf %119, %122 : vector<2x8x8xf32>
    %124 = math.exp %123 : vector<2x8x8xf32>
    %cst_73 = arith.constant dense<0.000000e+00> : vector<2x8xf32>
    %125 = vector.multi_reduction <add>, %124, %cst_73 [2] : vector<2x8x8xf32> to vector<2x8xf32>
    %126 = vector.shape_cast %125 : vector<2x8xf32> to vector<2x8x1xf32>
    %127 = tpu.reciprocal %126 {approx = true} : vector<2x8x1xf32> -> vector<2x8x1xf32>
    %128 = vector.broadcast %127 : vector<2x8x1xf32> to vector<2x8x8xf32>
    %129 = arith.mulf %124, %128 : vector<2x8x8xf32>
    %130 = arith.truncf %129 : vector<2x8x8xf32> to vector<2x8x8xbf16>
    "tpu.trace_start"() <{level = 10 : i32, message = "bqk,bkd->bqd"}> : () -> ()
    %cst_74 = arith.constant dense<0.000000e+00> : vector<2x8x32xf32>
    %131 = tpu.matmul %130, %116, %cst_74 {dimension_numbers = #tpu.dot_dimension_numbers<[2], [1], [1], [2], [0, 0, 0, 1, 1, 2], [0], [0]>} : vector<2x8x8xbf16>, vector<2x8x32xbf16>, vector<2x8x32xf32> -> vector<2x8x32xf32>
    "tpu.trace_stop"() : () -> ()
    %132 = vector.shape_cast %131 : vector<2x8x32xf32> to vector<16x32xf32>
    %133 = arith.truncf %132 : vector<16x32xf32> to vector<16x32xbf16>
    %c1_75 = arith.constant 1 : index
    %c0_76 = arith.constant 0 : index
    %c0_77 = arith.constant 0 : index
    %134 = vector.load %arg12[%c1_75, %c0_76, %c0_77] : memref<4x32x128xbf16, #tpu.memory_space<vmem>>, vector<1x32x128xbf16>
    %135 = vector.shape_cast %134 : vector<1x32x128xbf16> to vector<32x128xbf16>
    %cst_78 = arith.constant dense<0.000000e+00> : vector<16x128xf32>
    %136 = tpu.matmul %133, %135, %cst_78 {dimension_numbers = #tpu.dot_dimension_numbers<[1], [0], [0], [1], [0, 0, 1, 1], [], []>} : vector<16x32xbf16>, vector<32x128xbf16>, vector<16x128xf32> -> vector<16x128xf32>
    %137 = arith.addf %89, %136 : vector<16x128xf32>
    %c2 = arith.constant 2 : index
    %c0_79 = arith.constant 0 : index
    %c0_80 = arith.constant 0 : index
    %138 = vector.load %arg6[%c2, %c0_79, %c0_80] : memref<4x128x32xbf16, #tpu.memory_space<vmem>>, vector<1x128x32xbf16>
    %139 = vector.shape_cast %138 : vector<1x128x32xbf16> to vector<128x32xbf16>
    %cst_81 = arith.constant dense<0.000000e+00> : vector<16x32xf32>
    %140 = tpu.matmul %39, %139, %cst_81 {dimension_numbers = #tpu.dot_dimension_numbers<[1], [0], [0], [1], [0, 0, 1, 1], [], []>} : vector<16x128xbf16>, vector<128x32xbf16>, vector<16x32xf32> -> vector<16x32xf32>
    %c2_82 = arith.constant 2 : index
    %c0_83 = arith.constant 0 : index
    %c0_84 = arith.constant 0 : index
    %141 = vector.load %arg7[%c2_82, %c0_83, %c0_84] : memref<4x1x32xf32, #tpu.memory_space<vmem>>, vector<1x1x32xf32>
    %142 = vector.shape_cast %141 : vector<1x1x32xf32> to vector<1x32xf32>
    %143 = vector.broadcast %142 : vector<1x32xf32> to vector<16x32xf32>
    %144 = arith.addf %140, %143 : vector<16x32xf32>
    %c2_85 = arith.constant 2 : index
    %c0_86 = arith.constant 0 : index
    %c0_87 = arith.constant 0 : index
    %145 = vector.load %arg8[%c2_85, %c0_86, %c0_87] : memref<4x128x32xbf16, #tpu.memory_space<vmem>>, vector<1x128x32xbf16>
    %146 = vector.shape_cast %145 : vector<1x128x32xbf16> to vector<128x32xbf16>
    %cst_88 = arith.constant dense<0.000000e+00> : vector<16x32xf32>
    %147 = tpu.matmul %40, %146, %cst_88 {dimension_numbers = #tpu.dot_dimension_numbers<[1], [0], [0], [1], [0, 0, 1, 1], [], []>} : vector<16x128xbf16>, vector<128x32xbf16>, vector<16x32xf32> -> vector<16x32xf32>
    %c2_89 = arith.constant 2 : index
    %c0_90 = arith.constant 0 : index
    %c0_91 = arith.constant 0 : index
    %148 = vector.load %arg9[%c2_89, %c0_90, %c0_91] : memref<4x1x32xf32, #tpu.memory_space<vmem>>, vector<1x1x32xf32>
    %149 = vector.shape_cast %148 : vector<1x1x32xf32> to vector<1x32xf32>
    %150 = vector.broadcast %149 : vector<1x32xf32> to vector<16x32xf32>
    %151 = arith.addf %147, %150 : vector<16x32xf32>
    %c2_92 = arith.constant 2 : index
    %c0_93 = arith.constant 0 : index
    %c0_94 = arith.constant 0 : index
    %152 = vector.load %arg10[%c2_92, %c0_93, %c0_94] : memref<4x128x32xbf16, #tpu.memory_space<vmem>>, vector<1x128x32xbf16>
    %153 = vector.shape_cast %152 : vector<1x128x32xbf16> to vector<128x32xbf16>
    %cst_95 = arith.constant dense<0.000000e+00> : vector<16x32xf32>
    %154 = tpu.matmul %40, %153, %cst_95 {dimension_numbers = #tpu.dot_dimension_numbers<[1], [0], [0], [1], [0, 0, 1, 1], [], []>} : vector<16x128xbf16>, vector<128x32xbf16>, vector<16x32xf32> -> vector<16x32xf32>
    %c2_96 = arith.constant 2 : index
    %c0_97 = arith.constant 0 : index
    %c0_98 = arith.constant 0 : index
    %155 = vector.load %arg11[%c2_96, %c0_97, %c0_98] : memref<4x1x32xf32, #tpu.memory_space<vmem>>, vector<1x1x32xf32>
    %156 = vector.shape_cast %155 : vector<1x1x32xf32> to vector<1x32xf32>
    %157 = vector.broadcast %156 : vector<1x32xf32> to vector<16x32xf32>
    %158 = arith.addf %154, %157 : vector<16x32xf32>
    %159 = vector.shape_cast %144 : vector<16x32xf32> to vector<2x8x32xf32>
    %160 = arith.truncf %159 : vector<2x8x32xf32> to vector<2x8x32xbf16>
    %161 = vector.shape_cast %151 : vector<16x32xf32> to vector<2x8x32xf32>
    %162 = arith.truncf %161 : vector<2x8x32xf32> to vector<2x8x32xbf16>
    %163 = vector.shape_cast %158 : vector<16x32xf32> to vector<2x8x32xf32>
    %164 = arith.truncf %163 : vector<2x8x32xf32> to vector<2x8x32xbf16>
    "tpu.trace_start"() <{level = 10 : i32, message = "bqd,bkd->bqk"}> : () -> ()
    %cst_99 = arith.constant dense<0.000000e+00> : vector<2x8x8xf32>
    %165 = tpu.matmul %160, %162, %cst_99 {dimension_numbers = #tpu.dot_dimension_numbers<[2], [2], [1], [1], [0, 0, 0, 1, 1, 1], [0], [0]>} : vector<2x8x32xbf16>, vector<2x8x32xbf16>, vector<2x8x8xf32> -> vector<2x8x8xf32>
    "tpu.trace_stop"() : () -> ()
    %166 = vector.broadcast %10 : vector<1x8x8xf32> to vector<2x8x8xf32>
    %167 = arith.addf %165, %166 : vector<2x8x8xf32>
    %cst_100 = arith.constant dense<0xFF800000> : vector<2x8xf32>
    %168 = vector.multi_reduction <maximumf>, %167, %cst_100 [2] : vector<2x8x8xf32> to vector<2x8xf32>
    %169 = vector.shape_cast %168 : vector<2x8xf32> to vector<2x8x1xf32>
    %170 = vector.broadcast %169 : vector<2x8x1xf32> to vector<2x8x8xf32>
    %171 = arith.subf %167, %170 : vector<2x8x8xf32>
    %172 = math.exp %171 : vector<2x8x8xf32>
    %cst_101 = arith.constant dense<0.000000e+00> : vector<2x8xf32>
    %173 = vector.multi_reduction <add>, %172, %cst_101 [2] : vector<2x8x8xf32> to vector<2x8xf32>
    %174 = vector.shape_cast %173 : vector<2x8xf32> to vector<2x8x1xf32>
    %175 = tpu.reciprocal %174 {approx = true} : vector<2x8x1xf32> -> vector<2x8x1xf32>
    %176 = vector.broadcast %175 : vector<2x8x1xf32> to vector<2x8x8xf32>
    %177 = arith.mulf %172, %176 : vector<2x8x8xf32>
    %178 = arith.truncf %177 : vector<2x8x8xf32> to vector<2x8x8xbf16>
    "tpu.trace_start"() <{level = 10 : i32, message = "bqk,bkd->bqd"}> : () -> ()
    %cst_102 = arith.constant dense<0.000000e+00> : vector<2x8x32xf32>
    %179 = tpu.matmul %178, %164, %cst_102 {dimension_numbers = #tpu.dot_dimension_numbers<[2], [1], [1], [2], [0, 0, 0, 1, 1, 2], [0], [0]>} : vector<2x8x8xbf16>, vector<2x8x32xbf16>, vector<2x8x32xf32> -> vector<2x8x32xf32>
    "tpu.trace_stop"() : () -> ()
    %180 = vector.shape_cast %179 : vector<2x8x32xf32> to vector<16x32xf32>
    %181 = arith.truncf %180 : vector<16x32xf32> to vector<16x32xbf16>
    %c2_103 = arith.constant 2 : index
    %c0_104 = arith.constant 0 : index
    %c0_105 = arith.constant 0 : index
    %182 = vector.load %arg12[%c2_103, %c0_104, %c0_105] : memref<4x32x128xbf16, #tpu.memory_space<vmem>>, vector<1x32x128xbf16>
    %183 = vector.shape_cast %182 : vector<1x32x128xbf16> to vector<32x128xbf16>
    %cst_106 = arith.constant dense<0.000000e+00> : vector<16x128xf32>
    %184 = tpu.matmul %181, %183, %cst_106 {dimension_numbers = #tpu.dot_dimension_numbers<[1], [0], [0], [1], [0, 0, 1, 1], [], []>} : vector<16x32xbf16>, vector<32x128xbf16>, vector<16x128xf32> -> vector<16x128xf32>
    %185 = arith.addf %137, %184 : vector<16x128xf32>
    %c3 = arith.constant 3 : index
    %c0_107 = arith.constant 0 : index
    %c0_108 = arith.constant 0 : index
    %186 = vector.load %arg6[%c3, %c0_107, %c0_108] : memref<4x128x32xbf16, #tpu.memory_space<vmem>>, vector<1x128x32xbf16>
    %187 = vector.shape_cast %186 : vector<1x128x32xbf16> to vector<128x32xbf16>
    %cst_109 = arith.constant dense<0.000000e+00> : vector<16x32xf32>
    %188 = tpu.matmul %39, %187, %cst_109 {dimension_numbers = #tpu.dot_dimension_numbers<[1], [0], [0], [1], [0, 0, 1, 1], [], []>} : vector<16x128xbf16>, vector<128x32xbf16>, vector<16x32xf32> -> vector<16x32xf32>
    %c3_110 = arith.constant 3 : index
    %c0_111 = arith.constant 0 : index
    %c0_112 = arith.constant 0 : index
    %189 = vector.load %arg7[%c3_110, %c0_111, %c0_112] : memref<4x1x32xf32, #tpu.memory_space<vmem>>, vector<1x1x32xf32>
    %190 = vector.shape_cast %189 : vector<1x1x32xf32> to vector<1x32xf32>
    %191 = vector.broadcast %190 : vector<1x32xf32> to vector<16x32xf32>
    %192 = arith.addf %188, %191 : vector<16x32xf32>
    %c3_113 = arith.constant 3 : index
    %c0_114 = arith.constant 0 : index
    %c0_115 = arith.constant 0 : index
    %193 = vector.load %arg8[%c3_113, %c0_114, %c0_115] : memref<4x128x32xbf16, #tpu.memory_space<vmem>>, vector<1x128x32xbf16>
    %194 = vector.shape_cast %193 : vector<1x128x32xbf16> to vector<128x32xbf16>
    %cst_116 = arith.constant dense<0.000000e+00> : vector<16x32xf32>
    %195 = tpu.matmul %40, %194, %cst_116 {dimension_numbers = #tpu.dot_dimension_numbers<[1], [0], [0], [1], [0, 0, 1, 1], [], []>} : vector<16x128xbf16>, vector<128x32xbf16>, vector<16x32xf32> -> vector<16x32xf32>
    %c3_117 = arith.constant 3 : index
    %c0_118 = arith.constant 0 : index
    %c0_119 = arith.constant 0 : index
    %196 = vector.load %arg9[%c3_117, %c0_118, %c0_119] : memref<4x1x32xf32, #tpu.memory_space<vmem>>, vector<1x1x32xf32>
    %197 = vector.shape_cast %196 : vector<1x1x32xf32> to vector<1x32xf32>
    %198 = vector.broadcast %197 : vector<1x32xf32> to vector<16x32xf32>
    %199 = arith.addf %195, %198 : vector<16x32xf32>
    %c3_120 = arith.constant 3 : index
    %c0_121 = arith.constant 0 : index
    %c0_122 = arith.constant 0 : index
    %200 = vector.load %arg10[%c3_120, %c0_121, %c0_122] : memref<4x128x32xbf16, #tpu.memory_space<vmem>>, vector<1x128x32xbf16>
    %201 = vector.shape_cast %200 : vector<1x128x32xbf16> to vector<128x32xbf16>
    %cst_123 = arith.constant dense<0.000000e+00> : vector<16x32xf32>
    %202 = tpu.matmul %40, %201, %cst_123 {dimension_numbers = #tpu.dot_dimension_numbers<[1], [0], [0], [1], [0, 0, 1, 1], [], []>} : vector<16x128xbf16>, vector<128x32xbf16>, vector<16x32xf32> -> vector<16x32xf32>
    %c3_124 = arith.constant 3 : index
    %c0_125 = arith.constant 0 : index
    %c0_126 = arith.constant 0 : index
    %203 = vector.load %arg11[%c3_124, %c0_125, %c0_126] : memref<4x1x32xf32, #tpu.memory_space<vmem>>, vector<1x1x32xf32>
    %204 = vector.shape_cast %203 : vector<1x1x32xf32> to vector<1x32xf32>
    %205 = vector.broadcast %204 : vector<1x32xf32> to vector<16x32xf32>
    %206 = arith.addf %202, %205 : vector<16x32xf32>
    %207 = vector.shape_cast %192 : vector<16x32xf32> to vector<2x8x32xf32>
    %208 = arith.truncf %207 : vector<2x8x32xf32> to vector<2x8x32xbf16>
    %209 = vector.shape_cast %199 : vector<16x32xf32> to vector<2x8x32xf32>
    %210 = arith.truncf %209 : vector<2x8x32xf32> to vector<2x8x32xbf16>
    %211 = vector.shape_cast %206 : vector<16x32xf32> to vector<2x8x32xf32>
    %212 = arith.truncf %211 : vector<2x8x32xf32> to vector<2x8x32xbf16>
    "tpu.trace_start"() <{level = 10 : i32, message = "bqd,bkd->bqk"}> : () -> ()
    %cst_127 = arith.constant dense<0.000000e+00> : vector<2x8x8xf32>
    %213 = tpu.matmul %208, %210, %cst_127 {dimension_numbers = #tpu.dot_dimension_numbers<[2], [2], [1], [1], [0, 0, 0, 1, 1, 1], [0], [0]>} : vector<2x8x32xbf16>, vector<2x8x32xbf16>, vector<2x8x8xf32> -> vector<2x8x8xf32>
    "tpu.trace_stop"() : () -> ()
    %214 = vector.broadcast %10 : vector<1x8x8xf32> to vector<2x8x8xf32>
    %215 = arith.addf %213, %214 : vector<2x8x8xf32>
    %cst_128 = arith.constant dense<0xFF800000> : vector<2x8xf32>
    %216 = vector.multi_reduction <maximumf>, %215, %cst_128 [2] : vector<2x8x8xf32> to vector<2x8xf32>
    %217 = vector.shape_cast %216 : vector<2x8xf32> to vector<2x8x1xf32>
    %218 = vector.broadcast %217 : vector<2x8x1xf32> to vector<2x8x8xf32>
    %219 = arith.subf %215, %218 : vector<2x8x8xf32>
    %220 = math.exp %219 : vector<2x8x8xf32>
    %cst_129 = arith.constant dense<0.000000e+00> : vector<2x8xf32>
    %221 = vector.multi_reduction <add>, %220, %cst_129 [2] : vector<2x8x8xf32> to vector<2x8xf32>
    %222 = vector.shape_cast %221 : vector<2x8xf32> to vector<2x8x1xf32>
    %223 = tpu.reciprocal %222 {approx = true} : vector<2x8x1xf32> -> vector<2x8x1xf32>
    %224 = vector.broadcast %223 : vector<2x8x1xf32> to vector<2x8x8xf32>
    %225 = arith.mulf %220, %224 : vector<2x8x8xf32>
    %226 = arith.truncf %225 : vector<2x8x8xf32> to vector<2x8x8xbf16>
    "tpu.trace_start"() <{level = 10 : i32, message = "bqk,bkd->bqd"}> : () -> ()
    %cst_130 = arith.constant dense<0.000000e+00> : vector<2x8x32xf32>
    %227 = tpu.matmul %226, %212, %cst_130 {dimension_numbers = #tpu.dot_dimension_numbers<[2], [1], [1], [2], [0, 0, 0, 1, 1, 2], [0], [0]>} : vector<2x8x8xbf16>, vector<2x8x32xbf16>, vector<2x8x32xf32> -> vector<2x8x32xf32>
    "tpu.trace_stop"() : () -> ()
    %228 = vector.shape_cast %227 : vector<2x8x32xf32> to vector<16x32xf32>
    %229 = arith.truncf %228 : vector<16x32xf32> to vector<16x32xbf16>
    %c3_131 = arith.constant 3 : index
    %c0_132 = arith.constant 0 : index
    %c0_133 = arith.constant 0 : index
    %230 = vector.load %arg12[%c3_131, %c0_132, %c0_133] : memref<4x32x128xbf16, #tpu.memory_space<vmem>>, vector<1x32x128xbf16>
    %231 = vector.shape_cast %230 : vector<1x32x128xbf16> to vector<32x128xbf16>
    %cst_134 = arith.constant dense<0.000000e+00> : vector<16x128xf32>
    %232 = tpu.matmul %229, %231, %cst_134 {dimension_numbers = #tpu.dot_dimension_numbers<[1], [0], [0], [1], [0, 0, 1, 1], [], []>} : vector<16x32xbf16>, vector<32x128xbf16>, vector<16x128xf32> -> vector<16x128xf32>
    %233 = arith.addf %185, %232 : vector<16x128xf32>
    %c0_135 = arith.constant 0 : index
    %c0_136 = arith.constant 0 : index
    %234 = vector.load %arg13[%c0_135, %c0_136] : memref<1x128xf32, #tpu.memory_space<vmem>>, vector<1x128xf32>
    %235 = vector.broadcast %234 : vector<1x128xf32> to vector<16x128xf32>
    %236 = arith.addf %233, %235 : vector<16x128xf32>
    %237 = arith.addf %1, %236 : vector<16x128xf32>
    %cst_137 = arith.constant dense<0.000000e+00> : vector<16xf32>
    %238 = vector.multi_reduction <add>, %237, %cst_137 [1] : vector<16x128xf32> to vector<16xf32>
    %239 = vector.shape_cast %238 : vector<16xf32> to vector<16x1xf32>
    %cst_138 = arith.constant 1.280000e+02 : f32
    %240 = vector.broadcast %cst_138 : f32 to vector<16x1xf32>
    %241 = arith.divf %239, %240 : vector<16x1xf32>
    %242 = vector.broadcast %241 : vector<16x1xf32> to vector<16x128xf32>
    %243 = arith.subf %237, %242 : vector<16x128xf32>
    %244 = arith.mulf %243, %243 : vector<16x128xf32>
    %cst_139 = arith.constant dense<0.000000e+00> : vector<16xf32>
    %245 = vector.multi_reduction <add>, %244, %cst_139 [1] : vector<16x128xf32> to vector<16xf32>
    %246 = vector.shape_cast %245 : vector<16xf32> to vector<16x1xf32>
    %cst_140 = arith.constant 0.00787401571 : f32
    %247 = vector.broadcast %cst_140 : f32 to vector<16x1xf32>
    %248 = arith.mulf %246, %247 : vector<16x1xf32>
    %c0_141 = arith.constant 0 : index
    %c0_142 = arith.constant 0 : index
    %249 = vector.load %arg14[%c0_141, %c0_142] : memref<1x128xf32, #tpu.memory_space<vmem>>, vector<1x128xf32>
    %250 = vector.broadcast %249 : vector<1x128xf32> to vector<16x128xf32>
    %251 = arith.mulf %250, %243 : vector<16x128xf32>
    %252 = math.sqrt %248 : vector<16x1xf32>
    %cst_143 = arith.constant 9.99999974E-6 : f32
    %253 = vector.broadcast %cst_143 : f32 to vector<16x1xf32>
    %254 = arith.addf %252, %253 : vector<16x1xf32>
    %255 = vector.broadcast %254 : vector<16x1xf32> to vector<16x128xf32>
    %256 = arith.divf %251, %255 : vector<16x128xf32>
    %c0_144 = arith.constant 0 : index
    %c0_145 = arith.constant 0 : index
    %257 = vector.load %arg15[%c0_144, %c0_145] : memref<1x128xf32, #tpu.memory_space<vmem>>, vector<1x128xf32>
    %258 = vector.broadcast %257 : vector<1x128xf32> to vector<16x128xf32>
    %259 = arith.addf %256, %258 : vector<16x128xf32>
    %260 = arith.truncf %259 : vector<16x128xf32> to vector<16x128xbf16>
    %261 = arith.truncf %3 : vector<32x128xf32> to vector<32x128xbf16>
    %cst_146 = arith.constant 0.000000e+00 : f32
    %262 = vector.broadcast %cst_146 : f32 to vector<16x128xf32>
    %c0_147 = arith.constant 0 : index
    %c0_148 = arith.constant 0 : index
    %c0_149 = arith.constant 0 : index
    %263 = vector.load %arg16[%c0_147, %c0_148, %c0_149] : memref<4x128x32xbf16, #tpu.memory_space<vmem>>, vector<1x128x32xbf16>
    %264 = vector.shape_cast %263 : vector<1x128x32xbf16> to vector<128x32xbf16>
    %cst_150 = arith.constant dense<0.000000e+00> : vector<16x32xf32>
    %265 = tpu.matmul %260, %264, %cst_150 {dimension_numbers = #tpu.dot_dimension_numbers<[1], [0], [0], [1], [0, 0, 1, 1], [], []>} : vector<16x128xbf16>, vector<128x32xbf16>, vector<16x32xf32> -> vector<16x32xf32>
    %c0_151 = arith.constant 0 : index
    %c0_152 = arith.constant 0 : index
    %c0_153 = arith.constant 0 : index
    %266 = vector.load %arg17[%c0_151, %c0_152, %c0_153] : memref<4x1x32xf32, #tpu.memory_space<vmem>>, vector<1x1x32xf32>
    %267 = vector.shape_cast %266 : vector<1x1x32xf32> to vector<1x32xf32>
    %268 = vector.broadcast %267 : vector<1x32xf32> to vector<16x32xf32>
    %269 = arith.addf %265, %268 : vector<16x32xf32>
    %c0_154 = arith.constant 0 : index
    %c0_155 = arith.constant 0 : index
    %c0_156 = arith.constant 0 : index
    %270 = vector.load %arg18[%c0_154, %c0_155, %c0_156] : memref<4x128x32xbf16, #tpu.memory_space<vmem>>, vector<1x128x32xbf16>
    %271 = vector.shape_cast %270 : vector<1x128x32xbf16> to vector<128x32xbf16>
    %cst_157 = arith.constant dense<0.000000e+00> : vector<32x32xf32>
    %272 = tpu.matmul %261, %271, %cst_157 {dimension_numbers = #tpu.dot_dimension_numbers<[1], [0], [0], [1], [0, 0, 1, 1], [], []>} : vector<32x128xbf16>, vector<128x32xbf16>, vector<32x32xf32> -> vector<32x32xf32>
    %c0_158 = arith.constant 0 : index
    %c0_159 = arith.constant 0 : index
    %c0_160 = arith.constant 0 : index
    %273 = vector.load %arg19[%c0_158, %c0_159, %c0_160] : memref<4x1x32xf32, #tpu.memory_space<vmem>>, vector<1x1x32xf32>
    %274 = vector.shape_cast %273 : vector<1x1x32xf32> to vector<1x32xf32>
    %275 = vector.broadcast %274 : vector<1x32xf32> to vector<32x32xf32>
    %276 = arith.addf %272, %275 : vector<32x32xf32>
    %c0_161 = arith.constant 0 : index
    %c0_162 = arith.constant 0 : index
    %c0_163 = arith.constant 0 : index
    %277 = vector.load %arg20[%c0_161, %c0_162, %c0_163] : memref<4x128x32xbf16, #tpu.memory_space<vmem>>, vector<1x128x32xbf16>
    %278 = vector.shape_cast %277 : vector<1x128x32xbf16> to vector<128x32xbf16>
    %cst_164 = arith.constant dense<0.000000e+00> : vector<32x32xf32>
    %279 = tpu.matmul %261, %278, %cst_164 {dimension_numbers = #tpu.dot_dimension_numbers<[1], [0], [0], [1], [0, 0, 1, 1], [], []>} : vector<32x128xbf16>, vector<128x32xbf16>, vector<32x32xf32> -> vector<32x32xf32>
    %c0_165 = arith.constant 0 : index
    %c0_166 = arith.constant 0 : index
    %c0_167 = arith.constant 0 : index
    %280 = vector.load %arg21[%c0_165, %c0_166, %c0_167] : memref<4x1x32xf32, #tpu.memory_space<vmem>>, vector<1x1x32xf32>
    %281 = vector.shape_cast %280 : vector<1x1x32xf32> to vector<1x32xf32>
    %282 = vector.broadcast %281 : vector<1x32xf32> to vector<32x32xf32>
    %283 = arith.addf %279, %282 : vector<32x32xf32>
    %284 = vector.shape_cast %269 : vector<16x32xf32> to vector<2x8x32xf32>
    %285 = arith.truncf %284 : vector<2x8x32xf32> to vector<2x8x32xbf16>
    %286 = vector.shape_cast %276 : vector<32x32xf32> to vector<2x16x32xf32>
    %287 = arith.truncf %286 : vector<2x16x32xf32> to vector<2x16x32xbf16>
    %288 = vector.shape_cast %283 : vector<32x32xf32> to vector<2x16x32xf32>
    %289 = arith.truncf %288 : vector<2x16x32xf32> to vector<2x16x32xbf16>
    "tpu.trace_start"() <{level = 10 : i32, message = "bqd,bkd->bqk"}> : () -> ()
    %cst_168 = arith.constant dense<0.000000e+00> : vector<2x8x16xf32>
    %290 = tpu.matmul %285, %287, %cst_168 {dimension_numbers = #tpu.dot_dimension_numbers<[2], [2], [1], [1], [0, 0, 0, 1, 1, 1], [0], [0]>} : vector<2x8x32xbf16>, vector<2x16x32xbf16>, vector<2x8x16xf32> -> vector<2x8x16xf32>
    "tpu.trace_stop"() : () -> ()
    %291 = vector.broadcast %16 : vector<2x1x16xf32> to vector<2x8x16xf32>
    %292 = arith.addf %290, %291 : vector<2x8x16xf32>
    %cst_169 = arith.constant dense<0xFF800000> : vector<2x8xf32>
    %293 = vector.multi_reduction <maximumf>, %292, %cst_169 [2] : vector<2x8x16xf32> to vector<2x8xf32>
    %294 = vector.shape_cast %293 : vector<2x8xf32> to vector<2x8x1xf32>
    %295 = vector.broadcast %294 : vector<2x8x1xf32> to vector<2x8x16xf32>
    %296 = arith.subf %292, %295 : vector<2x8x16xf32>
    %297 = math.exp %296 : vector<2x8x16xf32>
    %cst_170 = arith.constant dense<0.000000e+00> : vector<2x8xf32>
    %298 = vector.multi_reduction <add>, %297, %cst_170 [2] : vector<2x8x16xf32> to vector<2x8xf32>
    %299 = vector.shape_cast %298 : vector<2x8xf32> to vector<2x8x1xf32>
    %300 = tpu.reciprocal %299 {approx = true} : vector<2x8x1xf32> -> vector<2x8x1xf32>
    %301 = vector.broadcast %300 : vector<2x8x1xf32> to vector<2x8x16xf32>
    %302 = arith.mulf %297, %301 : vector<2x8x16xf32>
    %303 = arith.truncf %302 : vector<2x8x16xf32> to vector<2x8x16xbf16>
    "tpu.trace_start"() <{level = 10 : i32, message = "bqk,bkd->bqd"}> : () -> ()
    %cst_171 = arith.constant dense<0.000000e+00> : vector<2x8x32xf32>
    %304 = tpu.matmul %303, %289, %cst_171 {dimension_numbers = #tpu.dot_dimension_numbers<[2], [1], [1], [2], [0, 0, 0, 1, 1, 2], [0], [0]>} : vector<2x8x16xbf16>, vector<2x16x32xbf16>, vector<2x8x32xf32> -> vector<2x8x32xf32>
    "tpu.trace_stop"() : () -> ()
    %305 = vector.shape_cast %304 : vector<2x8x32xf32> to vector<16x32xf32>
    %306 = arith.truncf %305 : vector<16x32xf32> to vector<16x32xbf16>
    %c0_172 = arith.constant 0 : index
    %c0_173 = arith.constant 0 : index
    %c0_174 = arith.constant 0 : index
    %307 = vector.load %arg22[%c0_172, %c0_173, %c0_174] : memref<4x32x128xbf16, #tpu.memory_space<vmem>>, vector<1x32x128xbf16>
    %308 = vector.shape_cast %307 : vector<1x32x128xbf16> to vector<32x128xbf16>
    %cst_175 = arith.constant dense<0.000000e+00> : vector<16x128xf32>
    %309 = tpu.matmul %306, %308, %cst_175 {dimension_numbers = #tpu.dot_dimension_numbers<[1], [0], [0], [1], [0, 0, 1, 1], [], []>} : vector<16x32xbf16>, vector<32x128xbf16>, vector<16x128xf32> -> vector<16x128xf32>
    %310 = arith.addf %262, %309 : vector<16x128xf32>
    %c1_176 = arith.constant 1 : index
    %c0_177 = arith.constant 0 : index
    %c0_178 = arith.constant 0 : index
    %311 = vector.load %arg16[%c1_176, %c0_177, %c0_178] : memref<4x128x32xbf16, #tpu.memory_space<vmem>>, vector<1x128x32xbf16>
    %312 = vector.shape_cast %311 : vector<1x128x32xbf16> to vector<128x32xbf16>
    %cst_179 = arith.constant dense<0.000000e+00> : vector<16x32xf32>
    %313 = tpu.matmul %260, %312, %cst_179 {dimension_numbers = #tpu.dot_dimension_numbers<[1], [0], [0], [1], [0, 0, 1, 1], [], []>} : vector<16x128xbf16>, vector<128x32xbf16>, vector<16x32xf32> -> vector<16x32xf32>
    %c1_180 = arith.constant 1 : index
    %c0_181 = arith.constant 0 : index
    %c0_182 = arith.constant 0 : index
    %314 = vector.load %arg17[%c1_180, %c0_181, %c0_182] : memref<4x1x32xf32, #tpu.memory_space<vmem>>, vector<1x1x32xf32>
    %315 = vector.shape_cast %314 : vector<1x1x32xf32> to vector<1x32xf32>
    %316 = vector.broadcast %315 : vector<1x32xf32> to vector<16x32xf32>
    %317 = arith.addf %313, %316 : vector<16x32xf32>
    %c1_183 = arith.constant 1 : index
    %c0_184 = arith.constant 0 : index
    %c0_185 = arith.constant 0 : index
    %318 = vector.load %arg18[%c1_183, %c0_184, %c0_185] : memref<4x128x32xbf16, #tpu.memory_space<vmem>>, vector<1x128x32xbf16>
    %319 = vector.shape_cast %318 : vector<1x128x32xbf16> to vector<128x32xbf16>
    %cst_186 = arith.constant dense<0.000000e+00> : vector<32x32xf32>
    %320 = tpu.matmul %261, %319, %cst_186 {dimension_numbers = #tpu.dot_dimension_numbers<[1], [0], [0], [1], [0, 0, 1, 1], [], []>} : vector<32x128xbf16>, vector<128x32xbf16>, vector<32x32xf32> -> vector<32x32xf32>
    %c1_187 = arith.constant 1 : index
    %c0_188 = arith.constant 0 : index
    %c0_189 = arith.constant 0 : index
    %321 = vector.load %arg19[%c1_187, %c0_188, %c0_189] : memref<4x1x32xf32, #tpu.memory_space<vmem>>, vector<1x1x32xf32>
    %322 = vector.shape_cast %321 : vector<1x1x32xf32> to vector<1x32xf32>
    %323 = vector.broadcast %322 : vector<1x32xf32> to vector<32x32xf32>
    %324 = arith.addf %320, %323 : vector<32x32xf32>
    %c1_190 = arith.constant 1 : index
    %c0_191 = arith.constant 0 : index
    %c0_192 = arith.constant 0 : index
    %325 = vector.load %arg20[%c1_190, %c0_191, %c0_192] : memref<4x128x32xbf16, #tpu.memory_space<vmem>>, vector<1x128x32xbf16>
    %326 = vector.shape_cast %325 : vector<1x128x32xbf16> to vector<128x32xbf16>
    %cst_193 = arith.constant dense<0.000000e+00> : vector<32x32xf32>
    %327 = tpu.matmul %261, %326, %cst_193 {dimension_numbers = #tpu.dot_dimension_numbers<[1], [0], [0], [1], [0, 0, 1, 1], [], []>} : vector<32x128xbf16>, vector<128x32xbf16>, vector<32x32xf32> -> vector<32x32xf32>
    %c1_194 = arith.constant 1 : index
    %c0_195 = arith.constant 0 : index
    %c0_196 = arith.constant 0 : index
    %328 = vector.load %arg21[%c1_194, %c0_195, %c0_196] : memref<4x1x32xf32, #tpu.memory_space<vmem>>, vector<1x1x32xf32>
    %329 = vector.shape_cast %328 : vector<1x1x32xf32> to vector<1x32xf32>
    %330 = vector.broadcast %329 : vector<1x32xf32> to vector<32x32xf32>
    %331 = arith.addf %327, %330 : vector<32x32xf32>
    %332 = vector.shape_cast %317 : vector<16x32xf32> to vector<2x8x32xf32>
    %333 = arith.truncf %332 : vector<2x8x32xf32> to vector<2x8x32xbf16>
    %334 = vector.shape_cast %324 : vector<32x32xf32> to vector<2x16x32xf32>
    %335 = arith.truncf %334 : vector<2x16x32xf32> to vector<2x16x32xbf16>
    %336 = vector.shape_cast %331 : vector<32x32xf32> to vector<2x16x32xf32>
    %337 = arith.truncf %336 : vector<2x16x32xf32> to vector<2x16x32xbf16>
    "tpu.trace_start"() <{level = 10 : i32, message = "bqd,bkd->bqk"}> : () -> ()
    %cst_197 = arith.constant dense<0.000000e+00> : vector<2x8x16xf32>
    %338 = tpu.matmul %333, %335, %cst_197 {dimension_numbers = #tpu.dot_dimension_numbers<[2], [2], [1], [1], [0, 0, 0, 1, 1, 1], [0], [0]>} : vector<2x8x32xbf16>, vector<2x16x32xbf16>, vector<2x8x16xf32> -> vector<2x8x16xf32>
    "tpu.trace_stop"() : () -> ()
    %339 = vector.broadcast %16 : vector<2x1x16xf32> to vector<2x8x16xf32>
    %340 = arith.addf %338, %339 : vector<2x8x16xf32>
    %cst_198 = arith.constant dense<0xFF800000> : vector<2x8xf32>
    %341 = vector.multi_reduction <maximumf>, %340, %cst_198 [2] : vector<2x8x16xf32> to vector<2x8xf32>
    %342 = vector.shape_cast %341 : vector<2x8xf32> to vector<2x8x1xf32>
    %343 = vector.broadcast %342 : vector<2x8x1xf32> to vector<2x8x16xf32>
    %344 = arith.subf %340, %343 : vector<2x8x16xf32>
    %345 = math.exp %344 : vector<2x8x16xf32>
    %cst_199 = arith.constant dense<0.000000e+00> : vector<2x8xf32>
    %346 = vector.multi_reduction <add>, %345, %cst_199 [2] : vector<2x8x16xf32> to vector<2x8xf32>
    %347 = vector.shape_cast %346 : vector<2x8xf32> to vector<2x8x1xf32>
    %348 = tpu.reciprocal %347 {approx = true} : vector<2x8x1xf32> -> vector<2x8x1xf32>
    %349 = vector.broadcast %348 : vector<2x8x1xf32> to vector<2x8x16xf32>
    %350 = arith.mulf %345, %349 : vector<2x8x16xf32>
    %351 = arith.truncf %350 : vector<2x8x16xf32> to vector<2x8x16xbf16>
    "tpu.trace_start"() <{level = 10 : i32, message = "bqk,bkd->bqd"}> : () -> ()
    %cst_200 = arith.constant dense<0.000000e+00> : vector<2x8x32xf32>
    %352 = tpu.matmul %351, %337, %cst_200 {dimension_numbers = #tpu.dot_dimension_numbers<[2], [1], [1], [2], [0, 0, 0, 1, 1, 2], [0], [0]>} : vector<2x8x16xbf16>, vector<2x16x32xbf16>, vector<2x8x32xf32> -> vector<2x8x32xf32>
    "tpu.trace_stop"() : () -> ()
    %353 = vector.shape_cast %352 : vector<2x8x32xf32> to vector<16x32xf32>
    %354 = arith.truncf %353 : vector<16x32xf32> to vector<16x32xbf16>
    %c1_201 = arith.constant 1 : index
    %c0_202 = arith.constant 0 : index
    %c0_203 = arith.constant 0 : index
    %355 = vector.load %arg22[%c1_201, %c0_202, %c0_203] : memref<4x32x128xbf16, #tpu.memory_space<vmem>>, vector<1x32x128xbf16>
    %356 = vector.shape_cast %355 : vector<1x32x128xbf16> to vector<32x128xbf16>
    %cst_204 = arith.constant dense<0.000000e+00> : vector<16x128xf32>
    %357 = tpu.matmul %354, %356, %cst_204 {dimension_numbers = #tpu.dot_dimension_numbers<[1], [0], [0], [1], [0, 0, 1, 1], [], []>} : vector<16x32xbf16>, vector<32x128xbf16>, vector<16x128xf32> -> vector<16x128xf32>
    %358 = arith.addf %310, %357 : vector<16x128xf32>
    %c2_205 = arith.constant 2 : index
    %c0_206 = arith.constant 0 : index
    %c0_207 = arith.constant 0 : index
    %359 = vector.load %arg16[%c2_205, %c0_206, %c0_207] : memref<4x128x32xbf16, #tpu.memory_space<vmem>>, vector<1x128x32xbf16>
    %360 = vector.shape_cast %359 : vector<1x128x32xbf16> to vector<128x32xbf16>
    %cst_208 = arith.constant dense<0.000000e+00> : vector<16x32xf32>
    %361 = tpu.matmul %260, %360, %cst_208 {dimension_numbers = #tpu.dot_dimension_numbers<[1], [0], [0], [1], [0, 0, 1, 1], [], []>} : vector<16x128xbf16>, vector<128x32xbf16>, vector<16x32xf32> -> vector<16x32xf32>
    %c2_209 = arith.constant 2 : index
    %c0_210 = arith.constant 0 : index
    %c0_211 = arith.constant 0 : index
    %362 = vector.load %arg17[%c2_209, %c0_210, %c0_211] : memref<4x1x32xf32, #tpu.memory_space<vmem>>, vector<1x1x32xf32>
    %363 = vector.shape_cast %362 : vector<1x1x32xf32> to vector<1x32xf32>
    %364 = vector.broadcast %363 : vector<1x32xf32> to vector<16x32xf32>
    %365 = arith.addf %361, %364 : vector<16x32xf32>
    %c2_212 = arith.constant 2 : index
    %c0_213 = arith.constant 0 : index
    %c0_214 = arith.constant 0 : index
    %366 = vector.load %arg18[%c2_212, %c0_213, %c0_214] : memref<4x128x32xbf16, #tpu.memory_space<vmem>>, vector<1x128x32xbf16>
    %367 = vector.shape_cast %366 : vector<1x128x32xbf16> to vector<128x32xbf16>
    %cst_215 = arith.constant dense<0.000000e+00> : vector<32x32xf32>
    %368 = tpu.matmul %261, %367, %cst_215 {dimension_numbers = #tpu.dot_dimension_numbers<[1], [0], [0], [1], [0, 0, 1, 1], [], []>} : vector<32x128xbf16>, vector<128x32xbf16>, vector<32x32xf32> -> vector<32x32xf32>
    %c2_216 = arith.constant 2 : index
    %c0_217 = arith.constant 0 : index
    %c0_218 = arith.constant 0 : index
    %369 = vector.load %arg19[%c2_216, %c0_217, %c0_218] : memref<4x1x32xf32, #tpu.memory_space<vmem>>, vector<1x1x32xf32>
    %370 = vector.shape_cast %369 : vector<1x1x32xf32> to vector<1x32xf32>
    %371 = vector.broadcast %370 : vector<1x32xf32> to vector<32x32xf32>
    %372 = arith.addf %368, %371 : vector<32x32xf32>
    %c2_219 = arith.constant 2 : index
    %c0_220 = arith.constant 0 : index
    %c0_221 = arith.constant 0 : index
    %373 = vector.load %arg20[%c2_219, %c0_220, %c0_221] : memref<4x128x32xbf16, #tpu.memory_space<vmem>>, vector<1x128x32xbf16>
    %374 = vector.shape_cast %373 : vector<1x128x32xbf16> to vector<128x32xbf16>
    %cst_222 = arith.constant dense<0.000000e+00> : vector<32x32xf32>
    %375 = tpu.matmul %261, %374, %cst_222 {dimension_numbers = #tpu.dot_dimension_numbers<[1], [0], [0], [1], [0, 0, 1, 1], [], []>} : vector<32x128xbf16>, vector<128x32xbf16>, vector<32x32xf32> -> vector<32x32xf32>
    %c2_223 = arith.constant 2 : index
    %c0_224 = arith.constant 0 : index
    %c0_225 = arith.constant 0 : index
    %376 = vector.load %arg21[%c2_223, %c0_224, %c0_225] : memref<4x1x32xf32, #tpu.memory_space<vmem>>, vector<1x1x32xf32>
    %377 = vector.shape_cast %376 : vector<1x1x32xf32> to vector<1x32xf32>
    %378 = vector.broadcast %377 : vector<1x32xf32> to vector<32x32xf32>
    %379 = arith.addf %375, %378 : vector<32x32xf32>
    %380 = vector.shape_cast %365 : vector<16x32xf32> to vector<2x8x32xf32>
    %381 = arith.truncf %380 : vector<2x8x32xf32> to vector<2x8x32xbf16>
    %382 = vector.shape_cast %372 : vector<32x32xf32> to vector<2x16x32xf32>
    %383 = arith.truncf %382 : vector<2x16x32xf32> to vector<2x16x32xbf16>
    %384 = vector.shape_cast %379 : vector<32x32xf32> to vector<2x16x32xf32>
    %385 = arith.truncf %384 : vector<2x16x32xf32> to vector<2x16x32xbf16>
    "tpu.trace_start"() <{level = 10 : i32, message = "bqd,bkd->bqk"}> : () -> ()
    %cst_226 = arith.constant dense<0.000000e+00> : vector<2x8x16xf32>
    %386 = tpu.matmul %381, %383, %cst_226 {dimension_numbers = #tpu.dot_dimension_numbers<[2], [2], [1], [1], [0, 0, 0, 1, 1, 1], [0], [0]>} : vector<2x8x32xbf16>, vector<2x16x32xbf16>, vector<2x8x16xf32> -> vector<2x8x16xf32>
    "tpu.trace_stop"() : () -> ()
    %387 = vector.broadcast %16 : vector<2x1x16xf32> to vector<2x8x16xf32>
    %388 = arith.addf %386, %387 : vector<2x8x16xf32>
    %cst_227 = arith.constant dense<0xFF800000> : vector<2x8xf32>
    %389 = vector.multi_reduction <maximumf>, %388, %cst_227 [2] : vector<2x8x16xf32> to vector<2x8xf32>
    %390 = vector.shape_cast %389 : vector<2x8xf32> to vector<2x8x1xf32>
    %391 = vector.broadcast %390 : vector<2x8x1xf32> to vector<2x8x16xf32>
    %392 = arith.subf %388, %391 : vector<2x8x16xf32>
    %393 = math.exp %392 : vector<2x8x16xf32>
    %cst_228 = arith.constant dense<0.000000e+00> : vector<2x8xf32>
    %394 = vector.multi_reduction <add>, %393, %cst_228 [2] : vector<2x8x16xf32> to vector<2x8xf32>
    %395 = vector.shape_cast %394 : vector<2x8xf32> to vector<2x8x1xf32>
    %396 = tpu.reciprocal %395 {approx = true} : vector<2x8x1xf32> -> vector<2x8x1xf32>
    %397 = vector.broadcast %396 : vector<2x8x1xf32> to vector<2x8x16xf32>
    %398 = arith.mulf %393, %397 : vector<2x8x16xf32>
    %399 = arith.truncf %398 : vector<2x8x16xf32> to vector<2x8x16xbf16>
    "tpu.trace_start"() <{level = 10 : i32, message = "bqk,bkd->bqd"}> : () -> ()
    %cst_229 = arith.constant dense<0.000000e+00> : vector<2x8x32xf32>
    %400 = tpu.matmul %399, %385, %cst_229 {dimension_numbers = #tpu.dot_dimension_numbers<[2], [1], [1], [2], [0, 0, 0, 1, 1, 2], [0], [0]>} : vector<2x8x16xbf16>, vector<2x16x32xbf16>, vector<2x8x32xf32> -> vector<2x8x32xf32>
    "tpu.trace_stop"() : () -> ()
    %401 = vector.shape_cast %400 : vector<2x8x32xf32> to vector<16x32xf32>
    %402 = arith.truncf %401 : vector<16x32xf32> to vector<16x32xbf16>
    %c2_230 = arith.constant 2 : index
    %c0_231 = arith.constant 0 : index
    %c0_232 = arith.constant 0 : index
    %403 = vector.load %arg22[%c2_230, %c0_231, %c0_232] : memref<4x32x128xbf16, #tpu.memory_space<vmem>>, vector<1x32x128xbf16>
    %404 = vector.shape_cast %403 : vector<1x32x128xbf16> to vector<32x128xbf16>
    %cst_233 = arith.constant dense<0.000000e+00> : vector<16x128xf32>
    %405 = tpu.matmul %402, %404, %cst_233 {dimension_numbers = #tpu.dot_dimension_numbers<[1], [0], [0], [1], [0, 0, 1, 1], [], []>} : vector<16x32xbf16>, vector<32x128xbf16>, vector<16x128xf32> -> vector<16x128xf32>
    %406 = arith.addf %358, %405 : vector<16x128xf32>
    %c3_234 = arith.constant 3 : index
    %c0_235 = arith.constant 0 : index
    %c0_236 = arith.constant 0 : index
    %407 = vector.load %arg16[%c3_234, %c0_235, %c0_236] : memref<4x128x32xbf16, #tpu.memory_space<vmem>>, vector<1x128x32xbf16>
    %408 = vector.shape_cast %407 : vector<1x128x32xbf16> to vector<128x32xbf16>
    %cst_237 = arith.constant dense<0.000000e+00> : vector<16x32xf32>
    %409 = tpu.matmul %260, %408, %cst_237 {dimension_numbers = #tpu.dot_dimension_numbers<[1], [0], [0], [1], [0, 0, 1, 1], [], []>} : vector<16x128xbf16>, vector<128x32xbf16>, vector<16x32xf32> -> vector<16x32xf32>
    %c3_238 = arith.constant 3 : index
    %c0_239 = arith.constant 0 : index
    %c0_240 = arith.constant 0 : index
    %410 = vector.load %arg17[%c3_238, %c0_239, %c0_240] : memref<4x1x32xf32, #tpu.memory_space<vmem>>, vector<1x1x32xf32>
    %411 = vector.shape_cast %410 : vector<1x1x32xf32> to vector<1x32xf32>
    %412 = vector.broadcast %411 : vector<1x32xf32> to vector<16x32xf32>
    %413 = arith.addf %409, %412 : vector<16x32xf32>
    %c3_241 = arith.constant 3 : index
    %c0_242 = arith.constant 0 : index
    %c0_243 = arith.constant 0 : index
    %414 = vector.load %arg18[%c3_241, %c0_242, %c0_243] : memref<4x128x32xbf16, #tpu.memory_space<vmem>>, vector<1x128x32xbf16>
    %415 = vector.shape_cast %414 : vector<1x128x32xbf16> to vector<128x32xbf16>
    %cst_244 = arith.constant dense<0.000000e+00> : vector<32x32xf32>
    %416 = tpu.matmul %261, %415, %cst_244 {dimension_numbers = #tpu.dot_dimension_numbers<[1], [0], [0], [1], [0, 0, 1, 1], [], []>} : vector<32x128xbf16>, vector<128x32xbf16>, vector<32x32xf32> -> vector<32x32xf32>
    %c3_245 = arith.constant 3 : index
    %c0_246 = arith.constant 0 : index
    %c0_247 = arith.constant 0 : index
    %417 = vector.load %arg19[%c3_245, %c0_246, %c0_247] : memref<4x1x32xf32, #tpu.memory_space<vmem>>, vector<1x1x32xf32>
    %418 = vector.shape_cast %417 : vector<1x1x32xf32> to vector<1x32xf32>
    %419 = vector.broadcast %418 : vector<1x32xf32> to vector<32x32xf32>
    %420 = arith.addf %416, %419 : vector<32x32xf32>
    %c3_248 = arith.constant 3 : index
    %c0_249 = arith.constant 0 : index
    %c0_250 = arith.constant 0 : index
    %421 = vector.load %arg20[%c3_248, %c0_249, %c0_250] : memref<4x128x32xbf16, #tpu.memory_space<vmem>>, vector<1x128x32xbf16>
    %422 = vector.shape_cast %421 : vector<1x128x32xbf16> to vector<128x32xbf16>
    %cst_251 = arith.constant dense<0.000000e+00> : vector<32x32xf32>
    %423 = tpu.matmul %261, %422, %cst_251 {dimension_numbers = #tpu.dot_dimension_numbers<[1], [0], [0], [1], [0, 0, 1, 1], [], []>} : vector<32x128xbf16>, vector<128x32xbf16>, vector<32x32xf32> -> vector<32x32xf32>
    %c3_252 = arith.constant 3 : index
    %c0_253 = arith.constant 0 : index
    %c0_254 = arith.constant 0 : index
    %424 = vector.load %arg21[%c3_252, %c0_253, %c0_254] : memref<4x1x32xf32, #tpu.memory_space<vmem>>, vector<1x1x32xf32>
    %425 = vector.shape_cast %424 : vector<1x1x32xf32> to vector<1x32xf32>
    %426 = vector.broadcast %425 : vector<1x32xf32> to vector<32x32xf32>
    %427 = arith.addf %423, %426 : vector<32x32xf32>
    %428 = vector.shape_cast %413 : vector<16x32xf32> to vector<2x8x32xf32>
    %429 = arith.truncf %428 : vector<2x8x32xf32> to vector<2x8x32xbf16>
    %430 = vector.shape_cast %420 : vector<32x32xf32> to vector<2x16x32xf32>
    %431 = arith.truncf %430 : vector<2x16x32xf32> to vector<2x16x32xbf16>
    %432 = vector.shape_cast %427 : vector<32x32xf32> to vector<2x16x32xf32>
    %433 = arith.truncf %432 : vector<2x16x32xf32> to vector<2x16x32xbf16>
    "tpu.trace_start"() <{level = 10 : i32, message = "bqd,bkd->bqk"}> : () -> ()
    %cst_255 = arith.constant dense<0.000000e+00> : vector<2x8x16xf32>
    %434 = tpu.matmul %429, %431, %cst_255 {dimension_numbers = #tpu.dot_dimension_numbers<[2], [2], [1], [1], [0, 0, 0, 1, 1, 1], [0], [0]>} : vector<2x8x32xbf16>, vector<2x16x32xbf16>, vector<2x8x16xf32> -> vector<2x8x16xf32>
    "tpu.trace_stop"() : () -> ()
    %435 = vector.broadcast %16 : vector<2x1x16xf32> to vector<2x8x16xf32>
    %436 = arith.addf %434, %435 : vector<2x8x16xf32>
    %cst_256 = arith.constant dense<0xFF800000> : vector<2x8xf32>
    %437 = vector.multi_reduction <maximumf>, %436, %cst_256 [2] : vector<2x8x16xf32> to vector<2x8xf32>
    %438 = vector.shape_cast %437 : vector<2x8xf32> to vector<2x8x1xf32>
    %439 = vector.broadcast %438 : vector<2x8x1xf32> to vector<2x8x16xf32>
    %440 = arith.subf %436, %439 : vector<2x8x16xf32>
    %441 = math.exp %440 : vector<2x8x16xf32>
    %cst_257 = arith.constant dense<0.000000e+00> : vector<2x8xf32>
    %442 = vector.multi_reduction <add>, %441, %cst_257 [2] : vector<2x8x16xf32> to vector<2x8xf32>
    %443 = vector.shape_cast %442 : vector<2x8xf32> to vector<2x8x1xf32>
    %444 = tpu.reciprocal %443 {approx = true} : vector<2x8x1xf32> -> vector<2x8x1xf32>
    %445 = vector.broadcast %444 : vector<2x8x1xf32> to vector<2x8x16xf32>
    %446 = arith.mulf %441, %445 : vector<2x8x16xf32>
    %447 = arith.truncf %446 : vector<2x8x16xf32> to vector<2x8x16xbf16>
    "tpu.trace_start"() <{level = 10 : i32, message = "bqk,bkd->bqd"}> : () -> ()
    %cst_258 = arith.constant dense<0.000000e+00> : vector<2x8x32xf32>
    %448 = tpu.matmul %447, %433, %cst_258 {dimension_numbers = #tpu.dot_dimension_numbers<[2], [1], [1], [2], [0, 0, 0, 1, 1, 2], [0], [0]>} : vector<2x8x16xbf16>, vector<2x16x32xbf16>, vector<2x8x32xf32> -> vector<2x8x32xf32>
    "tpu.trace_stop"() : () -> ()
    %449 = vector.shape_cast %448 : vector<2x8x32xf32> to vector<16x32xf32>
    %450 = arith.truncf %449 : vector<16x32xf32> to vector<16x32xbf16>
    %c3_259 = arith.constant 3 : index
    %c0_260 = arith.constant 0 : index
    %c0_261 = arith.constant 0 : index
    %451 = vector.load %arg22[%c3_259, %c0_260, %c0_261] : memref<4x32x128xbf16, #tpu.memory_space<vmem>>, vector<1x32x128xbf16>
    %452 = vector.shape_cast %451 : vector<1x32x128xbf16> to vector<32x128xbf16>
    %cst_262 = arith.constant dense<0.000000e+00> : vector<16x128xf32>
    %453 = tpu.matmul %450, %452, %cst_262 {dimension_numbers = #tpu.dot_dimension_numbers<[1], [0], [0], [1], [0, 0, 1, 1], [], []>} : vector<16x32xbf16>, vector<32x128xbf16>, vector<16x128xf32> -> vector<16x128xf32>
    %454 = arith.addf %406, %453 : vector<16x128xf32>
    %c0_263 = arith.constant 0 : index
    %c0_264 = arith.constant 0 : index
    %455 = vector.load %arg23[%c0_263, %c0_264] : memref<1x128xf32, #tpu.memory_space<vmem>>, vector<1x128xf32>
    %456 = vector.broadcast %455 : vector<1x128xf32> to vector<16x128xf32>
    %457 = arith.addf %454, %456 : vector<16x128xf32>
    %458 = arith.addf %237, %457 : vector<16x128xf32>
    %cst_265 = arith.constant dense<0.000000e+00> : vector<16xf32>
    %459 = vector.multi_reduction <add>, %458, %cst_265 [1] : vector<16x128xf32> to vector<16xf32>
    %460 = vector.shape_cast %459 : vector<16xf32> to vector<16x1xf32>
    %cst_266 = arith.constant 1.280000e+02 : f32
    %461 = vector.broadcast %cst_266 : f32 to vector<16x1xf32>
    %462 = arith.divf %460, %461 : vector<16x1xf32>
    %463 = vector.broadcast %462 : vector<16x1xf32> to vector<16x128xf32>
    %464 = arith.subf %458, %463 : vector<16x128xf32>
    %465 = arith.mulf %464, %464 : vector<16x128xf32>
    %cst_267 = arith.constant dense<0.000000e+00> : vector<16xf32>
    %466 = vector.multi_reduction <add>, %465, %cst_267 [1] : vector<16x128xf32> to vector<16xf32>
    %467 = vector.shape_cast %466 : vector<16xf32> to vector<16x1xf32>
    %cst_268 = arith.constant 0.00787401571 : f32
    %468 = vector.broadcast %cst_268 : f32 to vector<16x1xf32>
    %469 = arith.mulf %467, %468 : vector<16x1xf32>
    %c0_269 = arith.constant 0 : index
    %c0_270 = arith.constant 0 : index
    %470 = vector.load %arg24[%c0_269, %c0_270] : memref<1x128xf32, #tpu.memory_space<vmem>>, vector<1x128xf32>
    %471 = vector.broadcast %470 : vector<1x128xf32> to vector<16x128xf32>
    %472 = arith.mulf %471, %464 : vector<16x128xf32>
    %473 = math.sqrt %469 : vector<16x1xf32>
    %cst_271 = arith.constant 9.99999974E-6 : f32
    %474 = vector.broadcast %cst_271 : f32 to vector<16x1xf32>
    %475 = arith.addf %473, %474 : vector<16x1xf32>
    %476 = vector.broadcast %475 : vector<16x1xf32> to vector<16x128xf32>
    %477 = arith.divf %472, %476 : vector<16x128xf32>
    %c0_272 = arith.constant 0 : index
    %c0_273 = arith.constant 0 : index
    %478 = vector.load %arg25[%c0_272, %c0_273] : memref<1x128xf32, #tpu.memory_space<vmem>>, vector<1x128xf32>
    %479 = vector.broadcast %478 : vector<1x128xf32> to vector<16x128xf32>
    %480 = arith.addf %477, %479 : vector<16x128xf32>
    %481 = arith.truncf %480 : vector<16x128xf32> to vector<16x128xbf16>
    %c0_274 = arith.constant 0 : index
    %c0_275 = arith.constant 0 : index
    %482 = vector.load %arg26[%c0_274, %c0_275] : memref<128x256xbf16, #tpu.memory_space<vmem>>, vector<128x256xbf16>
    %cst_276 = arith.constant dense<0.000000e+00> : vector<16x256xf32>
    %483 = tpu.matmul %481, %482, %cst_276 {dimension_numbers = #tpu.dot_dimension_numbers<[1], [0], [0], [1], [0, 0, 1, 1], [], []>} : vector<16x128xbf16>, vector<128x256xbf16>, vector<16x256xf32> -> vector<16x256xf32>
    %c0_277 = arith.constant 0 : index
    %c0_278 = arith.constant 0 : index
    %484 = vector.load %arg27[%c0_277, %c0_278] : memref<1x256xf32, #tpu.memory_space<vmem>>, vector<1x256xf32>
    %485 = vector.broadcast %484 : vector<1x256xf32> to vector<16x256xf32>
    %486 = arith.addf %483, %485 : vector<16x256xf32>
    %cst_279 = arith.constant 0.000000e+00 : f32
    %487 = vector.broadcast %cst_279 : f32 to vector<16x256xf32>
    %488 = arith.maximumf %486, %487 : vector<16x256xf32>
    %489 = arith.truncf %488 : vector<16x256xf32> to vector<16x256xbf16>
    %c0_280 = arith.constant 0 : index
    %c0_281 = arith.constant 0 : index
    %490 = vector.load %arg28[%c0_280, %c0_281] : memref<256x128xbf16, #tpu.memory_space<vmem>>, vector<256x128xbf16>
    %cst_282 = arith.constant dense<0.000000e+00> : vector<16x128xf32>
    %491 = tpu.matmul %489, %490, %cst_282 {dimension_numbers = #tpu.dot_dimension_numbers<[1], [0], [0], [1], [0, 0, 1, 1], [], []>} : vector<16x256xbf16>, vector<256x128xbf16>, vector<16x128xf32> -> vector<16x128xf32>
    %c0_283 = arith.constant 0 : index
    %c0_284 = arith.constant 0 : index
    %492 = vector.load %arg29[%c0_283, %c0_284] : memref<1x128xf32, #tpu.memory_space<vmem>>, vector<1x128xf32>
    %493 = vector.broadcast %492 : vector<1x128xf32> to vector<16x128xf32>
    %494 = arith.addf %491, %493 : vector<16x128xf32>
    %495 = arith.addf %458, %494 : vector<16x128xf32>
    %496 = vector.shape_cast %495 : vector<16x128xf32> to vector<2x8x128xf32>
    %c0_285 = arith.constant 0 : index
    %c0_286 = arith.constant 0 : index
    %c0_287 = arith.constant 0 : index
    %497 = vector.load %arg30[%c0_285, %c0_286, %c0_287] : memref<2x8x128xf32, #tpu.memory_space<vmem>>, vector<2x8x128xf32>
    tpu.vector_store %arg30[%c0_285, %c0_286, %c0_287], %496 {strides = array<i32>} : memref<2x8x128xf32, #tpu.memory_space<vmem>>, vector<2x8x128xf32>,
    return
  }
  func.func @transform_0(%arg0: i32) -> (i32, i32, i32) {
    %c0_i32 = arith.constant 0 : i32
    %c0_i32_0 = arith.constant 0 : i32
    %c0_i32_1 = arith.constant 0 : i32
    return %arg0, %c0_i32, %c0_i32_0 : i32, i32, i32
  }
  func.func @transform_1(%arg0: i32) -> (i32, i32, i32) {
    %c0_i32 = arith.constant 0 : i32
    %c0_i32_0 = arith.constant 0 : i32
    %c0_i32_1 = arith.constant 0 : i32
    return %arg0, %c0_i32, %c0_i32_0 : i32, i32, i32
  }
  func.func @transform_2(%arg0: i32) -> (i32, i32, i32) {
    %c0_i32 = arith.constant 0 : i32
    %c0_i32_0 = arith.constant 0 : i32
    %c0_i32_1 = arith.constant 0 : i32
    return %arg0, %c0_i32, %c0_i32_0 : i32, i32, i32
  }
  func.func @transform_3(%arg0: i32) -> (i32, i32) {
    %c0_i32 = arith.constant 0 : i32
    %c0_i32_0 = arith.constant 0 : i32
    %c0_i32_1 = arith.constant 0 : i32
    return %c0_i32, %c0_i32_0 : i32, i32
  }
  func.func @transform_4(%arg0: i32) -> (i32, i32) {
    %c0_i32 = arith.constant 0 : i32
    %c0_i32_0 = arith.constant 0 : i32
    %c0_i32_1 = arith.constant 0 : i32
    return %c0_i32, %c0_i32_0 : i32, i32
  }
  func.func @transform_5(%arg0: i32) -> (i32, i32, i32) {
    %c0_i32 = arith.constant 0 : i32
    %c0_i32_0 = arith.constant 0 : i32
    %c0_i32_1 = arith.constant 0 : i32
    %c0_i32_2 = arith.constant 0 : i32
    return %c0_i32, %c0_i32_0, %c0_i32_1 : i32, i32, i32
  }
  func.func @transform_6(%arg0: i32) -> (i32, i32, i32) {
    %c0_i32 = arith.constant 0 : i32
    %c0_i32_0 = arith.constant 0 : i32
    %c0_i32_1 = arith.constant 0 : i32
    %c0_i32_2 = arith.constant 0 : i32
    return %c0_i32, %c0_i32_0, %c0_i32_1 : i32, i32, i32
  }
  func.func @transform_7(%arg0: i32) -> (i32, i32, i32) {
    %c0_i32 = arith.constant 0 : i32
    %c0_i32_0 = arith.constant 0 : i32
    %c0_i32_1 = arith.constant 0 : i32
    %c0_i32_2 = arith.constant 0 : i32
    return %c0_i32, %c0_i32_0, %c0_i32_1 : i32, i32, i32
  }
  func.func @transform_8(%arg0: i32) -> (i32, i32, i32) {
    %c0_i32 = arith.constant 0 : i32
    %c0_i32_0 = arith.constant 0 : i32
    %c0_i32_1 = arith.constant 0 : i32
    %c0_i32_2 = arith.constant 0 : i32
    return %c0_i32, %c0_i32_0, %c0_i32_1 : i32, i32, i32
  }
  func.func @transform_9(%arg0: i32) -> (i32, i32, i32) {
    %c0_i32 = arith.constant 0 : i32
    %c0_i32_0 = arith.constant 0 : i32
    %c0_i32_1 = arith.constant 0 : i32
    %c0_i32_2 = arith.constant 0 : i32
    return %c0_i32, %c0_i32_0, %c0_i32_1 : i32, i32, i32
  }
  func.func @transform_10(%arg0: i32) -> (i32, i32, i32) {
    %c0_i32 = arith.constant 0 : i32
    %c0_i32_0 = arith.constant 0 : i32
    %c0_i32_1 = arith.constant 0 : i32
    %c0_i32_2 = arith.constant 0 : i32
    return %c0_i32, %c0_i32_0, %c0_i32_1 : i32, i32, i32
  }
  func.func @transform_11(%arg0: i32) -> (i32, i32, i32) {
    %c0_i32 = arith.constant 0 : i32
    %c0_i32_0 = arith.constant 0 : i32
    %c0_i32_1 = arith.constant 0 : i32
    %c0_i32_2 = arith.constant 0 : i32
    return %c0_i32, %c0_i32_0, %c0_i32_1 : i32, i32, i32
  }
  func.func @transform_12(%arg0: i32) -> (i32, i32) {
    %c0_i32 = arith.constant 0 : i32
    %c0_i32_0 = arith.constant 0 : i32
    %c0_i32_1 = arith.constant 0 : i32
    return %c0_i32, %c0_i32_0 : i32, i32
  }
  func.func @transform_13(%arg0: i32) -> (i32, i32) {
    %c0_i32 = arith.constant 0 : i32
    %c0_i32_0 = arith.constant 0 : i32
    %c0_i32_1 = arith.constant 0 : i32
    return %c0_i32, %c0_i32_0 : i32, i32
  }
  func.func @transform_14(%arg0: i32) -> (i32, i32) {
    %c0_i32 = arith.constant 0 : i32
    %c0_i32_0 = arith.constant 0 : i32
    %c0_i32_1 = arith.constant 0 : i32
    return %c0_i32, %c0_i32_0 : i32, i32
  }
  func.func @transform_15(%arg0: i32) -> (i32, i32, i32) {
    %c0_i32 = arith.constant 0 : i32
    %c0_i32_0 = arith.constant 0 : i32
    %c0_i32_1 = arith.constant 0 : i32
    %c0_i32_2 = arith.constant 0 : i32
    return %c0_i32, %c0_i32_0, %c0_i32_1 : i32, i32, i32
  }
  func.func @transform_16(%arg0: i32) -> (i32, i32, i32) {
    %c0_i32 = arith.constant 0 : i32
    %c0_i32_0 = arith.constant 0 : i32
    %c0_i32_1 = arith.constant 0 : i32
    %c0_i32_2 = arith.constant 0 : i32
    return %c0_i32, %c0_i32_0, %c0_i32_1 : i32, i32, i32
  }
  func.func @transform_17(%arg0: i32) -> (i32, i32, i32) {
    %c0_i32 = arith.constant 0 : i32
    %c0_i32_0 = arith.constant 0 : i32
    %c0_i32_1 = arith.constant 0 : i32
    %c0_i32_2 = arith.constant 0 : i32
    return %c0_i32, %c0_i32_0, %c0_i32_1 : i32, i32, i32
  }
  func.func @transform_18(%arg0: i32) -> (i32, i32, i32) {
    %c0_i32 = arith.constant 0 : i32
    %c0_i32_0 = arith.constant 0 : i32
    %c0_i32_1 = arith.constant 0 : i32
    %c0_i32_2 = arith.constant 0 : i32
    return %c0_i32, %c0_i32_0, %c0_i32_1 : i32, i32, i32
  }
  func.func @transform_19(%arg0: i32) -> (i32, i32, i32) {
    %c0_i32 = arith.constant 0 : i32
    %c0_i32_0 = arith.constant 0 : i32
    %c0_i32_1 = arith.constant 0 : i32
    %c0_i32_2 = arith.constant 0 : i32
    return %c0_i32, %c0_i32_0, %c0_i32_1 : i32, i32, i32
  }
  func.func @transform_20(%arg0: i32) -> (i32, i32, i32) {
    %c0_i32 = arith.constant 0 : i32
    %c0_i32_0 = arith.constant 0 : i32
    %c0_i32_1 = arith.constant 0 : i32
    %c0_i32_2 = arith.constant 0 : i32
    return %c0_i32, %c0_i32_0, %c0_i32_1 : i32, i32, i32
  }
  func.func @transform_21(%arg0: i32) -> (i32, i32, i32) {
    %c0_i32 = arith.constant 0 : i32
    %c0_i32_0 = arith.constant 0 : i32
    %c0_i32_1 = arith.constant 0 : i32
    %c0_i32_2 = arith.constant 0 : i32
    return %c0_i32, %c0_i32_0, %c0_i32_1 : i32, i32, i32
  }
  func.func @transform_22(%arg0: i32) -> (i32, i32) {
    %c0_i32 = arith.constant 0 : i32
    %c0_i32_0 = arith.constant 0 : i32
    %c0_i32_1 = arith.constant 0 : i32
    return %c0_i32, %c0_i32_0 : i32, i32
  }
  func.func @transform_23(%arg0: i32) -> (i32, i32) {
    %c0_i32 = arith.constant 0 : i32
    %c0_i32_0 = arith.constant 0 : i32
    %c0_i32_1 = arith.constant 0 : i32
    return %c0_i32, %c0_i32_0 : i32, i32
  }
  func.func @transform_24(%arg0: i32) -> (i32, i32) {
    %c0_i32 = arith.constant 0 : i32
    %c0_i32_0 = arith.constant 0 : i32
    %c0_i32_1 = arith.constant 0 : i32
    return %c0_i32, %c0_i32_0 : i32, i32
  }
  func.func @transform_25(%arg0: i32) -> (i32, i32) {
    %c0_i32 = arith.constant 0 : i32
    %c0_i32_0 = arith.constant 0 : i32
    %c0_i32_1 = arith.constant 0 : i32
    return %c0_i32, %c0_i32_0 : i32, i32
  }
  func.func @transform_26(%arg0: i32) -> (i32, i32) {
    %c0_i32 = arith.constant 0 : i32
    %c0_i32_0 = arith.constant 0 : i32
    %c0_i32_1 = arith.constant 0 : i32
    return %c0_i32, %c0_i32_0 : i32, i32
  }
  func.func @transform_27(%arg0: i32) -> (i32, i32) {
    %c0_i32 = arith.constant 0 : i32
    %c0_i32_0 = arith.constant 0 : i32
    %c0_i32_1 = arith.constant 0 : i32
    return %c0_i32, %c0_i32_0 : i32, i32
  }
  func.func @transform_28(%arg0: i32) -> (i32, i32) {
    %c0_i32 = arith.constant 0 : i32
    %c0_i32_0 = arith.constant 0 : i32
    %c0_i32_1 = arith.constant 0 : i32
    return %c0_i32, %c0_i32_0 : i32, i32
  }
  func.func @transform_29(%arg0: i32) -> (i32, i32, i32) {
    %c0_i32 = arith.constant 0 : i32
    %c0_i32_0 = arith.constant 0 : i32
    %c0_i32_1 = arith.constant 0 : i32
    return %arg0, %c0_i32, %c0_i32_0 : i32, i32, i32
  }
}

</mosaic_0001>

<bundles_post_ra>
// kernel: decoder_layer.1
= control target key start
LH: loop header
LB: loop body
LE: loop exit
PB: predicated region body
PF: predicated region fallthrough
CT: control target
= control target key end

     0   :  { %s7819_s6 = smov 1   ;;  %s7820_s10 = smov 2   ;;  %s8878_s0 = inlined_call_operand.smem [shape: u32[30], index: -1, kind: input, shape index: {}] }
   0x1   :  { %s7863_s5 = sld [smem:[%s8878_s0]]   ;;  %s7821_s14 = smov 3  }
   0x2   :  { %s7868_s9 = sld [smem:[%s8878_s0 + %s7819_s6]]   ;;  %s7822_s18 = smov 4  }
   0x3   :  { %s7873_s13 = sld [smem:[%s8878_s0 + %s7820_s10]]   ;;  %s7823_s22 = smov 5  }
   0x4   :  { %s7878_s17 = sld [smem:[%s8878_s0 + %s7821_s14]]   ;;  %s7824_s26 = smov 6  }
   0x5   :  { %s7883_s21 = sld [smem:[%s8878_s0 + %s7822_s18]]   ;;  %s7825_s30 = smov 7  }
   0x6   :  { %s7888_s25 = sld [smem:[%s8878_s0 + %s7823_s22]]   ;;  %s7826_s4 = smov 8  }
   0x7   :  { %s7893_s29 = sld [smem:[%s8878_s0 + %s7824_s26]]   ;;  %s7827_s10 = smov 9  }
   0x8   :  { %s7898_s3 = sld [smem:[%s8878_s0 + %s7825_s30]]   ;;  %s7828_s15 = smov 10  }
   0x9   :  { %8886 = sst [smem:[#allocation5_spill]] %s7873_s13  ;;  %s7829_s20 = smov 11  }
   0xa   :  { %s7903_s8 = sld [smem:[%s8878_s0 + %s7826_s4]]   ;;  %s7830_s26 = smov 12  }
   0xb   :  { %s7908_s14 = sld [smem:[%s8878_s0 + %s7827_s10]]   ;;  %s7831_s1 = smov 13  }
   0xc   :  { %s7913_s19 = sld [smem:[%s8878_s0 + %s7828_s15]]   ;;  %s7832_s7 = smov 14  }
   0xd   :  { %s7918_s24 = sld [smem:[%s8878_s0 + %s7829_s20]]   ;;  %s7833_s15 = smov 15  }
   0xe   :  { %s7923_s30 = sld [smem:[%s8878_s0 + %s7830_s26]]   ;;  %s7834_s22 = smov 16  }
   0xf   :  { %s7928_s6 = sld [smem:[%s8878_s0 + %s7831_s1]]   ;;  %s7835_s28 = smov 17  }
  0x10   :  { %s7933_s12 = sld [smem:[%s8878_s0 + %s7832_s7]]   ;;  %s7836_s7 = smov 18  }
  0x11   :  { %s7938_s20 = sld [smem:[%s8878_s0 + %s7833_s15]]   ;;  %s7837_s15 = smov 19  }
  0x12   :  { %s7943_s27 = sld [smem:[%s8878_s0 + %s7834_s22]]   ;;  %s7838_s22 = smov 20  }
  0x13   :  { %s7948_s4 = sld [smem:[%s8878_s0 + %s7835_s28]]   ;;  %s7839_s28 = smov 21  }
  0x14   :  { %s7953_s13 = sld [smem:[%s8878_s0 + %s7836_s7]]   ;;  %s7840_s7 = smov 22  }
  0x15   :  { %8887 = sst [smem:[#allocation6_spill]] %s7928_s6 }
  0x16   :  { %8888 = sst [smem:[#allocation7_spill]] %s7933_s12 }
  0x17   :  { %s7958_s12 = sld [smem:[%s8878_s0 + %s7837_s15]]   ;;  %s7841_s15 = smov 23  }
  0x18   :  { %8889 = sst [smem:[#allocation8_spill]] %s7943_s27 }
  0x19   :  { %s7963_s27 = sld [smem:[%s8878_s0 + %s7838_s22]]   ;;  %s7842_s22 = smov 24  }
  0x1a   :  { %8890 = sst [smem:[#allocation9_spill]] %s7953_s13 }
  0x1b   :  { %s7968_s6 = sld [smem:[%s8878_s0 + %s7839_s28]]   ;;  %s7843_s28 = smov 25  }
  0x1c   :  { %s7973_s13 = sld [smem:[%s8878_s0 + %s7840_s7]]   ;;  %s7844_s7 = smov 26  }
  0x1d   :  { %8891 = sst [smem:[#allocation10_spill]] %s7958_s12 }
  0x1e   :  { %s7978_s12 = sld [smem:[%s8878_s0 + %s7841_s15]]   ;;  %s7845_s15 = smov 27  }
  0x1f   :  { %8892 = sst [smem:[#allocation11_spill]] %s7963_s27 }
  0x20   :  { %s7983_s27 = sld [smem:[%s8878_s0 + %s7842_s22]]   ;;  %s7846_s22 = smov 28  }
  0x21   :  { %8893 = sst [smem:[#allocation12_spill]] %s7968_s6 }
  0x22   :  { %8894 = sst [smem:[#allocation13_spill]] %s7973_s13 }
  0x23   :  { %s7988_s6 = sld [smem:[%s8878_s0 + %s7843_s28]]   ;;  %s7847_s28 = smov 29  }
  0x24   :  { %8895 = sst [smem:[#allocation14_spill]] %s7978_s12 }
  0x25   :  { %s7993_s13 = sld [smem:[%s8878_s0 + %s7844_s7]]  }
  0x26   :  { %8896 = sst [smem:[#allocation15_spill]] %s7983_s27 }
  0x27   :  { %s7998_s12 = sld [smem:[%s8878_s0 + %s7845_s15]]  }
  0x28   :  { %s8003_s27 = sld [smem:[%s8878_s0 + %s7846_s22]]  }
  0x29   :  { %8897 = sst [smem:[#allocation16_spill]] %s7988_s6 }
  0x2a   :  { %s8008_s6 = sld [smem:[%s8878_s0 + %s7847_s28]]  }
  0x2b   :  { %v124_v0 = vld [vmem:[%s7863_s5] sm:$0xff]  ;;  %v125_v1 = vld [vmem:[%s7863_s5 + $0x8] sm:$0xff] }
  0x2c   :  { %142 = vadd.xlane.f32.xlu0 %v124_v0 }
  0x30   :  { %144 = vadd.xlane.f32.xlu0 %v125_v1 }
  0xb9   :  { %v143_v2 = vpop.xlane.xlu0 %142 }
  0xba   :  { %v147_v3 = vmul.f32 0.0078125, %v143_v2 }
  0xbc   :  { %v8012_v4 = vsub.f32 %v124_v0, %v147_v3 }
  0xbd   :  { %v145_v5 = vpop.xlane.xlu0 %144 }
  0xbe   :  { %v148_v6 = vmul.f32 0.0078125, %v145_v5  ;;  %v151_v7 = vmul.f32 %v8012_v4, %v8012_v4 }
  0xc0   :  { %v8016_v8 = vsub.f32 %v125_v1, %v148_v6  ;;  %153 = vadd.xlane.f32.xlu1 %v151_v7 }
  0xc2   :  { %v152_v9 = vmul.f32 %v8016_v8, %v8016_v8 }
  0xc4   :  { %155 = vadd.xlane.f32.xlu1 %v152_v9 }
  0xc5   :  { %64 = vsyncpa [#allocation3], 0  ;;  %v7457_v10 = vld [vmem:[%s7888_s25] sm:$0xff]   ;;  %v7848_v11 = vmov 0.0   ;;  %v7459_v13 = vld [vmem:[%s7888_s25 + $0x8] sm:$0xff]   ;;  %vm7849_vm0 = vmmov 0  }
  0xc6   :  { %6685 = vmatprep.subr.bf16.mxu0 %v7848_v11  ;;  %6705 = vmatprep.subr.bf16.mxu1 %v7848_v11  ;;  %v7458_v12 = vld [vmem:[%s7898_s3] sm:$0xff]   ;;  %v7460_v14 = vld [vmem:[%s7898_s3 + $0x8] sm:$0xff]   ;;  %v7461_v15 = vld [vmem:[%s7888_s25 + $0x10] sm:$0xff]   ;;  %vm540_vm5 = vcmask 261120   ;;  %vm661_vm6 = vcmask 1043456   ;;  %vm633_vm8 = vcmask 64512  }
  0xc7   :  { %6686 = vmatpush3.bf16.msra.mxu0 %v7457_v10  ;;  %6706 = vmatpush3.bf16.msra.mxu1 %v7458_v12  ;;  %v7462_v16 = vld [vmem:[%s7898_s3 + $0x10] sm:$0xff]   ;;  %v7463_v17 = vld [vmem:[%s7888_s25 + $0x18] sm:$0xff]   ;;  %v7465_v19 = vld [vmem:[%s7888_s25 + $0x20] sm:$0xff]   ;;  %s8898_s0 = sld [smem:[#allocation10_spill]]  ;;  %vm3200_vm15 = vcmask 130048  }
  0xc8   :  { %6687 = vmatprep.subr.bf16.mxu0 %v7848_v11  ;;  %6707 = vmatprep.subr.bf16.mxu1 %v7848_v11  ;;  %v7464_v18 = vld [vmem:[%s7898_s3 + $0x18] sm:$0xff]   ;;  %v7466_v20 = vld [vmem:[%s7898_s3 + $0x20] sm:$0xff]   ;;  %v7467_v21 = vld [vmem:[%s7888_s25 + $0x28] sm:$0xff]  }
  0xc9   :  { %v7468_v22 = vld [vmem:[%s7898_s3 + $0x28] sm:$0xff]   ;;  %v7469_v23 = vld [vmem:[%s7888_s25 + $0x30] sm:$0xff]   ;;  %v7471_v25 = vld [vmem:[%s7888_s25 + $0x38] sm:$0xff]   ;;  %6701 = vmatprep.mubr.msk.bf16.mxu0 %vm7849_vm0, %v7848_v11  ;;  %6721 = vmatprep.mubr.msk.bf16.mxu1 %vm7849_vm0, %v7848_v11 }
  0xca   :  { %v7470_v24 = vld [vmem:[%s7898_s3 + $0x30] sm:$0xff]   ;;  %v7472_v26 = vld [vmem:[%s7898_s3 + $0x38] sm:$0xff]   ;;  %v5708_v43 = vld [vmem:[%s7878_s17] ss:$0 sm:$0xff]  ;;  %s8901_s17 = sld [smem:[#allocation9_spill]] }
  0xcb   :  { %6688 = vmatpush3.bf16.msra.mxu0 %v7459_v13  ;;  %6708 = vmatpush3.bf16.msra.mxu1 %v7460_v14  ;;  %v166_v45 = vmul.f32 %v5708_v43, %v8012_v4  ;;  %v167_v46 = vmul.f32 %v5708_v43, %v8016_v8  ;;  %v5709_v49 = vld [vmem:[%s7883_s21] ss:$0 sm:$0xff]  ;;  %v7474_v55 = vld [vmem:[%s7908_s14 + $0x8] sm:$0xff]   ;;  %v7475_v56 = vld [vmem:[%s7908_s14 + $0x10] sm:$0xff]   ;;  %s8902_s21 = sld [smem:[#allocation8_spill]] }
  0xcc   :  { %6689 = vmatprep.subr.bf16.mxu0 %v7848_v11  ;;  %6709 = vmatprep.subr.bf16.mxu1 %v7848_v11  ;;  %v7473_v53 = vld [vmem:[%s7908_s14] sm:$0xff]   ;;  %v7476_v57 = vld [vmem:[%s7908_s14 + $0x18] sm:$0xff]   ;;  %v7478_v59 = vld [vmem:[%s7908_s14 + $0x28] sm:$0xff]  }
  0xcd   :  { %v7477_v58 = vld [vmem:[%s7908_s14 + $0x20] sm:$0xff]   ;;  %v7479_v60 = vld [vmem:[%s7908_s14 + $0x30] sm:$0xff]   ;;  %v7480_v61 = vld [vmem:[%s7908_s14 + $0x38] sm:$0xff]  }
  0xce   :  { %v7481_v62 = vld [vmem:[%s7888_s25 + $0x40] sm:$0xff]   ;;  %v7482_v63 = vld [vmem:[%s7888_s25 + $0x48] sm:$0xff]   ;;  %v7483_v0 = vld [vmem:[%s7888_s25 + $0x50] sm:$0xff]  }
  0xcf   :  { %6690 = vmatpush3.bf16.msra.mxu0 %v7461_v15  ;;  %6710 = vmatpush3.bf16.msra.mxu1 %v7462_v16  ;;  %v7484_v1 = vld [vmem:[%s7888_s25 + $0x58] sm:$0xff]   ;;  %v7485_v2 = vld [vmem:[%s7888_s25 + $0x60] sm:$0xff]   ;;  %v7486_v3 = vld [vmem:[%s7888_s25 + $0x68] sm:$0xff]  }
  0xd0   :  { %6691 = vmatprep.subr.bf16.mxu0 %v7848_v11  ;;  %6711 = vmatprep.subr.bf16.mxu1 %v7848_v11  ;;  %v7487_v4 = vld [vmem:[%s7888_s25 + $0x70] sm:$0xff]   ;;  %v7488_v5 = vld [vmem:[%s7888_s25 + $0x78] sm:$0xff]   ;;  %v7489_v6 = vld [vmem:[%s7908_s14 + $0x40] sm:$0xff]  }
  0xd1   :  { %v7490_v7 = vld [vmem:[%s7908_s14 + $0x48] sm:$0xff]   ;;  %v7491_v8 = vld [vmem:[%s7908_s14 + $0x50] sm:$0xff]   ;;  %v7492_v9 = vld [vmem:[%s7908_s14 + $0x58] sm:$0xff]  }
  0xd2   :  { %v7493_v10 = vld [vmem:[%s7908_s14 + $0x60] sm:$0xff]   ;;  %v7494_v12 = vld [vmem:[%s7908_s14 + $0x68] sm:$0xff]   ;;  %v7495_v13 = vld [vmem:[%s7908_s14 + $0x70] sm:$0xff]  }
  0xd3   :  { %6692 = vmatpush3.bf16.msra.mxu0 %v7463_v17  ;;  %6712 = vmatpush3.bf16.msra.mxu1 %v7464_v18  ;;  %v7496_v14 = vld [vmem:[%s7908_s14 + $0x78] sm:$0xff]   ;;  %v5719_v15 = vld [vmem:[%s7903_s8] ss:$0 sm:$0xff] }
  0xd4   :  { %6693 = vmatprep.subr.bf16.mxu0 %v7848_v11  ;;  %6713 = vmatprep.subr.bf16.mxu1 %v7848_v11 }
  0xd7   :  { %6694 = vmatpush3.bf16.msra.mxu0 %v7465_v19  ;;  %6714 = vmatpush3.bf16.msra.mxu1 %v7466_v20 }
  0xd8   :  { %6695 = vmatprep.subr.bf16.mxu0 %v7848_v11  ;;  %6715 = vmatprep.subr.bf16.mxu1 %v7848_v11 }
  0xdb   :  { %6696 = vmatpush3.bf16.msra.mxu0 %v7467_v21  ;;  %6716 = vmatpush3.bf16.msra.mxu1 %v7468_v22 }
  0xdc   :  { %6697 = vmatprep.subr.bf16.mxu0 %v7848_v11  ;;  %6717 = vmatprep.subr.bf16.mxu1 %v7848_v11 }
  0xdf   :  { %6698 = vmatpush3.bf16.msra.mxu0 %v7469_v23  ;;  %6718 = vmatpush3.bf16.msra.mxu1 %v7470_v24 }
  0xe0   :  { %6699 = vmatprep.subr.bf16.mxu0 %v7848_v11  ;;  %6719 = vmatprep.subr.bf16.mxu1 %v7848_v11 }
  0xe3   :  { %6700 = vmatpush3.bf16.msra.mxu0 %v7471_v25  ;;  %6720 = vmatpush3.bf16.msra.mxu1 %v7472_v26  ;;  %v5710_v26 = vld [vmem:[%s7893_s29] ss:$0 sm:$0xff] }
  0xe4   :  { %6725 = vmatprep.subr.bf16.mxu0 %v7848_v11  ;;  %6745 = vmatprep.subr.bf16.mxu1 %v7848_v11 }
 0x14d   :  { %v154_v27 = vpop.xlane.xlu1 %153 }
 0x14e   :  { %v157_v28 = vmul.f32 0.007874016, %v154_v27 }
 0x150   :  { %7705 = vrsqrt.f32 %v157_v28  ;;  %vm170_vm1 = vcmp.eq.f32.partialorder %v157_v28, inf  ;;  %v173_v33 = vand.u32 2147483648, %v157_v28  ;;  %vm172_vm2 = vcmp.eq.f32.partialorder %v157_v28, 0.0 }
 0x151   :  { %v156_v29 = vpop.xlane.xlu1 %155 }
 0x152   :  { %v158_v30 = vmul.f32 0.007874016, %v156_v29 }
 0x154   :  { %7707 = vrsqrt.f32 %v158_v30  ;;  %vm177_vm3 = vcmp.eq.f32.partialorder %v158_v30, inf  ;;  %v180_v39 = vand.u32 2147483648, %v158_v30  ;;  %vm179_vm4 = vcmp.eq.f32.partialorder %v158_v30, 0.0 }
 0x15a   :  { %v7706_v31 = vpop.eup %7705 }
 0x15b   :  { %v169_v32 = vmul.f32 %v7706_v31, %v157_v28 }
 0x15d   :  { %v171_v34 = vsel %vm170_vm1, %v157_v28, %v169_v32 }
 0x15e   :  { %v7708_v35 = vpop.eup %7707  ;;  %v174_v36 = vsel %vm172_vm2, %v173_v33, %v171_v34 }
 0x15f   :  { %v182_v37 = vadd.f32 1e-05, %v174_v36  ;;  %v176_v38 = vmul.f32 %v7708_v35, %v158_v30  ;;  %v5728_v35 = vld [vmem:[%s7913_s19] ss:$0 sm:$0xff] }
 0x161   :  { %7709 = vrcp.f32 %v182_v37  ;;  %v178_v40 = vsel %vm177_vm3, %v158_v30, %v176_v38 }
 0x162   :  { %v181_v41 = vsel %vm179_vm4, %v180_v39, %v178_v40 }
 0x163   :  { %v183_v42 = vadd.f32 1e-05, %v181_v41 }
 0x165   :  { %7711 = vrcp.f32 %v183_v42 }
 0x16b   :  { %v7710_v44 = vpop.eup %7709 }
 0x16c   :  { %v185_v47 = vmul.f32 %v7710_v44, %v166_v45 }
 0x16e   :  { %v195_v51 = vadd.f32 %v5709_v49, %v185_v47 }
 0x16f   :  { %v7712_v48 = vpop.eup %7711 }
 0x170   :  { %v187_v50 = vmul.f32 %v7712_v48, %v167_v46 }
 0x172   :  { %v196_v52 = vadd.f32 %v5709_v49, %v187_v50  ;;  %v8149_v50 = vld [vmem:[%s7913_s19 + $0x1] ss:$0 sm:$0xff] }
 0x174   :  { %v8063_v54 = vpack.c.bf16 %v196_v52, %v195_v51 }
 0x176   :  { %6702 = vmatmul.mubr.bf16.vlgmr.msra.gmra.mrb[0].mxu0 %v8063_v54  ;;  %6722 = vmatmul.mubr.bf16.vlgmr.msra.gmra.mrb[0].mxu1 %v8063_v54 }
 0x177   :  { %6726 = vmatpush3.bf16.msra.mxu0 %v7473_v53  ;;  %6741 = vmatprep.mubr.msk.bf16.mxu0 %vm7849_vm0, %v7848_v11 }
 0x178   :  { %6727 = vmatprep.subr.bf16.mxu0 %v7848_v11  ;;  %6747 = vmatprep.mubr.msk.bf16.mxu1 %vm7849_vm0, %v7848_v11 }
 0x17b   :  { %6728 = vmatpush3.bf16.msra.mxu0 %v7474_v55  ;;  %v130_v55 = vlaneseq }
 0x17c   :  { %6729 = vmatprep.subr.bf16.mxu0 %v7848_v11 }
 0x17f   :  { %6730 = vmatpush3.bf16.msra.mxu0 %v7475_v56  ;;  %v8154_v56 = vshrl.u32 %v130_v55, 7 }
 0x180   :  { %6731 = vmatprep.subr.bf16.mxu0 %v7848_v11 }
 0x183   :  { %6732 = vmatpush3.bf16.msra.mxu0 %v7476_v57  ;;  %v133_v57 = vand.u32 127, %v130_v55 }
 0x184   :  { %6733 = vmatprep.subr.bf16.mxu0 %v7848_v11 }
 0x185   :  { %vm134_vm7 = vcmp.le.s32.totalorder %v133_v57, %v8154_v56 }
 0x187   :  { %6734 = vmatpush3.bf16.msra.mxu0 %v7477_v58  ;;  %v7850_v58 = vmov -1e+09  }
 0x188   :  { %6735 = vmatprep.subr.bf16.mxu0 %v7848_v11 }
 0x18b   :  { %6736 = vmatpush3.bf16.msra.mxu0 %v7478_v59  ;;  %v8157_v59 = vsel %vm134_vm7, 0.0, %v7850_v58 }
 0x18c   :  { %6737 = vmatprep.subr.bf16.mxu0 %v7848_v11 }
 0x18f   :  { %6738 = vmatpush3.bf16.msra.mxu0 %v7479_v60 }
 0x190   :  { %6739 = vmatprep.subr.bf16.mxu0 %v7848_v11 }
 0x193   :  { %6740 = vmatpush3.bf16.msra.mxu0 %v7480_v61 }
 0x194   :  { %6769 = vmatprep.subr.bf16.mxu0 %v7848_v11 }
 0x196   :  { %6742 = vmatmul.mubr.bf16.vlgmr.msra.gmra.mrb[4].mxu0 %v8063_v54 }
 0x197   :  { %6770 = vmatpush3.bf16.msra.mxu0 %v7481_v62  ;;  %6785 = vmatprep.mubr.msk.bf16.mxu0 %vm7849_vm0, %v7848_v11 }
 0x198   :  { %6771 = vmatprep.subr.bf16.mxu0 %v7848_v11 }
 0x19b   :  { %6772 = vmatpush3.bf16.msra.mxu0 %v7482_v63 }
 0x19c   :  { %6773 = vmatprep.subr.bf16.mxu0 %v7848_v11 }
 0x19f   :  { %6774 = vmatpush3.bf16.msra.mxu0 %v7483_v0 }
 0x1a0   :  { %6775 = vmatprep.subr.bf16.mxu0 %v7848_v11 }
 0x1a3   :  { %6776 = vmatpush3.bf16.msra.mxu0 %v7484_v1 }
 0x1a4   :  { %6777 = vmatprep.subr.bf16.mxu0 %v7848_v11 }
 0x1a7   :  { %6778 = vmatpush3.bf16.msra.mxu0 %v7485_v2 }
 0x1a8   :  { %6779 = vmatprep.subr.bf16.mxu0 %v7848_v11 }
 0x1ab   :  { %6780 = vmatpush3.bf16.msra.mxu0 %v7486_v3 }
 0x1ac   :  { %6781 = vmatprep.subr.bf16.mxu0 %v7848_v11 }
 0x1af   :  { %6782 = vmatpush3.bf16.msra.mxu0 %v7487_v4 }
 0x1b0   :  { %6783 = vmatprep.subr.bf16.mxu0 %v7848_v11 }
 0x1b3   :  { %6784 = vmatpush3.bf16.msra.mxu0 %v7488_v5 }
 0x1b4   :  { %6809 = vmatprep.subr.bf16.mxu0 %v7848_v11 }
 0x1b6   :  { %6786 = vmatmul.mubr.bf16.vlgmr.msra.gmra.mrb[8].mxu0 %v8063_v54 }
 0x1b7   :  { %6810 = vmatpush3.bf16.msra.mxu0 %v7489_v6  ;;  %6825 = vmatprep.mubr.msk.bf16.mxu0 %vm7849_vm0, %v7848_v11 }
 0x1b8   :  { %6811 = vmatprep.subr.bf16.mxu0 %v7848_v11 }
 0x1bb   :  { %6812 = vmatpush3.bf16.msra.mxu0 %v7490_v7 }
 0x1bc   :  { %6813 = vmatprep.subr.bf16.mxu0 %v7848_v11 }
 0x1bf   :  { %6814 = vmatpush3.bf16.msra.mxu0 %v7491_v8 }
 0x1c0   :  { %6815 = vmatprep.subr.bf16.mxu0 %v7848_v11 }
 0x1c3   :  { %6816 = vmatpush3.bf16.msra.mxu0 %v7492_v9 }
 0x1c4   :  { %6817 = vmatprep.subr.bf16.mxu0 %v7848_v11 }
 0x1c7   :  { %6818 = vmatpush3.bf16.msra.mxu0 %v7493_v10 }
 0x1c8   :  { %6819 = vmatprep.subr.bf16.mxu0 %v7848_v11 }
 0x1cb   :  { %6820 = vmatpush3.bf16.msra.mxu0 %v7494_v12 }
 0x1cc   :  { %6821 = vmatprep.subr.bf16.mxu0 %v7848_v11 }
 0x1cf   :  { %6822 = vmatpush3.bf16.msra.mxu0 %v7495_v13 }
 0x1d0   :  { %6823 = vmatprep.subr.bf16.mxu0 %v7848_v11 }
 0x1d3   :  { %6824 = vmatpush3.bf16.msra.mxu0 %v7496_v14 }
 0x1d4   :  { %6853 = vmatprep.subr.bf16.mxu0 %v7848_v11 }
 0x1d6   :  { %6826 = vmatmul.mubr.bf16.vlgmr.msra.gmra.mrb[12].mxu0 %v8063_v54 }
 0x1d7   :  { %6857 = vmatprep.mubr.msk.bf16.mxu0 %vm7849_vm0, %v7848_v11 }
 0x249   :  { %v303_v16 = vpop.f32.mrb[0].mxu0  ;;  %v415_v17 = vpop.f32.mrb[0].mxu1 }
 0x24a   :  { %v416_v18 = vadd.f32 %v5719_v15, %v415_v17  ;;  %v6703_v19 = vpop.f32.mrb[1].mxu0  ;;  %v6723_v20 = vpop.f32.mrb[1].mxu1  ;;  %v304_v29 = vadd.f32 %v5710_v26, %v303_v16 }
 0x24b   :  { %v306_v21 = vpop.f32.mrb[2].mxu0  ;;  %v418_v22 = vpop.f32.mrb[2].mxu1 }
 0x24c   :  { %v536_v23 = vpack.c.bf16 %v416_v18, %v416_v18  ;;  %v6704_v24 = vpop.f32.mrb[3].mxu0  ;;  %v6724_v25 = vpop.f32.mrb[3].mxu1  ;;  %v419_v28 = vadd.f32 %v5719_v15, %v418_v22  ;;  %v534_v31 = vpack.c.bf16 %v304_v29, %v304_v29  ;;  %v307_v33 = vadd.f32 %v5710_v26, %v306_v21 }
 0x24e   :  { %v545_v27 = vsel %vm540_vm5, %v536_v23, 0  ;;  %v537_v30 = vpack.c.bf16 %v419_v28, %v419_v28  ;;  %v535_v34 = vpack.c.bf16 %v307_v33, %v307_v33  ;;  %v7497_v28 = vld [vmem:[%s7898_s3 + $0x40] sm:$0xff]  }
 0x24f   :  { %6746 = vmatpush3.bf16.xpose.msra.mxu1 %v545_v27  ;;  %v7501_v33 = vld [vmem:[%s7898_s3 + $0x60] sm:$0xff]  }
 0x250   :  { %6751 = vmatprep.subr.bf16.mxu1 %v7848_v11  ;;  %v591_v32 = vsel %vm540_vm5, %v537_v30, 0  ;;  %v7498_v30 = vld [vmem:[%s7898_s3 + $0x48] sm:$0xff]  }
 0x256   :  { %6748 = vmatmul.mubr.msk.bf16.vlgmr.msra.gmra.mrb[4].mxu1 %vm540_vm5, %v534_v31  ;;  %v7499_v31 = vld [vmem:[%s7898_s3 + $0x50] sm:$0xff]  }
 0x257   :  { %6752 = vmatpush3.bf16.xpose.msra.mxu1 %v591_v32  ;;  %6753 = vmatprep.mubr.msk.bf16.mxu1 %vm7849_vm0, %v7848_v11  ;;  %v7500_v32 = vld [vmem:[%s7898_s3 + $0x58] sm:$0xff]  }
 0x258   :  { %6757 = vmatprep.subr.bf16.mxu1 %v7848_v11 }
 0x25e   :  { %6754 = vmatmul.mubr.msk.bf16.vlgmr.msra.gmra.mrb[8].mxu1 %vm540_vm5, %v535_v34  ;;  %v7502_v34 = vld [vmem:[%s7898_s3 + $0x68] sm:$0xff]  }
 0x25f   :  { %6759 = vmatprep.mubr.msk.bf16.mxu1 %vm7849_vm0, %v7848_v11 }
 0x269   :  { %v527_v36 = vpop.f32.mrb[4].mxu0 }
 0x26a   :  { %v528_v37 = vadd.f32 %v5728_v35, %v527_v36  ;;  %v6743_v38 = vpop.f32.mrb[5].mxu0  ;;  %v7504_v36 = vld [vmem:[%s7898_s3 + $0x78] sm:$0xff]  }
 0x26b   :  { %v530_v39 = vpop.f32.mrb[6].mxu0 }
 0x26c   :  { %v538_v40 = vpack.c.bf16 %v528_v37, %v528_v37  ;;  %v531_v41 = vadd.f32 %v5728_v35, %v530_v39  ;;  %v6744_v42 = vpop.f32.mrb[7].mxu0  ;;  %v7503_v35 = vld [vmem:[%s7898_s3 + $0x70] sm:$0xff]  }
 0x26e   :  { %v663_v43 = vsel %vm661_vm6, %v538_v40, 0  ;;  %v539_v22 = vpack.c.bf16 %v531_v41, %v531_v41 }
 0x26f   :  { %6758 = vmatpush3.bf16.msra.mxu1 %v663_v43 }
 0x270   :  { %6763 = vmatprep.subr.bf16.mxu1 %v7848_v11  ;;  %v709_v25 = vsel %vm661_vm6, %v539_v22, 0 }
 0x289   :  { %v8142_v44 = vpop.f32.mrb[8].mxu0 }
 0x28a   :  { %v6787_v45 = vpop.f32.mrb[9].mxu0 }
 0x28b   :  { %v8144_v46 = vpop.f32.mrb[10].mxu0 }
 0x28c   :  { %v6788_v47 = vpop.f32.mrb[11].mxu0 }
 0x2a9   :  { %v8146_v48 = vpop.f32.mrb[12].mxu0 }
 0x2aa   :  { %v6827_v49 = vpop.f32.mrb[13].mxu0 }
 0x2ab   :  { %v1094_v51 = vpop.f32.mrb[14].mxu0  ;;  %v5784_v49 = vld [vmem:[%s7903_s8 + $0x1] ss:$0 sm:$0xff] }
 0x2ac   :  { %v8152_v52 = vadd.f32 %v8149_v50, %v1094_v51  ;;  %v6828_v53 = vpop.f32.mrb[15].mxu0 }
 0x329   :  { %v581_v60 = vpop.f32.mrb[4].mxu1 }
 0x32a   :  { %v582_v61 = vadd.f32 %v581_v60, %v8157_v59  ;;  %v6749_v62 = vpop.f32.mrb[5].mxu1 }
 0x32b   :  { %v584_v63 = vpop.f32.mrb[6].mxu1 }
 0x32c   :  { %v6750_v0 = vpop.f32.mrb[7].mxu1  ;;  %v634_v1 = vsel %vm633_vm8, %v582_v61, -inf }
 0x32d   :  { %635 = vmax.xlane.f32.xlu0 %v634_v1 }
 0x331   :  { %v627_v2 = vpop.f32.mrb[8].mxu1 }
 0x332   :  { %v628_v3 = vadd.f32 %v627_v2, %v8157_v59  ;;  %v6755_v4 = vpop.f32.mrb[9].mxu1 }
 0x333   :  { %v630_v5 = vpop.f32.mrb[10].mxu1 }
 0x334   :  { %v6756_v6 = vpop.f32.mrb[11].mxu1  ;;  %v637_v7 = vsel %vm633_vm8, %v628_v3, -inf }
 0x335   :  { %638 = vmax.xlane.f32.xlu1 %v637_v7 }
 0x3ba   :  { %v636_v8 = vpop.xlane.xlu0 %635 }
 0x3bb   :  { %v640_v9 = vsub.f32 %v582_v61, %v636_v8  ;;  %v5758_v61 = vld [vmem:[%s7893_s29 + $0x1] ss:$0 sm:$0xff] }
 0x3bc   :  { %v864_v0 = vadd.f32 %v5758_v61, %v8142_v44  ;;  %v867_v5 = vadd.f32 %v5758_v61, %v8144_v46 }
 0x3bd   :  { %v642_v10 = vmul.f32 1.442695, %v640_v9 }
 0x3be   :  { %v1098_v2 = vpack.c.bf16 %v864_v0, %v864_v0  ;;  %v1099_v6 = vpack.c.bf16 %v867_v5, %v867_v5  ;;  %v7519_v5 = vld [vmem:[%s7888_s25 + $0x90] sm:$0xff]  }
 0x3bf   :  { %7713 = vpow2.f32 %v642_v10 }
 0x3c2   :  { %v639_v12 = vpop.xlane.xlu1 %638 }
 0x3c3   :  { %v641_v13 = vsub.f32 %v628_v3, %v639_v12  ;;  %v1092_v3 = vadd.f32 %v8149_v50, %v8146_v48 }
 0x3c5   :  { %v644_v14 = vmul.f32 1.442695, %v641_v13  ;;  %v1102_v44 = vpack.c.bf16 %v1092_v3, %v1092_v3  ;;  %v7518_v3 = vld [vmem:[%s7888_s25 + $0x88] sm:$0xff]  }
 0x3c7   :  { %7715 = vpow2.f32 %v644_v14  ;;  %v1224_v7 = vsel %vm661_vm6, %v1102_v44, 0 }
 0x3c9   :  { %v7714_v15 = vpop.eup %7713 }
 0x3ca   :  { %v646_v16 = vsel %vm633_vm8, %v7714_v15, 0.0 }
 0x3cb   :  { %647 = vadd.xlane.f32.xlu0 %v646_v16 }
 0x3d1   :  { %v7716_v17 = vpop.eup %7715 }
 0x3d2   :  { %v649_v18 = vsel %vm633_vm8, %v7716_v17, 0.0 }
 0x3d3   :  { %650 = vadd.xlane.f32.xlu1 %v649_v18 }
 0x458   :  { %v648_v19 = vpop.xlane.xlu0 %647 }
 0x459   :  { %7717 = vrcp.f32 %v648_v19 }
 0x460   :  { %v651_v20 = vpop.xlane.xlu1 %650 }
 0x461   :  { %7719 = vrcp.f32 %v651_v20 }
 0x463   :  { %v7718_v21 = vpop.eup %7717 }
 0x464   :  { %v654_v23 = vmul.f32 %v7718_v21, %v7714_v15 }
 0x466   :  { %v656_v24 = vpack.c.bf16 %v654_v23, %v654_v23 }
 0x468   :  { %6760 = vmatmul.mubr.msk.bf16.vlgmr.msra.gmra.mrb[12].mxu1 %vm633_vm8, %v656_v24 }
 0x469   :  { %6764 = vmatpush3.bf16.msra.mxu1 %v709_v25  ;;  %6765 = vmatprep.mubr.msk.bf16.mxu1 %vm7849_vm0, %v7848_v11 }
 0x46a   :  { %6789 = vmatprep.subr.bf16.mxu1 %v7848_v11 }
 0x46b   :  { %v7720_v26 = vpop.eup %7719 }
 0x46c   :  { %v655_v27 = vmul.f32 %v7720_v26, %v7716_v17 }
 0x46e   :  { %v657_v29 = vpack.c.bf16 %v655_v27, %v655_v27 }
 0x470   :  { %6766 = vmatmul.mubr.msk.bf16.vlgmr.msra.gmra.mrb[16].mxu1 %vm633_vm8, %v657_v29 }
 0x471   :  { %6790 = vmatpush3.bf16.msra.mxu1 %v7497_v28  ;;  %6805 = vmatprep.mubr.msk.bf16.mxu1 %vm7849_vm0, %v7848_v11 }
 0x472   :  { %6791 = vmatprep.subr.bf16.mxu1 %v7848_v11 }
 0x475   :  { %6792 = vmatpush3.bf16.msra.mxu1 %v7498_v30 }
 0x476   :  { %6793 = vmatprep.subr.bf16.mxu1 %v7848_v11 }
 0x479   :  { %6794 = vmatpush3.bf16.msra.mxu1 %v7499_v31  ;;  %v1103_v31 = vpack.c.bf16 %v8152_v52, %v8152_v52  ;;  %v7506_v52 = vld [vmem:[%s7918_s24 + $0x8] sm:$0xff]  }
 0x47a   :  { %6795 = vmatprep.subr.bf16.mxu1 %v7848_v11 }
 0x47d   :  { %6796 = vmatpush3.bf16.msra.mxu1 %v7500_v32 }
 0x47e   :  { %6797 = vmatprep.subr.bf16.mxu1 %v7848_v11 }
 0x481   :  { %6798 = vmatpush3.bf16.msra.mxu1 %v7501_v33 }
 0x482   :  { %6799 = vmatprep.subr.bf16.mxu1 %v7848_v11 }
 0x485   :  { %6800 = vmatpush3.bf16.msra.mxu1 %v7502_v34  ;;  %v1270_v34 = vsel %vm661_vm6, %v1103_v31, 0 }
 0x486   :  { %6801 = vmatprep.subr.bf16.mxu1 %v7848_v11 }
 0x489   :  { %6802 = vmatpush3.bf16.msra.mxu1 %v7503_v35 }
 0x48a   :  { %6803 = vmatprep.subr.bf16.mxu1 %v7848_v11 }
 0x48d   :  { %6804 = vmatpush3.bf16.msra.mxu1 %v7504_v36 }
 0x48e   :  { %6829 = vmatprep.subr.bf16.mxu1 %v7848_v11 }
 0x490   :  { %6806 = vmatmul.mubr.bf16.vlgmr.msra.gmra.mrb[20].mxu1 %v8063_v54 }
 0x491   :  { %6831 = vmatprep.mubr.msk.bf16.mxu1 %vm7849_vm0, %v7848_v11 }
 0x53b   :  { %v8192_v37 = vpop.f32.mrb[12].mxu1 }
 0x53c   :  { %v6761_v38 = vpop.f32.mrb[13].mxu1 }
 0x53d   :  { %v702_v39 = vpop.f32.mrb[14].mxu1  ;;  %v7505_v38 = vld [vmem:[%s7918_s24] sm:$0xff]  }
 0x53e   :  { %v6762_v40 = vpop.f32.mrb[15].mxu1 }
 0x53f   :  { %v7507_v40 = vld [vmem:[%s7898_s3 + $0x80] sm:$0xff]  }
 0x543   :  { %v8194_v41 = vpop.f32.mrb[16].mxu1 }
 0x544   :  { %v751_v42 = vpack.c.bf16 %v8194_v41, %v8192_v37  ;;  %v6767_v43 = vpop.f32.mrb[17].mxu1  ;;  %v7511_v37 = vld [vmem:[%s7898_s3 + $0xa0] sm:$0xff]   ;;  %v7512_v41 = vld [vmem:[%s7898_s3 + $0xa8] sm:$0xff]  }
 0x545   :  { %v748_v45 = vpop.f32.mrb[18].mxu1  ;;  %v7508_v43 = vld [vmem:[%s7898_s3 + $0x88] sm:$0xff]  }
 0x546   :  { %v6768_v47 = vpop.f32.mrb[19].mxu1  ;;  %v7509_v45 = vld [vmem:[%s7898_s3 + $0x90] sm:$0xff]  }
 0x547   :  { %v7510_v47 = vld [vmem:[%s7898_s3 + $0x98] sm:$0xff]  }
 0x563   :  { %v977_v51 = vpop.f32.mrb[20].mxu1 }
 0x564   :  { %v978_v53 = vadd.f32 %v5784_v49, %v977_v51  ;;  %v6807_v55 = vpop.f32.mrb[21].mxu1  ;;  %v7515_v51 = vld [vmem:[%s7918_s24 + $0x10] sm:$0xff]  }
 0x565   :  { %v980_v57 = vpop.f32.mrb[22].mxu1  ;;  %6854 = vmatpush3.bf16.msra.mxu0 %v7515_v51 }
 0x566   :  { %v1100_v58 = vpack.c.bf16 %v978_v53, %v978_v53  ;;  %v6808_v60 = vpop.f32.mrb[23].mxu1  ;;  %v981_v63 = vadd.f32 %v5784_v49, %v980_v57  ;;  %v7514_v49 = vld [vmem:[%s7898_s3 + $0xb8] sm:$0xff]   ;;  %6855 = vmatprep.subr.bf16.mxu0 %v7848_v11 }
 0x567   :  { %v7516_v53 = vld [vmem:[%s7918_s24 + $0x18] sm:$0xff]  }
 0x568   :  { %v1108_v62 = vsel %vm540_vm5, %v1100_v58, 0  ;;  %v1101_v1 = vpack.c.bf16 %v981_v63, %v981_v63 }
 0x569   :  { %6830 = vmatpush3.bf16.xpose.msra.mxu1 %v1108_v62  ;;  %6856 = vmatpush3.bf16.msra.mxu0 %v7516_v53  ;;  %v7517_v62 = vld [vmem:[%s7888_s25 + $0x80] sm:$0xff]  }
 0x56a   :  { %6835 = vmatprep.subr.bf16.mxu1 %v7848_v11  ;;  %v1154_v4 = vsel %vm540_vm5, %v1101_v1, 0  ;;  %6869 = vmatprep.subr.bf16.mxu0 %v7848_v11 }
 0x570   :  { %6832 = vmatmul.mubr.msk.bf16.vlgmr.msra.gmra.mrb[24].mxu1 %vm540_vm5, %v1098_v2 }
 0x571   :  { %6836 = vmatpush3.bf16.xpose.msra.mxu1 %v1154_v4  ;;  %6837 = vmatprep.mubr.msk.bf16.mxu1 %vm7849_vm0, %v7848_v11 }
 0x572   :  { %6841 = vmatprep.subr.bf16.mxu1 %v7848_v11 }
 0x578   :  { %6838 = vmatmul.mubr.msk.bf16.vlgmr.msra.gmra.mrb[28].mxu1 %vm540_vm5, %v1099_v6 }
 0x579   :  { %6842 = vmatpush3.bf16.msra.mxu1 %v1224_v7  ;;  %6843 = vmatprep.mubr.msk.bf16.mxu1 %vm7849_vm0, %v7848_v11 }
 0x57a   :  { %6847 = vmatprep.subr.bf16.mxu1 %v7848_v11 }
 0x643   :  { %v1144_v48 = vpop.f32.mrb[24].mxu1 }
 0x644   :  { %v1145_v50 = vadd.f32 %v1144_v48, %v8157_v59  ;;  %v6833_v8 = vpop.f32.mrb[25].mxu1  ;;  %v7520_v48 = vld [vmem:[%s7888_s25 + $0x98] sm:$0xff]  }
 0x645   :  { %v1147_v9 = vpop.f32.mrb[26].mxu1  ;;  %v7522_v8 = vld [vmem:[%s7888_s25 + $0xa8] sm:$0xff]  }
 0x646   :  { %v6834_v46 = vpop.f32.mrb[27].mxu1  ;;  %v1196_v10 = vsel %vm633_vm8, %v1145_v50, -inf  ;;  %v7523_v9 = vld [vmem:[%s7888_s25 + $0xb0] sm:$0xff]  }
 0x647   :  { %1197 = vmax.xlane.f32.xlu0 %v1196_v10  ;;  %v7524_v46 = vld [vmem:[%s7888_s25 + $0xb8] sm:$0xff]   ;;  %v7525_v10 = vld [vmem:[%s7908_s14 + $0x80] sm:$0xff]  }
 0x64b   :  { %v1190_v12 = vpop.f32.mrb[28].mxu1 }
 0x64c   :  { %v1191_v13 = vadd.f32 %v1190_v12, %v8157_v59  ;;  %v6839_v14 = vpop.f32.mrb[29].mxu1  ;;  %v7526_v12 = vld [vmem:[%s7908_s14 + $0x88] sm:$0xff]  }
 0x64d   :  { %v1193_v15 = vpop.f32.mrb[30].mxu1 }
 0x64e   :  { %v6840_v16 = vpop.f32.mrb[31].mxu1  ;;  %v1199_v17 = vsel %vm633_vm8, %v1191_v13, -inf  ;;  %v7527_v15 = vld [vmem:[%s7908_s14 + $0x90] sm:$0xff]  }
 0x64f   :  { %1200 = vmax.xlane.f32.xlu1 %v1199_v17 }
 0x6d4   :  { %v1198_v18 = vpop.xlane.xlu0 %1197 }
 0x6d5   :  { %v1202_v19 = vsub.f32 %v1145_v50, %v1198_v18  ;;  %v7521_v50 = vld [vmem:[%s7888_s25 + $0xa0] sm:$0xff]  }
 0x6d7   :  { %v1204_v20 = vmul.f32 1.442695, %v1202_v19 }
 0x6d9   :  { %7721 = vpow2.f32 %v1204_v20 }
 0x6dc   :  { %v1201_v21 = vpop.xlane.xlu1 %1200 }
 0x6dd   :  { %v1203_v22 = vsub.f32 %v1191_v13, %v1201_v21  ;;  %v5876_v13 = vld [vmem:[%s7903_s8 + $0x2] ss:$0 sm:$0xff] }
 0x6df   :  { %v1206_v23 = vmul.f32 1.442695, %v1203_v22  ;;  %v7528_v22 = vld [vmem:[%s7908_s14 + $0x98] sm:$0xff]  }
 0x6e1   :  { %7723 = vpow2.f32 %v1206_v23 }
 0x6e3   :  { %v7722_v24 = vpop.eup %7721 }
 0x6e4   :  { %v1208_v25 = vsel %vm633_vm8, %v7722_v24, 0.0 }
 0x6e5   :  { %1209 = vadd.xlane.f32.xlu0 %v1208_v25  ;;  %v7530_v25 = vld [vmem:[%s7908_s14 + $0xa8] sm:$0xff]  }
 0x6eb   :  { %v7724_v26 = vpop.eup %7723 }
 0x6ec   :  { %v1211_v27 = vsel %vm633_vm8, %v7724_v26, 0.0 }
 0x6ed   :  { %1212 = vadd.xlane.f32.xlu1 %v1211_v27  ;;  %v7532_v27 = vld [vmem:[%s7908_s14 + $0xb8] sm:$0xff]  }
 0x772   :  { %v1210_v28 = vpop.xlane.xlu0 %1209 }
 0x773   :  { %7725 = vrcp.f32 %v1210_v28 }
 0x77a   :  { %v1213_v29 = vpop.xlane.xlu1 %1212 }
 0x77b   :  { %7727 = vrcp.f32 %v1213_v29 }
 0x77d   :  { %v7726_v30 = vpop.eup %7725 }
 0x77e   :  { %v1216_v32 = vmul.f32 %v7726_v30, %v7722_v24  ;;  %v7529_v24 = vld [vmem:[%s7908_s14 + $0xa0] sm:$0xff]  }
 0x780   :  { %v1218_v33 = vpack.c.bf16 %v1216_v32, %v1216_v32 }
 0x782   :  { %6844 = vmatmul.mubr.msk.bf16.vlgmr.msra.gmra.mrb[32].mxu1 %vm633_vm8, %v1218_v33 }
 0x783   :  { %6848 = vmatpush3.bf16.msra.mxu1 %v1270_v34  ;;  %6849 = vmatprep.mubr.msk.bf16.mxu1 %vm7849_vm0, %v7848_v11  ;;  %v5850_v34 = vld [vmem:[%s7893_s29 + $0x2] ss:$0 sm:$0xff] }
 0x784   :  { %6861 = vmatprep.subr.bf16.mxu1 %v7848_v11 }
 0x785   :  { %v7728_v35 = vpop.eup %7727 }
 0x786   :  { %v1217_v36 = vmul.f32 %v7728_v35, %v7724_v26  ;;  %v7531_v26 = vld [vmem:[%s7908_s14 + $0xb0] sm:$0xff]  }
 0x788   :  { %v1219_v39 = vpack.c.bf16 %v1217_v36, %v1217_v36 }
 0x78a   :  { %6850 = vmatmul.mubr.msk.bf16.vlgmr.msra.gmra.mrb[36].mxu1 %vm633_vm8, %v1219_v39 }
 0x78b   :  { %6862 = vmatpush3.bf16.msra.mxu1 %v7505_v38  ;;  %6865 = vmatprep.mubr.msk.bf16.mxu1 %vm7849_vm0, %v7848_v11 }
 0x78c   :  { %6863 = vmatprep.subr.bf16.mxu1 %v7848_v11 }
 0x78f   :  { %6864 = vmatpush3.bf16.msra.mxu1 %v7506_v52 }
 0x790   :  { %6889 = vmatprep.subr.bf16.mxu1 %v7848_v11 }
 0x792   :  { %6866 = vmatmul.mubr.msk.bf16.vlgmr.msra.gmra.mrb[40].mxu1 %vm540_vm5, %v751_v42  ;;  %v7513_v42 = vld [vmem:[%s7898_s3 + $0xb0] sm:$0xff]  }
 0x793   :  { %6890 = vmatpush3.bf16.msra.mxu1 %v7507_v40  ;;  %6905 = vmatprep.mubr.msk.bf16.mxu1 %vm7849_vm0, %v7848_v11 }
 0x794   :  { %6891 = vmatprep.subr.bf16.mxu1 %v7848_v11 }
 0x797   :  { %6892 = vmatpush3.bf16.msra.mxu1 %v7508_v43 }
 0x798   :  { %6893 = vmatprep.subr.bf16.mxu1 %v7848_v11 }
 0x79b   :  { %6894 = vmatpush3.bf16.msra.mxu1 %v7509_v45 }
 0x79c   :  { %6895 = vmatprep.subr.bf16.mxu1 %v7848_v11 }
 0x79f   :  { %6896 = vmatpush3.bf16.msra.mxu1 %v7510_v47 }
 0x7a0   :  { %6897 = vmatprep.subr.bf16.mxu1 %v7848_v11 }
 0x7a3   :  { %6898 = vmatpush3.bf16.msra.mxu1 %v7511_v37 }
 0x7a4   :  { %6899 = vmatprep.subr.bf16.mxu1 %v7848_v11 }
 0x7a7   :  { %6900 = vmatpush3.bf16.msra.mxu1 %v7512_v41  ;;  %v5902_v41 = vld [vmem:[%s7913_s19 + $0x2] ss:$0 sm:$0xff] }
 0x7a8   :  { %6901 = vmatprep.subr.bf16.mxu1 %v7848_v11 }
 0x7ab   :  { %6902 = vmatpush3.bf16.msra.mxu1 %v7513_v42 }
 0x7ac   :  { %6903 = vmatprep.subr.bf16.mxu1 %v7848_v11 }
 0x7af   :  { %6904 = vmatpush3.bf16.msra.mxu1 %v7514_v49 }
 0x7b0   :  { %6929 = vmatprep.subr.bf16.mxu1 %v7848_v11 }
 0x7b2   :  { %6906 = vmatmul.mubr.bf16.vlgmr.msra.gmra.mrb[44].mxu1 %v8063_v54 }
 0x7b3   :  { %6931 = vmatprep.mubr.msk.bf16.mxu1 %vm7849_vm0, %v7848_v11 }
 0x855   :  { %v1260_v55 = vpop.f32.mrb[32].mxu1 }
 0x856   :  { %v6845_v57 = vpop.f32.mrb[33].mxu1 }
 0x857   :  { %v1263_v58 = vpop.f32.mrb[34].mxu1 }
 0x858   :  { %v6846_v60 = vpop.f32.mrb[35].mxu1 }
 0x85d   :  { %v1306_v61 = vpop.f32.mrb[36].mxu1 }
 0x85e   :  { %v1312_v63 = vpack.c.bf16 %v1306_v61, %v1260_v55  ;;  %v6851_v0 = vpop.f32.mrb[37].mxu1 }
 0x85f   :  { %v1309_v1 = vpop.f32.mrb[38].mxu1 }
 0x860   :  { %v6852_v2 = vpop.f32.mrb[39].mxu1  ;;  %6858 = vmatmul.mubr.msk.bf16.vlgmr.msra.gmra.mrb[16].mxu0 %vm540_vm5, %v1312_v63 }
 0x861   :  { %6870 = vmatpush3.bf16.msra.mxu0 %v7517_v62  ;;  %6885 = vmatprep.mubr.msk.bf16.mxu0 %vm7849_vm0, %v7848_v11 }
 0x862   :  { %6871 = vmatprep.subr.bf16.mxu0 %v7848_v11 }
 0x865   :  { %6872 = vmatpush3.bf16.msra.mxu0 %v7518_v3  ;;  %v8271_v4 = vpop.f32.mrb[40].mxu1 }
 0x866   :  { %v6867_v44 = vpop.f32.mrb[41].mxu1  ;;  %6873 = vmatprep.subr.bf16.mxu0 %v7848_v11 }
 0x867   :  { %v1426_v6 = vpop.f32.mrb[42].mxu1 }
 0x868   :  { %v6868_v7 = vpop.f32.mrb[43].mxu1 }
 0x869   :  { %6874 = vmatpush3.bf16.msra.mxu0 %v7519_v5 }
 0x86a   :  { %6875 = vmatprep.subr.bf16.mxu0 %v7848_v11 }
 0x86d   :  { %6876 = vmatpush3.bf16.msra.mxu0 %v7520_v48 }
 0x86e   :  { %6877 = vmatprep.subr.bf16.mxu0 %v7848_v11 }
 0x871   :  { %6878 = vmatpush3.bf16.msra.mxu0 %v7521_v50 }
 0x872   :  { %6879 = vmatprep.subr.bf16.mxu0 %v7848_v11 }
 0x875   :  { %6880 = vmatpush3.bf16.msra.mxu0 %v7522_v8 }
 0x876   :  { %6881 = vmatprep.subr.bf16.mxu0 %v7848_v11 }
 0x879   :  { %6882 = vmatpush3.bf16.msra.mxu0 %v7523_v9 }
 0x87a   :  { %6883 = vmatprep.subr.bf16.mxu0 %v7848_v11 }
 0x87d   :  { %6884 = vmatpush3.bf16.msra.mxu0 %v7524_v46 }
 0x87e   :  { %6909 = vmatprep.subr.bf16.mxu0 %v7848_v11 }
 0x880   :  { %6886 = vmatmul.mubr.bf16.vlgmr.msra.gmra.mrb[20].mxu0 %v8063_v54 }
 0x881   :  { %6910 = vmatpush3.bf16.msra.mxu0 %v7525_v10  ;;  %6925 = vmatprep.mubr.msk.bf16.mxu0 %vm7849_vm0, %v7848_v11 }
 0x882   :  { %6911 = vmatprep.subr.bf16.mxu0 %v7848_v11 }
 0x885   :  { %v1651_v14 = vpop.f32.mrb[44].mxu1  ;;  %6912 = vmatpush3.bf16.msra.mxu0 %v7526_v12 }
 0x886   :  { %v1652_v16 = vadd.f32 %v5876_v13, %v1651_v14  ;;  %v6907_v17 = vpop.f32.mrb[45].mxu1  ;;  %6913 = vmatprep.subr.bf16.mxu0 %v7848_v11 }
 0x887   :  { %v1654_v18 = vpop.f32.mrb[46].mxu1 }
 0x888   :  { %v1774_v19 = vpack.c.bf16 %v1652_v16, %v1652_v16  ;;  %v1655_v20 = vadd.f32 %v5876_v13, %v1654_v18  ;;  %v6908_v21 = vpop.f32.mrb[47].mxu1 }
 0x889   :  { %6914 = vmatpush3.bf16.msra.mxu0 %v7527_v15 }
 0x88a   :  { %v1782_v23 = vsel %vm540_vm5, %v1774_v19, 0  ;;  %6915 = vmatprep.subr.bf16.mxu0 %v7848_v11  ;;  %v1775_v36 = vpack.c.bf16 %v1655_v20, %v1655_v20 }
 0x88b   :  { %6930 = vmatpush3.bf16.xpose.msra.mxu1 %v1782_v23 }
 0x88c   :  { %6935 = vmatprep.subr.bf16.mxu1 %v7848_v11  ;;  %v1828_v45 = vsel %vm540_vm5, %v1775_v36, 0  ;;  %v7541_v36 = vld [vmem:[%s7908_s14 + $0xc0] sm:$0xff]  }
 0x88d   :  { %6916 = vmatpush3.bf16.msra.mxu0 %v7528_v22 }
 0x88e   :  { %6917 = vmatprep.subr.bf16.mxu0 %v7848_v11 }
 0x891   :  { %6918 = vmatpush3.bf16.msra.mxu0 %v7529_v24 }
 0x892   :  { %6919 = vmatprep.subr.bf16.mxu0 %v7848_v11 }
 0x895   :  { %6920 = vmatpush3.bf16.msra.mxu0 %v7530_v25  ;;  %v7533_v25 = vld [vmem:[%s7888_s25 + $0xc0] sm:$0xff]  }
 0x896   :  { %6921 = vmatprep.subr.bf16.mxu0 %v7848_v11 }
 0x899   :  { %6922 = vmatpush3.bf16.msra.mxu0 %v7531_v26 }
 0x89a   :  { %6923 = vmatprep.subr.bf16.mxu0 %v7848_v11 }
 0x89d   :  { %6924 = vmatpush3.bf16.msra.mxu0 %v7532_v27  ;;  %v7534_v27 = vld [vmem:[%s7888_s25 + $0xc8] sm:$0xff]  }
 0x89e   :  { %6953 = vmatprep.subr.bf16.mxu0 %v7848_v11 }
 0x8a0   :  { %6926 = vmatmul.mubr.bf16.vlgmr.msra.gmra.mrb[24].mxu0 %v8063_v54 }
 0x8a1   :  { %6957 = vmatprep.mubr.msk.bf16.mxu0 %vm7849_vm0, %v7848_v11 }
 0x933   :  { %v1367_v28 = vpop.f32.mrb[16].mxu0 }
 0x934   :  { %v8312_v29 = vadd.f32 %v8271_v4, %v1367_v28  ;;  %v6859_v30 = vpop.f32.mrb[17].mxu0  ;;  %v7535_v28 = vld [vmem:[%s7888_s25 + $0xd0] sm:$0xff]  }
 0x935   :  { %v1370_v31 = vpop.f32.mrb[18].mxu0  ;;  %v7536_v30 = vld [vmem:[%s7888_s25 + $0xd8] sm:$0xff]  }
 0x936   :  { %v8314_v32 = vadd.f32 %v1426_v6, %v1370_v31  ;;  %v6860_v33 = vpop.f32.mrb[19].mxu0  ;;  %v7537_v31 = vld [vmem:[%s7888_s25 + $0xe0] sm:$0xff]  }
 0x937   :  { %v7538_v33 = vld [vmem:[%s7888_s25 + $0xe8] sm:$0xff]  }
 0x953   :  { %v1537_v35 = vpop.f32.mrb[20].mxu0 }
 0x954   :  { %v1538_v38 = vadd.f32 %v5850_v34, %v1537_v35  ;;  %v6887_v39 = vpop.f32.mrb[21].mxu0  ;;  %v7540_v35 = vld [vmem:[%s7888_s25 + $0xf8] sm:$0xff]  }
 0x955   :  { %v1540_v52 = vpop.f32.mrb[22].mxu0  ;;  %v7543_v39 = vld [vmem:[%s7908_s14 + $0xd0] sm:$0xff]  }
 0x956   :  { %v1772_v40 = vpack.c.bf16 %v1538_v38, %v1538_v38  ;;  %v6888_v43 = vpop.f32.mrb[23].mxu0  ;;  %v1541_v47 = vadd.f32 %v5850_v34, %v1540_v52  ;;  %v7539_v34 = vld [vmem:[%s7888_s25 + $0xf0] sm:$0xff]   ;;  %v7542_v38 = vld [vmem:[%s7908_s14 + $0xc8] sm:$0xff]   ;;  %v7544_v52 = vld [vmem:[%s7908_s14 + $0xd8] sm:$0xff]   ;;  %s8903_s25 = sld [smem:[#allocation11_spill]] }
 0x957   :  { %v7546_v43 = vld [vmem:[%s7908_s14 + $0xe8] sm:$0xff]  }
 0x958   :  { %6932 = vmatmul.mubr.msk.bf16.vlgmr.msra.gmra.mrb[48].mxu1 %vm540_vm5, %v1772_v40  ;;  %v1773_v37 = vpack.c.bf16 %v1541_v47, %v1541_v47  ;;  %v7545_v40 = vld [vmem:[%s7908_s14 + $0xe0] sm:$0xff]   ;;  %v7548_v47 = vld [vmem:[%s7908_s14 + $0xf8] sm:$0xff]  }
 0x959   :  { %6936 = vmatpush3.bf16.xpose.msra.mxu1 %v1828_v45  ;;  %6937 = vmatprep.mubr.msk.bf16.mxu1 %vm7849_vm0, %v7848_v11  ;;  %v7547_v45 = vld [vmem:[%s7908_s14 + $0xf0] sm:$0xff]   ;;  %s8907_s14 = sld [smem:[#allocation16_spill]] }
 0x95a   :  { %6941 = vmatprep.subr.bf16.mxu1 %v7848_v11 }
 0x960   :  { %6938 = vmatmul.mubr.msk.bf16.vlgmr.msra.gmra.mrb[52].mxu1 %vm540_vm5, %v1773_v37  ;;  %v7549_v37 = vld [vmem:[%s7918_s24 + $0x20] sm:$0xff]  }
 0x961   :  { %6943 = vmatprep.mubr.msk.bf16.mxu1 %vm7849_vm0, %v7848_v11  ;;  %6954 = vmatpush3.bf16.msra.mxu0 %v7549_v37 }
 0x962   :  { %6955 = vmatprep.subr.bf16.mxu0 %v7848_v11 }
 0x973   :  { %v1765_v42 = vpop.f32.mrb[24].mxu0 }
 0x974   :  { %v1766_v49 = vadd.f32 %v5902_v41, %v1765_v42  ;;  %v6927_v51 = vpop.f32.mrb[25].mxu0 }
 0x975   :  { %v1768_v53 = vpop.f32.mrb[26].mxu0 }
 0x976   :  { %v1776_v55 = vpack.c.bf16 %v1766_v49, %v1766_v49  ;;  %v1769_v57 = vadd.f32 %v5902_v41, %v1768_v53  ;;  %v6928_v58 = vpop.f32.mrb[27].mxu0  ;;  %v7550_v41 = vld [vmem:[%s7918_s24 + $0x28] sm:$0xff]  }
 0x977   :  { %6956 = vmatpush3.bf16.msra.mxu0 %v7550_v41 }
 0x978   :  { %v1898_v60 = vsel %vm661_vm6, %v1776_v55, 0  ;;  %v1777_v19 = vpack.c.bf16 %v1769_v57, %v1769_v57  ;;  %6981 = vmatprep.subr.bf16.mxu0 %v7848_v11  ;;  %v7551_v57 = vld [vmem:[%s7898_s3 + $0xc0] sm:$0xff]  }
 0x979   :  { %6942 = vmatpush3.bf16.msra.mxu1 %v1898_v60 }
 0x97a   :  { %6947 = vmatprep.subr.bf16.mxu1 %v7848_v11  ;;  %v1944_v22 = vsel %vm661_vm6, %v1777_v19, 0 }
 0xa2b   :  { %v1818_v61 = vpop.f32.mrb[48].mxu1 }
 0xa2c   :  { %v1819_v62 = vadd.f32 %v1818_v61, %v8157_v59  ;;  %v6933_v63 = vpop.f32.mrb[49].mxu1 }
 0xa2d   :  { %v1821_v0 = vpop.f32.mrb[50].mxu1  ;;  %v7552_v63 = vld [vmem:[%s7898_s3 + $0xc8] sm:$0xff]  }
 0xa2e   :  { %v6934_v1 = vpop.f32.mrb[51].mxu1  ;;  %v1870_v2 = vsel %vm633_vm8, %v1819_v62, -inf  ;;  %v7553_v0 = vld [vmem:[%s7898_s3 + $0xd0] sm:$0xff]  }
 0xa2f   :  { %1871 = vmax.xlane.f32.xlu0 %v1870_v2  ;;  %v7554_v1 = vld [vmem:[%s7898_s3 + $0xd8] sm:$0xff]   ;;  %v7555_v2 = vld [vmem:[%s7898_s3 + $0xe0] sm:$0xff]  }
 0xa33   :  { %v1864_v3 = vpop.f32.mrb[52].mxu1 }
 0xa34   :  { %v1865_v4 = vadd.f32 %v1864_v3, %v8157_v59  ;;  %v6939_v5 = vpop.f32.mrb[53].mxu1  ;;  %v7556_v3 = vld [vmem:[%s7898_s3 + $0xe8] sm:$0xff]  }
 0xa35   :  { %v1867_v44 = vpop.f32.mrb[54].mxu1  ;;  %v7558_v5 = vld [vmem:[%s7898_s3 + $0xf8] sm:$0xff]  }
 0xa36   :  { %v6940_v6 = vpop.f32.mrb[55].mxu1  ;;  %v1873_v7 = vsel %vm633_vm8, %v1865_v4, -inf }
 0xa37   :  { %1874 = vmax.xlane.f32.xlu1 %v1873_v7 }
 0xabc   :  { %v1872_v48 = vpop.xlane.xlu0 %1871 }
 0xabd   :  { %v1876_v50 = vsub.f32 %v1819_v62, %v1872_v48 }
 0xabf   :  { %v1878_v8 = vmul.f32 1.442695, %v1876_v50 }
 0xac1   :  { %7729 = vpow2.f32 %v1878_v8 }
 0xac4   :  { %v1875_v9 = vpop.xlane.xlu1 %1874 }
 0xac5   :  { %v1877_v46 = vsub.f32 %v1865_v4, %v1875_v9  ;;  %v7557_v4 = vld [vmem:[%s7898_s3 + $0xf0] sm:$0xff]   ;;  %v5991_v9 = vld [vmem:[%s7913_s19 + $0x3] ss:$0 sm:$0xff]  ;;  %s8905_s3 = sld [smem:[#allocation12_spill]]  ;;  %s8908_s19 = sld [smem:[#allocation14_spill]] }
 0xac7   :  { %v1880_v10 = vmul.f32 1.442695, %v1877_v46 }
 0xac9   :  { %7731 = vpow2.f32 %v1880_v10 }
 0xacb   :  { %v7730_v12 = vpop.eup %7729 }
 0xacc   :  { %v1882_v13 = vsel %vm633_vm8, %v7730_v12, 0.0 }
 0xacd   :  { %1883 = vadd.xlane.f32.xlu0 %v1882_v13 }
 0xad3   :  { %v7732_v14 = vpop.eup %7731 }
 0xad4   :  { %v1885_v15 = vsel %vm633_vm8, %v7732_v14, 0.0 }
 0xad5   :  { %1886 = vadd.xlane.f32.xlu1 %v1885_v15 }
 0xb5a   :  { %v1884_v16 = vpop.xlane.xlu0 %1883 }
 0xb5b   :  { %7733 = vrcp.f32 %v1884_v16 }
 0xb62   :  { %v1887_v17 = vpop.xlane.xlu1 %1886 }
 0xb63   :  { %7735 = vrcp.f32 %v1887_v17 }
 0xb65   :  { %v7734_v18 = vpop.eup %7733 }
 0xb66   :  { %v1890_v20 = vmul.f32 %v7734_v18, %v7730_v12  ;;  %v5965_v18 = vld [vmem:[%s7903_s8 + $0x3] ss:$0 sm:$0xff]  ;;  %s8906_s8 = sld [smem:[#allocation13_spill]] }
 0xb68   :  { %v1892_v21 = vpack.c.bf16 %v1890_v20, %v1890_v20 }
 0xb6a   :  { %6944 = vmatmul.mubr.msk.bf16.vlgmr.msra.gmra.mrb[56].mxu1 %vm633_vm8, %v1892_v21 }
 0xb6b   :  { %6948 = vmatpush3.bf16.msra.mxu1 %v1944_v22  ;;  %6949 = vmatprep.mubr.msk.bf16.mxu1 %vm7849_vm0, %v7848_v11 }
 0xb6c   :  { %6961 = vmatprep.subr.bf16.mxu1 %v7848_v11 }
 0xb6d   :  { %v7736_v23 = vpop.eup %7735 }
 0xb6e   :  { %v1891_v24 = vmul.f32 %v7736_v23, %v7732_v14 }
 0xb70   :  { %v1893_v26 = vpack.c.bf16 %v1891_v24, %v1891_v24 }
 0xb72   :  { %6950 = vmatmul.mubr.msk.bf16.vlgmr.msra.gmra.mrb[60].mxu1 %vm633_vm8, %v1893_v26 }
 0xb73   :  { %6962 = vmatpush3.bf16.msra.mxu1 %v7533_v25  ;;  %6977 = vmatprep.mubr.msk.bf16.mxu1 %vm7849_vm0, %v7848_v11  ;;  %v5939_v25 = vld [vmem:[%s7893_s29 + $0x3] ss:$0 sm:$0xff]  ;;  %s8904_s29 = sld [smem:[#allocation5_spill]] }
 0xb74   :  { %6963 = vmatprep.subr.bf16.mxu1 %v7848_v11 }
 0xb77   :  { %6964 = vmatpush3.bf16.msra.mxu1 %v7534_v27 }
 0xb78   :  { %6965 = vmatprep.subr.bf16.mxu1 %v7848_v11 }
 0xb7b   :  { %6966 = vmatpush3.bf16.msra.mxu1 %v7535_v28 }
 0xb7c   :  { %6967 = vmatprep.subr.bf16.mxu1 %v7848_v11 }
 0xb7f   :  { %6968 = vmatpush3.bf16.msra.mxu1 %v7536_v30 }
 0xb80   :  { %6969 = vmatprep.subr.bf16.mxu1 %v7848_v11 }
 0xb83   :  { %6970 = vmatpush3.bf16.msra.mxu1 %v7537_v31 }
 0xb84   :  { %6971 = vmatprep.subr.bf16.mxu1 %v7848_v11 }
 0xb87   :  { %6972 = vmatpush3.bf16.msra.mxu1 %v7538_v33 }
 0xb88   :  { %6973 = vmatprep.subr.bf16.mxu1 %v7848_v11 }
 0xb8b   :  { %6974 = vmatpush3.bf16.msra.mxu1 %v7539_v34 }
 0xb8c   :  { %6975 = vmatprep.subr.bf16.mxu1 %v7848_v11 }
 0xb8f   :  { %6976 = vmatpush3.bf16.msra.mxu1 %v7540_v35 }
 0xb90   :  { %7001 = vmatprep.subr.bf16.mxu1 %v7848_v11 }
 0xb92   :  { %6978 = vmatmul.mubr.bf16.vlgmr.msra.gmra.mrb[64].mxu1 %v8063_v54 }
 0xb93   :  { %7002 = vmatpush3.bf16.msra.mxu1 %v7541_v36  ;;  %7017 = vmatprep.mubr.msk.bf16.mxu1 %vm7849_vm0, %v7848_v11 }
 0xb94   :  { %7003 = vmatprep.subr.bf16.mxu1 %v7848_v11 }
 0xb97   :  { %7004 = vmatpush3.bf16.msra.mxu1 %v7542_v38 }
 0xb98   :  { %7005 = vmatprep.subr.bf16.mxu1 %v7848_v11 }
 0xb9b   :  { %7006 = vmatpush3.bf16.msra.mxu1 %v7543_v39 }
 0xb9c   :  { %7007 = vmatprep.subr.bf16.mxu1 %v7848_v11 }
 0xb9f   :  { %7008 = vmatpush3.bf16.msra.mxu1 %v7544_v52 }
 0xba0   :  { %7009 = vmatprep.subr.bf16.mxu1 %v7848_v11 }
 0xba3   :  { %7010 = vmatpush3.bf16.msra.mxu1 %v7545_v40 }
 0xba4   :  { %7011 = vmatprep.subr.bf16.mxu1 %v7848_v11 }
 0xba7   :  { %7012 = vmatpush3.bf16.msra.mxu1 %v7546_v43 }
 0xba8   :  { %7013 = vmatprep.subr.bf16.mxu1 %v7848_v11 }
 0xbab   :  { %7014 = vmatpush3.bf16.msra.mxu1 %v7547_v45 }
 0xbac   :  { %7015 = vmatprep.subr.bf16.mxu1 %v7848_v11 }
 0xbaf   :  { %7016 = vmatpush3.bf16.msra.mxu1 %v7548_v47 }
 0xbb0   :  { %7045 = vmatprep.subr.bf16.mxu1 %v7848_v11 }
 0xbb2   :  { %7018 = vmatmul.mubr.bf16.vlgmr.msra.gmra.mrb[68].mxu1 %v8063_v54 }
 0xbb3   :  { %7049 = vmatprep.mubr.msk.bf16.mxu1 %vm7849_vm0, %v7848_v11 }
 0xc3d   :  { %v1934_v42 = vpop.f32.mrb[56].mxu1 }
 0xc3e   :  { %v6945_v49 = vpop.f32.mrb[57].mxu1 }
 0xc3f   :  { %v1937_v51 = vpop.f32.mrb[58].mxu1 }
 0xc40   :  { %v6946_v53 = vpop.f32.mrb[59].mxu1 }
 0xc45   :  { %v1980_v55 = vpop.f32.mrb[60].mxu1 }
 0xc46   :  { %v1986_v58 = vpack.c.bf16 %v1980_v55, %v1934_v42  ;;  %v6951_v60 = vpop.f32.mrb[61].mxu1 }
 0xc47   :  { %v1983_v61 = vpop.f32.mrb[62].mxu1 }
 0xc48   :  { %v6952_v62 = vpop.f32.mrb[63].mxu1  ;;  %6958 = vmatmul.mubr.msk.bf16.vlgmr.msra.gmra.mrb[28].mxu0 %vm540_vm5, %v1986_v58 }
 0xc49   :  { %6982 = vmatpush3.bf16.msra.mxu0 %v7551_v57  ;;  %6997 = vmatprep.mubr.msk.bf16.mxu0 %vm7849_vm0, %v7848_v11 }
 0xc4a   :  { %6983 = vmatprep.subr.bf16.mxu0 %v7848_v11 }
 0xc4d   :  { %6984 = vmatpush3.bf16.msra.mxu0 %v7552_v63 }
 0xc4e   :  { %6985 = vmatprep.subr.bf16.mxu0 %v7848_v11 }
 0xc51   :  { %6986 = vmatpush3.bf16.msra.mxu0 %v7553_v0 }
 0xc52   :  { %6987 = vmatprep.subr.bf16.mxu0 %v7848_v11 }
 0xc55   :  { %6988 = vmatpush3.bf16.msra.mxu0 %v7554_v1 }
 0xc56   :  { %6989 = vmatprep.subr.bf16.mxu0 %v7848_v11 }
 0xc59   :  { %6990 = vmatpush3.bf16.msra.mxu0 %v7555_v2 }
 0xc5a   :  { %6991 = vmatprep.subr.bf16.mxu0 %v7848_v11 }
 0xc5d   :  { %6992 = vmatpush3.bf16.msra.mxu0 %v7556_v3 }
 0xc5e   :  { %6993 = vmatprep.subr.bf16.mxu0 %v7848_v11 }
 0xc61   :  { %6994 = vmatpush3.bf16.msra.mxu0 %v7557_v4 }
 0xc62   :  { %6995 = vmatprep.subr.bf16.mxu0 %v7848_v11 }
 0xc65   :  { %v2157_v44 = vpop.f32.mrb[64].mxu1  ;;  %6996 = vmatpush3.bf16.msra.mxu0 %v7558_v5 }
 0xc66   :  { %v6979_v6 = vpop.f32.mrb[65].mxu1  ;;  %7021 = vmatprep.subr.bf16.mxu0 %v7848_v11 }
 0xc67   :  { %v2160_v7 = vpop.f32.mrb[66].mxu1 }
 0xc68   :  { %v6980_v48 = vpop.f32.mrb[67].mxu1  ;;  %6998 = vmatmul.mubr.bf16.vlgmr.msra.gmra.mrb[32].mxu0 %v8063_v54  ;;  %v2161_v33 = vadd.f32 %v5939_v25, %v2160_v7 }
 0xc69   :  { %7023 = vmatprep.mubr.msk.bf16.mxu0 %vm7849_vm0, %v7848_v11 }
 0xc6a   :  { %v2393_v35 = vpack.c.bf16 %v2161_v33, %v2161_v33  ;;  %v7561_v33 = vld [vmem:[%s7948_s4] sm:$0xff]  }
 0xc85   :  { %v2385_v50 = vpop.f32.mrb[68].mxu1 }
 0xc86   :  { %v7019_v8 = vpop.f32.mrb[69].mxu1 }
 0xc87   :  { %v2388_v46 = vpop.f32.mrb[70].mxu1  ;;  %v7559_v8 = vld [vmem:[%s7918_s24 + $0x30] sm:$0xff]  }
 0xc88   :  { %v8407_v10 = vadd.f32 %v5991_v9, %v2388_v46  ;;  %v7020_v12 = vpop.f32.mrb[71].mxu1  ;;  %7046 = vmatpush3.bf16.msra.mxu1 %v7559_v8 }
 0xc89   :  { %7047 = vmatprep.subr.bf16.mxu1 %v7848_v11 }
 0xc8a   :  { %v2397_v4 = vpack.c.bf16 %v8407_v10, %v8407_v10 }
 0xc8c   :  { %v2564_v6 = vsel %vm661_vm6, %v2397_v4, 0 }
 0xd1b   :  { %v2041_v13 = vpop.f32.mrb[28].mxu0 }
 0xd1c   :  { %v8410_v14 = vadd.f32 %v2041_v13, %v8312_v29  ;;  %v6959_v15 = vpop.f32.mrb[29].mxu0  ;;  %v2158_v29 = vadd.f32 %v5939_v25, %v2157_v44 }
 0xd1d   :  { %v2044_v16 = vpop.f32.mrb[30].mxu0 }
 0xd1e   :  { %v8413_v17 = vadd.f32 %v2044_v16, %v8314_v32  ;;  %v6960_v54 = vpop.f32.mrb[31].mxu0  ;;  %v2392_v30 = vpack.c.bf16 %v2158_v29, %v2158_v29  ;;  %v2386_v32 = vadd.f32 %v5991_v9, %v2385_v50  ;;  %v7560_v9 = vld [vmem:[%s7918_s24 + $0x38] sm:$0xff]   ;;  %s8909_s24 = sld [smem:[#allocation15_spill]] }
 0xd1f   :  { %7048 = vmatpush3.bf16.msra.mxu1 %v7560_v9 }
 0xd20   :  { %v2396_v34 = vpack.c.bf16 %v2386_v32, %v2386_v32  ;;  %v7794_v32 = vld [vmem:[%s7863_s5 + $0x8] sm:$0xff]  ;;  %7073 = vmatprep.subr.bf16.mxu1 %v7561_v33 }
 0xd22   :  { %v2518_v36 = vsel %vm661_vm6, %v2396_v34, 0 }
 0xd3b   :  { %v2271_v19 = vpop.f32.mrb[32].mxu0 }
 0xd3c   :  { %v2272_v20 = vadd.f32 %v5965_v18, %v2271_v19  ;;  %v6999_v21 = vpop.f32.mrb[33].mxu0 }
 0xd3d   :  { %v2274_v22 = vpop.f32.mrb[34].mxu0  ;;  %v6011_v21 = vld [vmem:[%s7923_s30] ss:$0 sm:$0xff] }
 0xd3e   :  { %v2394_v23 = vpack.c.bf16 %v2272_v20, %v2272_v20  ;;  %v7000_v24 = vpop.f32.mrb[35].mxu0  ;;  %v2275_v27 = vadd.f32 %v5965_v18, %v2274_v22 }
 0xd40   :  { %v2402_v26 = vsel %vm540_vm5, %v2394_v23, 0  ;;  %v2395_v28 = vpack.c.bf16 %v2275_v27, %v2275_v27 }
 0xd41   :  { %7022 = vmatpush3.bf16.xpose.msra.mxu0 %v2402_v26 }
 0xd42   :  { %7027 = vmatprep.subr.bf16.mxu0 %v7848_v11  ;;  %v2448_v31 = vsel %vm540_vm5, %v2395_v28, 0  ;;  %v7793_v28 = vld [vmem:[%s7863_s5] sm:$0xff]  ;;  %s8899_s5 = sld [smem:[#allocation6_spill]] }
 0xd48   :  { %7024 = vmatmul.mubr.msk.bf16.vlgmr.msra.gmra.mrb[36].mxu0 %vm540_vm5, %v2392_v30 }
 0xd49   :  { %7028 = vmatpush3.bf16.xpose.msra.mxu0 %v2448_v31  ;;  %7029 = vmatprep.mubr.msk.bf16.mxu0 %vm7849_vm0, %v7848_v11 }
 0xd4a   :  { %7033 = vmatprep.subr.bf16.mxu0 %v7848_v11 }
 0xd50   :  { %7030 = vmatmul.mubr.msk.bf16.vlgmr.msra.gmra.mrb[40].mxu0 %vm540_vm5, %v2393_v35 }
 0xd51   :  { %7034 = vmatpush3.bf16.msra.mxu0 %v2518_v36  ;;  %7035 = vmatprep.mubr.msk.bf16.mxu0 %vm7849_vm0, %v7848_v11 }
 0xd52   :  { %7039 = vmatprep.subr.bf16.mxu0 %v7848_v11 }
 0xe1b   :  { %v2438_v38 = vpop.f32.mrb[36].mxu0 }
 0xe1c   :  { %v2439_v39 = vadd.f32 %v2438_v38, %v8157_v59  ;;  %v7025_v52 = vpop.f32.mrb[37].mxu0 }
 0xe1d   :  { %v2441_v40 = vpop.f32.mrb[38].mxu0 }
 0xe1e   :  { %v7026_v43 = vpop.f32.mrb[39].mxu0  ;;  %v2490_v45 = vsel %vm633_vm8, %v2439_v39, -inf }
 0xe1f   :  { %2491 = vmax.xlane.f32.xlu0 %v2490_v45  ;;  %v7563_v43 = vld [vmem:[%s7948_s4 + $0x10] sm:$0xff]   ;;  %v7564_v45 = vld [vmem:[%s7948_s4 + $0x18] sm:$0xff]  }
 0xe23   :  { %v2484_v47 = vpop.f32.mrb[40].mxu0 }
 0xe24   :  { %v2485_v37 = vadd.f32 %v2484_v47, %v8157_v59  ;;  %v7031_v41 = vpop.f32.mrb[41].mxu0  ;;  %v7565_v47 = vld [vmem:[%s7938_s20] sm:$0xff]  }
 0xe25   :  { %v2487_v42 = vpop.f32.mrb[42].mxu0  ;;  %v7567_v41 = vld [vmem:[%s7938_s20 + $0x8] sm:$0xff]  }
 0xe26   :  { %v7032_v49 = vpop.f32.mrb[43].mxu0  ;;  %v2493_v51 = vsel %vm633_vm8, %v2485_v37, -inf  ;;  %v7568_v42 = vld [vmem:[%s7948_s4 + $0x28] sm:$0xff]  }
 0xe27   :  { %2494 = vmax.xlane.f32.xlu1 %v2493_v51  ;;  %v7569_v49 = vld [vmem:[%s7938_s20 + $0x10] sm:$0xff]  }
 0xe28   :  { %v7570_v51 = vld [vmem:[%s7948_s4 + $0x30] sm:$0xff]  }
 0xeac   :  { %v2492_v53 = vpop.xlane.xlu0 %2491 }
 0xead   :  { %v2496_v55 = vsub.f32 %v2439_v39, %v2492_v53  ;;  %v7571_v53 = vld [vmem:[%s7938_s20 + $0x18] sm:$0xff]  }
 0xeaf   :  { %v2498_v57 = vmul.f32 1.442695, %v2496_v55  ;;  %v7572_v55 = vld [vmem:[%s7948_s4 + $0x38] sm:$0xff]  }
 0xeb1   :  { %7737 = vpow2.f32 %v2498_v57  ;;  %v7573_v57 = vld [vmem:[%s7938_s20 + $0x20] sm:$0xff]  }
 0xeb4   :  { %v2495_v58 = vpop.xlane.xlu1 %2494 }
 0xeb5   :  { %v2497_v60 = vsub.f32 %v2485_v37, %v2495_v58  ;;  %v7566_v37 = vld [vmem:[%s7948_s4 + $0x20] sm:$0xff]  }
 0xeb6   :  { %v126_v58 = vld [vmem:[%s7868_s9] sm:$0xff] }
 0xeb7   :  { %v2500_v61 = vmul.f32 1.442695, %v2497_v60  ;;  %v127_v60 = vld [vmem:[%s7868_s9 + $0x8] sm:$0xff] }
 0xeb9   :  { %7739 = vpow2.f32 %v2500_v61  ;;  %v8489_v61 = vpack.c.bf16 %v127_v60, %v126_v58 }
 0xebb   :  { %v7738_v62 = vpop.eup %7737 }
 0xebc   :  { %v2502_v63 = vsel %vm633_vm8, %v7738_v62, 0.0 }
 0xebd   :  { %2503 = vadd.xlane.f32.xlu0 %v2502_v63  ;;  %v129_v63 = vld [vmem:[%s7868_s9 + $0x18] sm:$0xff] }
 0xec3   :  { %v7740_v0 = vpop.eup %7739 }
 0xec4   :  { %v2505_v59 = vsel %vm633_vm8, %v7740_v0, 0.0 }
 0xec5   :  { %2506 = vadd.xlane.f32.xlu1 %v2505_v59  ;;  %v7574_v59 = vld [vmem:[%s7938_s20 + $0x28] sm:$0xff]  }
 0xf4a   :  { %v2504_v1 = vpop.xlane.xlu0 %2503 }
 0xf4b   :  { %7741 = vrcp.f32 %v2504_v1  ;;  %v7575_v1 = vld [vmem:[%s7938_s20 + $0x30] sm:$0xff]  }
 0xf52   :  { %v2507_v2 = vpop.xlane.xlu1 %2506 }
 0xf53   :  { %7743 = vrcp.f32 %v2507_v2  ;;  %v7576_v2 = vld [vmem:[%s7938_s20 + $0x38] sm:$0xff]  }
 0xf55   :  { %v7742_v3 = vpop.eup %7741 }
 0xf56   :  { %v2510_v5 = vmul.f32 %v7742_v3, %v7738_v62  ;;  %v128_v62 = vld [vmem:[%s7868_s9 + $0x10] sm:$0xff]  ;;  %v7577_v3 = vld [vmem:[%s8898_s0] sm:$0xff]   ;;  %s8900_s9 = sld [smem:[#allocation7_spill]] }
 0xf58   :  { %v2512_v44 = vpack.c.bf16 %v2510_v5, %v2510_v5 }
 0xf5a   :  { %7036 = vmatmul.mubr.msk.bf16.vlgmr.msra.gmra.mrb[44].mxu0 %vm633_vm8, %v2512_v44 }
 0xf5b   :  { %7040 = vmatpush3.bf16.msra.mxu0 %v2564_v6  ;;  %7041 = vmatprep.mubr.msk.bf16.mxu0 %vm7849_vm0, %v7848_v11 }
 0xf5c   :  { %7053 = vmatprep.subr.bf16.mxu0 %v7848_v11 }
 0xf5d   :  { %v7744_v7 = vpop.eup %7743 }
 0xf5e   :  { %v2511_v48 = vmul.f32 %v7744_v7, %v7740_v0  ;;  %v8493_v0 = vpack.c.bf16 %v129_v63, %v128_v62 }
 0xf60   :  { %v2513_v50 = vpack.c.bf16 %v2511_v48, %v2511_v48 }
 0xf62   :  { %7042 = vmatmul.mubr.msk.bf16.vlgmr.msra.gmra.mrb[48].mxu0 %vm633_vm8, %v2513_v50 }
 0xf63   :  { %7069 = vmatprep.mubr.msk.bf16.mxu0 %vm7849_vm0, %v7848_v11  ;;  %7054 = vmatpush3.bf16.msra.mxu0 %v7565_v47  ;;  %v7592_v47 = vld [vmem:[%s7938_s20 + $0x78] sm:$0xff]  }
 0xf64   :  { %7055 = vmatprep.subr.bf16.mxu0 %v7848_v11 }
 0xf67   :  { %7056 = vmatpush3.bf16.msra.mxu0 %v7567_v41 }
 0xf68   :  { %7057 = vmatprep.subr.bf16.mxu0 %v7848_v11 }
 0xf6b   :  { %7058 = vmatpush3.bf16.msra.mxu0 %v7569_v49 }
 0xf6c   :  { %7059 = vmatprep.subr.bf16.mxu0 %v7848_v11 }
 0xf6f   :  { %7060 = vmatpush3.bf16.msra.mxu0 %v7571_v53 }
 0xf70   :  { %7061 = vmatprep.subr.bf16.mxu0 %v7848_v11 }
 0xf73   :  { %7062 = vmatpush3.bf16.msra.mxu0 %v7573_v57 }
 0xf74   :  { %7063 = vmatprep.subr.bf16.mxu0 %v7848_v11 }
 0xf77   :  { %7064 = vmatpush3.bf16.msra.mxu0 %v7574_v59  ;;  %v6014_v59 = vld [vmem:[%s8902_s21] ss:$0 sm:$0xff] }
 0xf78   :  { %7065 = vmatprep.subr.bf16.mxu0 %v7848_v11 }
 0xf7b   :  { %7066 = vmatpush3.bf16.msra.mxu0 %v7575_v1 }
 0xf7c   :  { %7067 = vmatprep.subr.bf16.mxu0 %v7848_v11 }
 0xf7f   :  { %7068 = vmatpush3.bf16.msra.mxu0 %v7576_v2 }
 0xf80   :  { %7093 = vmatprep.subr.bf16.mxu0 %v7577_v3 }
0x102d   :  { %v2554_v46 = vpop.f32.mrb[44].mxu0 }
0x102e   :  { %v7037_v10 = vpop.f32.mrb[45].mxu0 }
0x102f   :  { %v2557_v12 = vpop.f32.mrb[46].mxu0 }
0x1030   :  { %v7038_v13 = vpop.f32.mrb[47].mxu0 }
0x1035   :  { %v2600_v15 = vpop.f32.mrb[48].mxu0 }
0x1036   :  { %v2606_v16 = vpack.c.bf16 %v2600_v15, %v2554_v46  ;;  %v7043_v54 = vpop.f32.mrb[49].mxu0 }
0x1037   :  { %v2603_v18 = vpop.f32.mrb[50].mxu0 }
0x1038   :  { %v7044_v19 = vpop.f32.mrb[51].mxu0  ;;  %7050 = vmatmul.mubr.msk.bf16.vlgmr.msra.gmra.mrb[72].mxu1 %vm540_vm5, %v2606_v16  ;;  %v6012_v18 = vld [vmem:[%s8899_s5] ss:$0 sm:$0xff] }
0x1039   :  { %7074 = vmatpush3.bf16.msra.mxu1 %v7561_v33  ;;  %7089 = vmatprep.mubr.bf16.mxu1 %v8489_v61  ;;  %v7580_v33 = vld [vmem:[%s8898_s0 + $0x18] sm:$0xff]  }
0x110b   :  { %v2661_v20 = vpop.f32.mrb[72].mxu1 }
0x110c   :  { %v2668_v22 = vadd.f32 %v2661_v20, %v8410_v14  ;;  %v7051_v23 = vpop.f32.mrb[73].mxu1  ;;  %v7562_v14 = vld [vmem:[%s7948_s4 + $0x8] sm:$0xff]  }
0x110d   :  { %v2664_v24 = vpop.f32.mrb[74].mxu1  ;;  %7075 = vmatprep.subr.bf16.mxu1 %v7562_v14 }
0x110e   :  { %v2677_v25 = vadd.f32 %v6011_v21, %v2668_v22  ;;  %v2669_v26 = vadd.f32 %v2664_v24, %v8413_v17  ;;  %v7052_v27 = vpop.f32.mrb[75].mxu1  ;;  %7076 = vmatpush3.bf16.msra.mxu1 %v7562_v14  ;;  %v6013_v24 = vld [vmem:[%s8900_s9] ss:$0 sm:$0xff] }
0x110f   :  { %7077 = vmatprep.subr.bf16.mxu1 %v7563_v43  ;;  %v7581_v14 = vld [vmem:[%s8898_s0 + $0x20] sm:$0xff]  }
0x1110   :  { %v2678_v29 = vadd.f32 %v6011_v21, %v2669_v26  ;;  %v8453_v30 = vadd.f32 %v7793_v28, %v2677_v25  ;;  %v7578_v28 = vld [vmem:[%s8898_s0 + $0x8] sm:$0xff]  }
0x1112   :  { %2681 = vadd.xlane.f32.xlu0 %v8453_v30  ;;  %v8457_v31 = vadd.f32 %v7794_v32, %v2678_v29  ;;  %7078 = vmatpush3.bf16.msra.mxu1 %v7563_v43  ;;  %v7579_v32 = vld [vmem:[%s8898_s0 + $0x10] sm:$0xff]   ;;  %v7590_v43 = vld [vmem:[%s7938_s20 + $0x68] sm:$0xff]  }
0x1113   :  { %7079 = vmatprep.subr.bf16.mxu1 %v7564_v45 }
0x1114   :  { %2683 = vadd.xlane.f32.xlu1 %v8457_v31 }
0x1116   :  { %7080 = vmatpush3.bf16.msra.mxu1 %v7564_v45  ;;  %v7591_v45 = vld [vmem:[%s7938_s20 + $0x70] sm:$0xff]  }
0x1117   :  { %7081 = vmatprep.subr.bf16.mxu1 %v7566_v37 }
0x111a   :  { %7082 = vmatpush3.bf16.msra.mxu1 %v7566_v37  ;;  %v6023_v37 = vld [vmem:[%s8901_s17] ss:$0 sm:$0xff] }
0x111b   :  { %7083 = vmatprep.subr.bf16.mxu1 %v7568_v42 }
0x111e   :  { %7084 = vmatpush3.bf16.msra.mxu1 %v7568_v42 }
0x111f   :  { %7085 = vmatprep.subr.bf16.mxu1 %v7570_v51 }
0x1122   :  { %7086 = vmatpush3.bf16.msra.mxu1 %v7570_v51 }
0x1123   :  { %7087 = vmatprep.subr.bf16.mxu1 %v7572_v55 }
0x1126   :  { %7088 = vmatpush3.bf16.msra.mxu1 %v7572_v55 }
0x1127   :  { %7113 = vmatprep.subr.bf16.mxu1 %v7848_v11 }
0x1129   :  { %7090 = vmatmul.mubr.bf16.vlgmr.msra.gmra.mrb[76].mxu1 %v8493_v0 }
0x112a   :  { %7115 = vmatprep.mubr.msk.bf16.mxu1 %vm7849_vm0, %v7848_v11 }
0x119f   :  { %v2682_v17 = vpop.xlane.xlu0 %2681 }
0x11a0   :  { %v2685_v34 = vmul.f32 0.0078125, %v2682_v17  ;;  %v7582_v17 = vld [vmem:[%s8898_s0 + $0x28] sm:$0xff]  }
0x11a1   :  { %v2684_v35 = vpop.xlane.xlu1 %2683 }
0x11a2   :  { %v8463_v36 = vsub.f32 %v8453_v30, %v2685_v34  ;;  %v2686_v38 = vmul.f32 0.0078125, %v2684_v35  ;;  %v7583_v34 = vld [vmem:[%s8898_s0 + $0x30] sm:$0xff]   ;;  %v7584_v35 = vld [vmem:[%s8898_s0 + $0x38] sm:$0xff]  }
0x11a4   :  { %v8466_v39 = vsub.f32 %v8457_v31, %v2686_v38  ;;  %v2689_v52 = vmul.f32 %v8463_v36, %v8463_v36  ;;  %v2704_v20 = vmul.f32 %v6012_v18, %v8463_v36  ;;  %v7585_v36 = vld [vmem:[%s7938_s20 + $0x40] sm:$0xff]   ;;  %v7586_v38 = vld [vmem:[%s7938_s20 + $0x48] sm:$0xff]  }
0x11a6   :  { %2691 = vadd.xlane.f32.xlu0 %v2689_v52  ;;  %v2690_v40 = vmul.f32 %v8466_v39, %v8466_v39  ;;  %v2705_v21 = vmul.f32 %v6012_v18, %v8466_v39  ;;  %v7587_v39 = vld [vmem:[%s7938_s20 + $0x50] sm:$0xff]   ;;  %v7588_v52 = vld [vmem:[%s7938_s20 + $0x58] sm:$0xff]  }
0x11a8   :  { %2693 = vadd.xlane.f32.xlu1 %v2690_v40  ;;  %v7589_v40 = vld [vmem:[%s7938_s20 + $0x60] sm:$0xff]  }
0x11fc   :  { %v7091_v41 = vpop.f32.mrb[76].mxu1 }
0x11fd   :  { %v2964_v42 = vadd.f32 %v7091_v41, %v6023_v37  ;;  %v2955_v49 = vpop.f32.mrb[77].mxu1 }
0x11fe   :  { %v2956_v51 = vadd.f32 %v6023_v37, %v2955_v49  ;;  %v7092_v53 = vpop.f32.mrb[78].mxu1 }
0x11ff   :  { %v2967_v55 = vadd.f32 %v7092_v53, %v6023_v37  ;;  %v2958_v57 = vpop.f32.mrb[79].mxu1 }
0x1200   :  { %v2959_v58 = vadd.f32 %v6023_v37, %v2958_v57 }
0x1201   :  { %v3093_v60 = vpack.c.bf16 %v2967_v55, %v2964_v42 }
0x1202   :  { %v3092_v62 = vpack.c.bf16 %v2959_v58, %v2956_v51 }
0x1204   :  { %v3112_v63 = vsel %vm540_vm5, %v3092_v62, 0 }
0x1205   :  { %7114 = vmatpush3.bf16.xpose.msra.mxu1 %v3112_v63 }
0x1206   :  { %7119 = vmatprep.subr.bf16.mxu1 %v7848_v11 }
0x1233   :  { %v2692_v4 = vpop.xlane.xlu0 %2691 }
0x1234   :  { %v2695_v5 = vmul.f32 0.007874016, %v2692_v4 }
0x1235   :  { %v2694_v44 = vpop.xlane.xlu1 %2693 }
0x1236   :  { %7745 = vrsqrt.f32 %v2695_v5  ;;  %v2696_v6 = vmul.f32 0.007874016, %v2694_v44  ;;  %vm2708_vm9 = vcmp.eq.f32.partialorder %v2695_v5, inf  ;;  %v2711_v50 = vand.u32 2147483648, %v2695_v5 }
0x1237   :  { %vm2710_vm10 = vcmp.eq.f32.partialorder %v2695_v5, 0.0 }
0x1238   :  { %7747 = vrsqrt.f32 %v2696_v6  ;;  %vm2715_vm11 = vcmp.eq.f32.partialorder %v2696_v6, inf  ;;  %v2718_v13 = vand.u32 2147483648, %v2696_v6  ;;  %vm2717_vm12 = vcmp.eq.f32.partialorder %v2696_v6, 0.0 }
0x1240   :  { %v7746_v7 = vpop.eup %7745 }
0x1241   :  { %v2707_v48 = vmul.f32 %v7746_v7, %v2695_v5 }
0x1242   :  { %v7748_v8 = vpop.eup %7747 }
0x1243   :  { %v2709_v9 = vsel %vm2708_vm9, %v2695_v5, %v2707_v48  ;;  %v2714_v10 = vmul.f32 %v7748_v8, %v2696_v6 }
0x1244   :  { %v2712_v46 = vsel %vm2710_vm10, %v2711_v50, %v2709_v9  ;;  %v6032_v50 = vld [vmem:[%s8903_s25] ss:$0 sm:$0xff] }
0x1245   :  { %v2720_v12 = vadd.f32 1e-05, %v2712_v46  ;;  %v2716_v15 = vsel %vm2715_vm11, %v2696_v6, %v2714_v10  ;;  %v3158_v6 = vsel %vm540_vm5, %v3093_v60, 0 }
0x1246   :  { %v2719_v16 = vsel %vm2717_vm12, %v2718_v13, %v2716_v15 }
0x1247   :  { %7749 = vrcp.f32 %v2720_v12  ;;  %v2721_v54 = vadd.f32 1e-05, %v2719_v16 }
0x1249   :  { %7751 = vrcp.f32 %v2721_v54 }
0x1251   :  { %v7750_v19 = vpop.eup %7749 }
0x1252   :  { %v2723_v22 = vmul.f32 %v7750_v19, %v2704_v20 }
0x1253   :  { %v7752_v23 = vpop.eup %7751 }
0x1254   :  { %v2725_v25 = vmul.f32 %v7752_v23, %v2705_v21  ;;  %v2733_v26 = vadd.f32 %v6013_v24, %v2723_v22  ;;  %v136_v23 = vld [vmem:[%s8904_s29] sm:$0x1] }
0x1255   :  { %vm138_vm13 = vcmp.eq.f32.partialorder %v136_v23, 0.0  ;;  %v6088_v23 = vld [vmem:[%s8901_s17 + $0x1] ss:$0 sm:$0xff] }
0x1256   :  { %v2734_v27 = vadd.f32 %v6013_v24, %v2725_v25  ;;  %v8563_v24 = vsub.s32 0, %v8154_v56  ;;  %v140_v25 = vsel %vm138_vm13, -1e+09, %v7848_v11 }
0x1258   :  { %v8511_v29 = vpack.c.bf16 %v2734_v27, %v2733_v26  ;;  %v137_v26 = vld [vmem:[%s8904_s29 + $0x1] sm:$0x1]  ;;  %v8568_v27 = vrot.slane %v140_v25, %v8563_v24 }
0x1259   :  { %vm139_vm14 = vcmp.eq.f32.partialorder %v137_v26, 0.0 }
0x125a   :  { %7070 = vmatmul.mubr.bf16.vlgmr.msra.gmra.mrb[52].mxu0 %v8511_v29 }
0x125b   :  { %7094 = vmatpush3.bf16.msra.mxu0 %v7577_v3  ;;  %7109 = vmatprep.mubr.bf16.mxu0 %v8489_v61 }
0x125c   :  { %7095 = vmatprep.subr.bf16.mxu0 %v7578_v28 }
0x125f   :  { %7096 = vmatpush3.bf16.msra.mxu0 %v7578_v28 }
0x1260   :  { %7097 = vmatprep.subr.bf16.mxu0 %v7579_v32 }
0x1263   :  { %7098 = vmatpush3.bf16.msra.mxu0 %v7579_v32 }
0x1264   :  { %7099 = vmatprep.subr.bf16.mxu0 %v7580_v33 }
0x1267   :  { %7100 = vmatpush3.bf16.msra.mxu0 %v7580_v33 }
0x1268   :  { %7101 = vmatprep.subr.bf16.mxu0 %v7581_v14 }
0x126b   :  { %7102 = vmatpush3.bf16.msra.mxu0 %v7581_v14 }
0x126c   :  { %7103 = vmatprep.subr.bf16.mxu0 %v7582_v17 }
0x126f   :  { %7104 = vmatpush3.bf16.msra.mxu0 %v7582_v17  ;;  %v141_v17 = vsel %vm139_vm14, -1e+09, %v7848_v11 }
0x1270   :  { %7105 = vmatprep.subr.bf16.mxu0 %v7583_v34 }
0x1273   :  { %7106 = vmatpush3.bf16.msra.mxu0 %v7583_v34 }
0x1274   :  { %7107 = vmatprep.subr.bf16.mxu0 %v7584_v35 }
0x1277   :  { %7108 = vmatpush3.bf16.msra.mxu0 %v7584_v35 }
0x1278   :  { %7137 = vmatprep.subr.bf16.mxu0 %v7848_v11 }
0x127a   :  { %7110 = vmatmul.mubr.bf16.vlgmr.msra.gmra.mrb[56].mxu0 %v8493_v0 }
0x127b   :  { %7138 = vmatpush3.bf16.msra.mxu0 %v7585_v36  ;;  %7153 = vmatprep.mubr.msk.bf16.mxu0 %vm7849_vm0, %v7848_v11  ;;  %v8574_v36 = vrot.slane %v141_v17, %v8563_v24 }
0x127c   :  { %7139 = vmatprep.subr.bf16.mxu0 %v7848_v11 }
0x127f   :  { %7140 = vmatpush3.bf16.msra.mxu0 %v7586_v38 }
0x1280   :  { %7141 = vmatprep.subr.bf16.mxu0 %v7848_v11 }
0x1283   :  { %7142 = vmatpush3.bf16.msra.mxu0 %v7587_v39 }
0x1284   :  { %7143 = vmatprep.subr.bf16.mxu0 %v7848_v11 }
0x1287   :  { %7144 = vmatpush3.bf16.msra.mxu0 %v7588_v52 }
0x1288   :  { %7145 = vmatprep.subr.bf16.mxu0 %v7848_v11 }
0x128b   :  { %7146 = vmatpush3.bf16.msra.mxu0 %v7589_v40 }
0x128c   :  { %7147 = vmatprep.subr.bf16.mxu0 %v7848_v11 }
0x128f   :  { %7148 = vmatpush3.bf16.msra.mxu0 %v7590_v43 }
0x1290   :  { %7149 = vmatprep.subr.bf16.mxu0 %v7848_v11 }
0x1293   :  { %7150 = vmatpush3.bf16.msra.mxu0 %v7591_v45 }
0x1294   :  { %7151 = vmatprep.subr.bf16.mxu0 %v7848_v11 }
0x1297   :  { %7152 = vmatpush3.bf16.msra.mxu0 %v7592_v47 }
0x129a   :  { %7154 = vmatmul.mubr.bf16.vlgmr.msra.gmra.mrb[60].mxu0 %v8511_v29 }
0x129b   :  { %7193 = vmatprep.mubr.bf16.mxu0 %v8489_v61 }
0x132d   :  { %v2843_v1 = vpop.f32.mrb[52].mxu0 }
0x132e   :  { %v2844_v2 = vadd.f32 %v6014_v59, %v2843_v1  ;;  %v7071_v3 = vpop.f32.mrb[53].mxu0 }
0x132f   :  { %v2846_v4 = vpop.f32.mrb[54].mxu0 }
0x1330   :  { %v3090_v5 = vpack.c.bf16 %v2844_v2, %v2844_v2  ;;  %v7072_v44 = vpop.f32.mrb[55].mxu0  ;;  %v2847_v7 = vadd.f32 %v6014_v59, %v2846_v4  ;;  %v7593_v2 = vld [vmem:[%s7948_s4 + $0x40] sm:$0xff]  }
0x1331   :  { %v7594_v44 = vld [vmem:[%s7948_s4 + $0x48] sm:$0xff]  }
0x1332   :  { %7116 = vmatmul.mubr.msk.bf16.vlgmr.msra.gmra.mrb[80].mxu1 %vm540_vm5, %v3090_v5  ;;  %v3091_v48 = vpack.c.bf16 %v2847_v7, %v2847_v7  ;;  %v7596_v7 = vld [vmem:[%s7948_s4 + $0x58] sm:$0xff]  }
0x1333   :  { %7120 = vmatpush3.bf16.xpose.msra.mxu1 %v3158_v6  ;;  %7121 = vmatprep.mubr.msk.bf16.mxu1 %vm7849_vm0, %v7848_v11  ;;  %v7595_v6 = vld [vmem:[%s7948_s4 + $0x50] sm:$0xff]  }
0x1334   :  { %7125 = vmatprep.subr.bf16.mxu1 %v7848_v11 }
0x133a   :  { %7122 = vmatmul.mubr.msk.bf16.vlgmr.msra.gmra.mrb[84].mxu1 %vm540_vm5, %v3091_v48  ;;  %v7597_v48 = vld [vmem:[%s7948_s4 + $0x60] sm:$0xff]  }
0x133b   :  { %7127 = vmatprep.mubr.msk.bf16.mxu1 %vm7849_vm0, %v7848_v11 }
0x134d   :  { %v7111_v8 = vpop.f32.mrb[56].mxu0 }
0x134e   :  { %v3084_v9 = vadd.f32 %v7111_v8, %v6032_v50  ;;  %v3075_v46 = vpop.f32.mrb[57].mxu0  ;;  %v7599_v8 = vld [vmem:[%s7948_s4 + $0x70] sm:$0xff]  }
0x134f   :  { %v3076_v10 = vadd.f32 %v6032_v50, %v3075_v46  ;;  %v7112_v12 = vpop.f32.mrb[58].mxu0 }
0x1350   :  { %v3087_v13 = vadd.f32 %v7112_v12, %v6032_v50  ;;  %v3078_v15 = vpop.f32.mrb[59].mxu0 }
0x1351   :  { %v3079_v16 = vadd.f32 %v6032_v50, %v3078_v15  ;;  %v7598_v50 = vld [vmem:[%s7948_s4 + $0x68] sm:$0xff]  }
0x1352   :  { %v3095_v54 = vpack.c.bf16 %v3087_v13, %v3084_v9  ;;  %v7600_v9 = vld [vmem:[%s7948_s4 + $0x78] sm:$0xff]  }
0x1353   :  { %v3094_v18 = vpack.c.bf16 %v3079_v16, %v3076_v10 }
0x1355   :  { %7126 = vmatpush3.bf16.msra.mxu1 %v3094_v18 }
0x1356   :  { %7131 = vmatprep.subr.bf16.mxu1 %v7848_v11 }
0x136d   :  { %v8557_v19 = vpop.f32.mrb[60].mxu0 }
0x136e   :  { %v7155_v20 = vpop.f32.mrb[61].mxu0 }
0x136f   :  { %v8559_v21 = vpop.f32.mrb[62].mxu0 }
0x1370   :  { %v7156_v22 = vpop.f32.mrb[63].mxu0 }
0x1405   :  { %v3148_v28 = vpop.f32.mrb[80].mxu1 }
0x1406   :  { %v3149_v32 = vadd.f32 %v3148_v28, %v8568_v27  ;;  %v7117_v33 = vpop.f32.mrb[81].mxu1 }
0x1407   :  { %v3151_v14 = vpop.f32.mrb[82].mxu1 }
0x1408   :  { %v7118_v34 = vpop.f32.mrb[83].mxu1  ;;  %v3201_v35 = vsel %vm3200_vm15, %v3149_v32, -inf }
0x1409   :  { %3202 = vmax.xlane.f32.xlu0 %v3201_v35 }
0x140d   :  { %v3194_v38 = vpop.f32.mrb[84].mxu1 }
0x140e   :  { %v3195_v39 = vadd.f32 %v3194_v38, %v8574_v36  ;;  %v7123_v52 = vpop.f32.mrb[85].mxu1  ;;  %v6062_v38 = vld [vmem:[%s8902_s21 + $0x1] ss:$0 sm:$0xff] }
0x140f   :  { %v3197_v40 = vpop.f32.mrb[86].mxu1  ;;  %v3424_v52 = vadd.f32 %v6062_v38, %v8557_v19  ;;  %v7601_v19 = vld [vmem:[%s8898_s0 + $0x40] sm:$0xff]  }
0x1410   :  { %v7124_v43 = vpop.f32.mrb[87].mxu1  ;;  %v3204_v45 = vsel %vm3200_vm15, %v3195_v39, -inf  ;;  %7177 = vmatprep.subr.bf16.mxu0 %v7601_v19 }
0x1411   :  { %3205 = vmax.xlane.f32.xlu1 %v3204_v45  ;;  %v3674_v40 = vpack.c.bf16 %v3424_v52, %v3424_v52  ;;  %v3427_v45 = vadd.f32 %v6062_v38, %v8559_v21  ;;  %7178 = vmatpush3.bf16.msra.mxu0 %v7601_v19  ;;  %v7604_v21 = vld [vmem:[%s8898_s0 + $0x58] sm:$0xff]   ;;  %v7611_v19 = vld [vmem:[%s7948_s4 + $0x80] sm:$0xff]  }
0x1496   :  { %v3203_v47 = vpop.xlane.xlu0 %3202 }
0x1497   :  { %v3207_v37 = vsub.f32 %v3149_v32, %v3203_v47  ;;  %v3675_v47 = vpack.c.bf16 %v3427_v45, %v3427_v45 }
0x1499   :  { %v3209_v41 = vmul.f32 1.442695, %v3207_v37  ;;  %v7602_v37 = vld [vmem:[%s8898_s0 + $0x48] sm:$0xff]  }
0x149a   :  { %7179 = vmatprep.subr.bf16.mxu0 %v7602_v37 }
0x149b   :  { %7753 = vpow2.f32 %v3209_v41  ;;  %v7603_v41 = vld [vmem:[%s8898_s0 + $0x50] sm:$0xff]   ;;  %7180 = vmatpush3.bf16.msra.mxu0 %v7602_v37  ;;  %v7612_v37 = vld [vmem:[%s7948_s4 + $0x88] sm:$0xff]  }
0x149c   :  { %7181 = vmatprep.subr.bf16.mxu0 %v7603_v41 }
0x149e   :  { %v3206_v42 = vpop.xlane.xlu1 %3205 }
0x149f   :  { %v3208_v49 = vsub.f32 %v3195_v39, %v3206_v42  ;;  %7182 = vmatpush3.bf16.msra.mxu0 %v7603_v41  ;;  %v7605_v42 = vld [vmem:[%s8898_s0 + $0x60] sm:$0xff]   ;;  %v7613_v41 = vld [vmem:[%s8905_s3 + $0x10] sm:$0xff]  }
0x14a0   :  { %7183 = vmatprep.subr.bf16.mxu0 %v7604_v21 }
0x14a1   :  { %v3211_v51 = vmul.f32 1.442695, %v3208_v49  ;;  %v7606_v49 = vld [vmem:[%s8898_s0 + $0x68] sm:$0xff]  }
0x14a3   :  { %7755 = vpow2.f32 %v3211_v51  ;;  %7184 = vmatpush3.bf16.msra.mxu0 %v7604_v21  ;;  %v7607_v51 = vld [vmem:[%s8898_s0 + $0x70] sm:$0xff]  }
0x14a4   :  { %7185 = vmatprep.subr.bf16.mxu0 %v7605_v42  ;;  %v7614_v21 = vld [vmem:[%s7948_s4 + $0x90] sm:$0xff]  }
0x14a5   :  { %v7754_v53 = vpop.eup %7753 }
0x14a6   :  { %v3213_v55 = vsel %vm3200_vm15, %v7754_v53, 0.0 }
0x14a7   :  { %3214 = vadd.xlane.f32.xlu0 %v3213_v55  ;;  %7186 = vmatpush3.bf16.msra.mxu0 %v7605_v42  ;;  %v7615_v42 = vld [vmem:[%s8905_s3 + $0x18] sm:$0xff]  }
0x14a8   :  { %7187 = vmatprep.subr.bf16.mxu0 %v7606_v49 }
0x14ab   :  { %7188 = vmatpush3.bf16.msra.mxu0 %v7606_v49  ;;  %v7622_v49 = vld [vmem:[%s7948_s4 + $0xb0] sm:$0xff]  }
0x14ac   :  { %7189 = vmatprep.subr.bf16.mxu0 %v7607_v51 }
0x14ad   :  { %v7756_v57 = vpop.eup %7755 }
0x14ae   :  { %v3216_v58 = vsel %vm3200_vm15, %v7756_v57, 0.0 }
0x14af   :  { %3217 = vadd.xlane.f32.xlu1 %v3216_v58  ;;  %7190 = vmatpush3.bf16.msra.mxu0 %v7607_v51  ;;  %v7624_v51 = vld [vmem:[%s7948_s4 + $0xb8] sm:$0xff]  }
0x1534   :  { %v3215_v60 = vpop.xlane.xlu0 %3214 }
0x1535   :  { %7757 = vrcp.f32 %v3215_v60 }
0x153c   :  { %v3218_v62 = vpop.xlane.xlu1 %3217 }
0x153d   :  { %7759 = vrcp.f32 %v3218_v62 }
0x153f   :  { %v7758_v63 = vpop.eup %7757 }
0x1540   :  { %v3221_v59 = vmul.f32 %v7758_v63, %v7754_v53  ;;  %v7608_v53 = vld [vmem:[%s8898_s0 + $0x78] sm:$0xff]  }
0x1541   :  { %7191 = vmatprep.subr.bf16.mxu0 %v7608_v53 }
0x1542   :  { %v3223_v1 = vpack.c.bf16 %v3221_v59, %v3221_v59  ;;  %7192 = vmatpush3.bf16.msra.mxu0 %v7608_v53 }
0x1543   :  { %7221 = vmatprep.subr.bf16.mxu0 %v7848_v11 }
0x1544   :  { %7128 = vmatmul.mubr.msk.bf16.vlgmr.msra.gmra.mrb[88].mxu1 %vm3200_vm15, %v3223_v1 }
0x1545   :  { %7132 = vmatpush3.bf16.msra.mxu1 %v3095_v54  ;;  %7133 = vmatprep.mubr.msk.bf16.mxu1 %vm7849_vm0, %v7848_v11 }
0x1546   :  { %7157 = vmatprep.subr.bf16.mxu1 %v7593_v2  ;;  %7194 = vmatmul.mubr.bf16.vlgmr.msra.gmra.mrb[64].mxu0 %v8493_v0 }
0x1547   :  { %v7760_v3 = vpop.eup %7759  ;;  %7225 = vmatprep.mubr.msk.bf16.mxu0 %vm7849_vm0, %v7848_v11  ;;  %7222 = vmatpush3.bf16.msra.mxu0 %v7613_v41 }
0x1548   :  { %v3222_v4 = vmul.f32 %v7760_v3, %v7756_v57  ;;  %7223 = vmatprep.subr.bf16.mxu0 %v7848_v11 }
0x154a   :  { %v3224_v5 = vpack.c.bf16 %v3222_v4, %v3222_v4 }
0x154b   :  { %7224 = vmatpush3.bf16.msra.mxu0 %v7615_v42 }
0x154c   :  { %7134 = vmatmul.mubr.msk.bf16.vlgmr.msra.gmra.mrb[92].mxu1 %vm3200_vm15, %v3224_v5  ;;  %7237 = vmatprep.subr.bf16.mxu0 %v7848_v11 }
0x154d   :  { %7158 = vmatpush3.bf16.msra.mxu1 %v7593_v2  ;;  %7173 = vmatprep.mubr.bf16.mxu1 %v8489_v61 }
0x154e   :  { %7159 = vmatprep.subr.bf16.mxu1 %v7594_v44 }
0x1551   :  { %7160 = vmatpush3.bf16.msra.mxu1 %v7594_v44  ;;  %v6114_v44 = vld [vmem:[%s8903_s25 + $0x1] ss:$0 sm:$0xff] }
0x1552   :  { %7161 = vmatprep.subr.bf16.mxu1 %v7595_v6 }
0x1555   :  { %7162 = vmatpush3.bf16.msra.mxu1 %v7595_v6 }
0x1556   :  { %7163 = vmatprep.subr.bf16.mxu1 %v7596_v7 }
0x1559   :  { %7164 = vmatpush3.bf16.msra.mxu1 %v7596_v7 }
0x155a   :  { %7165 = vmatprep.subr.bf16.mxu1 %v7597_v48 }
0x155d   :  { %7166 = vmatpush3.bf16.msra.mxu1 %v7597_v48 }
0x155e   :  { %7167 = vmatprep.subr.bf16.mxu1 %v7598_v50 }
0x1561   :  { %7168 = vmatpush3.bf16.msra.mxu1 %v7598_v50 }
0x1562   :  { %7169 = vmatprep.subr.bf16.mxu1 %v7599_v8 }
0x1565   :  { %7170 = vmatpush3.bf16.msra.mxu1 %v7599_v8 }
0x1566   :  { %7171 = vmatprep.subr.bf16.mxu1 %v7600_v9 }
0x1569   :  { %7172 = vmatpush3.bf16.msra.mxu1 %v7600_v9 }
0x156a   :  { %7197 = vmatprep.subr.bf16.mxu1 %v7848_v11 }
0x156c   :  { %7174 = vmatmul.mubr.bf16.vlgmr.msra.gmra.mrb[96].mxu1 %v8493_v0 }
0x156d   :  { %7199 = vmatprep.mubr.msk.bf16.mxu1 %vm7849_vm0, %v7848_v11 }
0x1617   :  { %v8597_v46 = vpop.f32.mrb[88].mxu1 }
0x1618   :  { %v7129_v10 = vpop.f32.mrb[89].mxu1 }
0x1619   :  { %v3265_v12 = vpop.f32.mrb[90].mxu1  ;;  %v7195_v6 = vpop.f32.mrb[64].mxu0 }
0x161a   :  { %v7130_v13 = vpop.f32.mrb[91].mxu1  ;;  %v3668_v7 = vadd.f32 %v7195_v6, %v6114_v44  ;;  %v3659_v48 = vpop.f32.mrb[65].mxu0 }
0x161b   :  { %v7196_v50 = vpop.f32.mrb[66].mxu0 }
0x161c   :  { %v3671_v8 = vadd.f32 %v7196_v50, %v6114_v44  ;;  %v7625_v50 = vld [vmem:[%s7938_s20 + $0xa0] sm:$0xff]  }
0x161e   :  { %v3679_v9 = vpack.c.bf16 %v3671_v8, %v3668_v7  ;;  %v7626_v8 = vld [vmem:[%s7938_s20 + $0xa8] sm:$0xff]  }
0x161f   :  { %v8599_v15 = vpop.f32.mrb[92].mxu1 }
0x1620   :  { %v3311_v16 = vpack.c.bf16 %v8599_v15, %v8597_v46  ;;  %v7135_v54 = vpop.f32.mrb[93].mxu1  ;;  %v7616_v46 = vld [vmem:[%s7948_s4 + $0x98] sm:$0xff]   ;;  %v7618_v15 = vld [vmem:[%s7948_s4 + $0xa0] sm:$0xff]  }
0x1621   :  { %v3308_v18 = vpop.f32.mrb[94].mxu1 }
0x1622   :  { %v7136_v20 = vpop.f32.mrb[95].mxu1 }
0x163f   :  { %v7175_v22 = vpop.f32.mrb[96].mxu1 }
0x1640   :  { %v3537_v25 = vpop.f32.mrb[97].mxu1  ;;  %v3546_v28 = vadd.f32 %v7175_v22, %v6088_v23 }
0x1641   :  { %v7176_v26 = vpop.f32.mrb[98].mxu1  ;;  %v3538_v14 = vadd.f32 %v6088_v23, %v3537_v25 }
0x1642   :  { %v3549_v32 = vadd.f32 %v7176_v26, %v6088_v23  ;;  %v3540_v33 = vpop.f32.mrb[99].mxu1 }
0x1643   :  { %v3541_v17 = vadd.f32 %v6088_v23, %v3540_v33 }
0x1644   :  { %v3677_v34 = vpack.c.bf16 %v3549_v32, %v3546_v28  ;;  %v3660_v28 = vadd.f32 %v6114_v44, %v3659_v48  ;;  %v3662_v32 = vpop.f32.mrb[67].mxu0  ;;  %v7623_v48 = vld [vmem:[%s7938_s20 + $0x98] sm:$0xff]  }
0x1645   :  { %v3676_v35 = vpack.c.bf16 %v3541_v17, %v3538_v14  ;;  %v3663_v33 = vadd.f32 %v6114_v44, %v3662_v32 }
0x1646   :  { %v3730_v43 = vsel %vm540_vm5, %v3677_v34, 0 }
0x1647   :  { %v3684_v39 = vsel %vm540_vm5, %v3676_v35, 0  ;;  %v3678_v14 = vpack.c.bf16 %v3663_v33, %v3660_v28 }
0x1648   :  { %7198 = vmatpush3.bf16.xpose.msra.mxu1 %v3684_v39 }
0x1649   :  { %7203 = vmatprep.subr.bf16.mxu1 %v7848_v11 }
0x164f   :  { %7200 = vmatmul.mubr.msk.bf16.vlgmr.msra.gmra.mrb[100].mxu1 %vm540_vm5, %v3674_v40 }
0x1650   :  { %7204 = vmatpush3.bf16.xpose.msra.mxu1 %v3730_v43  ;;  %7205 = vmatprep.mubr.msk.bf16.mxu1 %vm7849_vm0, %v7848_v11  ;;  %v7609_v43 = vld [vmem:[%s8905_s3] sm:$0xff]  }
0x1651   :  { %7209 = vmatprep.subr.bf16.mxu1 %v7848_v11 }
0x1657   :  { %7206 = vmatmul.mubr.msk.bf16.vlgmr.msra.gmra.mrb[104].mxu1 %vm540_vm5, %v3675_v47  ;;  %v7610_v47 = vld [vmem:[%s8905_s3 + $0x8] sm:$0xff]  }
0x1658   :  { %7211 = vmatprep.mubr.msk.bf16.mxu1 %vm7849_vm0, %v7848_v11  ;;  %7210 = vmatpush3.bf16.msra.mxu1 %v3678_v14 }
0x1659   :  { %7215 = vmatprep.subr.bf16.mxu1 %v7848_v11 }
0x1722   :  { %v3720_v55 = vpop.f32.mrb[100].mxu1 }
0x1723   :  { %v3721_v57 = vadd.f32 %v3720_v55, %v8568_v27  ;;  %v7201_v58 = vpop.f32.mrb[101].mxu1 }
0x1724   :  { %v3723_v60 = vpop.f32.mrb[102].mxu1 }
0x1725   :  { %v7202_v62 = vpop.f32.mrb[103].mxu1  ;;  %v3772_v63 = vsel %vm3200_vm15, %v3721_v57, -inf }
0x1726   :  { %3773 = vmax.xlane.f32.xlu0 %v3772_v63  ;;  %v7617_v62 = vld [vmem:[%s7938_s20 + $0x80] sm:$0xff]  }
0x172a   :  { %v3766_v59 = vpop.f32.mrb[104].mxu1 }
0x172b   :  { %v3767_v1 = vadd.f32 %v3766_v59, %v8574_v36  ;;  %v7207_v2 = vpop.f32.mrb[105].mxu1 }
0x172c   :  { %v3769_v3 = vpop.f32.mrb[106].mxu1 }
0x172d   :  { %v7208_v4 = vpop.f32.mrb[107].mxu1  ;;  %v3775_v5 = vsel %vm3200_vm15, %v3767_v1, -inf  ;;  %v7619_v3 = vld [vmem:[%s7938_s20 + $0x88] sm:$0xff]  }
0x172e   :  { %3776 = vmax.xlane.f32.xlu1 %v3775_v5  ;;  %v7621_v5 = vld [vmem:[%s7938_s20 + $0x90] sm:$0xff]  }
0x17b3   :  { %v3774_v10 = vpop.xlane.xlu0 %3773 }
0x17b4   :  { %v3778_v12 = vsub.f32 %v3721_v57, %v3774_v10  ;;  %v7628_v10 = vld [vmem:[%s7938_s20 + $0xb8] sm:$0xff]  }
0x17b6   :  { %v3780_v13 = vmul.f32 1.442695, %v3778_v12  ;;  %v6180_v12 = vld [vmem:[%s8901_s17 + $0x2] ss:$0 sm:$0xff] }
0x17b8   :  { %7761 = vpow2.f32 %v3780_v13 }
0x17bb   :  { %v3777_v54 = vpop.xlane.xlu1 %3776 }
0x17bc   :  { %v3779_v18 = vsub.f32 %v3767_v1, %v3777_v54 }
0x17be   :  { %v3782_v20 = vmul.f32 1.442695, %v3779_v18 }
0x17c0   :  { %7763 = vpow2.f32 %v3782_v20 }
0x17c2   :  { %v7762_v22 = vpop.eup %7761 }
0x17c3   :  { %v3784_v23 = vsel %vm3200_vm15, %v7762_v22, 0.0 }
0x17c4   :  { %3785 = vadd.xlane.f32.xlu0 %v3784_v23 }
0x17ca   :  { %v7764_v25 = vpop.eup %7763 }
0x17cb   :  { %v3787_v26 = vsel %vm3200_vm15, %v7764_v25, 0.0 }
0x17cc   :  { %3788 = vadd.xlane.f32.xlu1 %v3787_v26 }
0x1851   :  { %v3786_v17 = vpop.xlane.xlu0 %3785 }
0x1852   :  { %7765 = vrcp.f32 %v3786_v17 }
0x1859   :  { %v3789_v34 = vpop.xlane.xlu1 %3788 }
0x185a   :  { %7767 = vrcp.f32 %v3789_v34 }
0x185c   :  { %v7766_v35 = vpop.eup %7765 }
0x185d   :  { %v3792_v38 = vmul.f32 %v7766_v35, %v7762_v22 }
0x185f   :  { %v3794_v39 = vpack.c.bf16 %v3792_v38, %v3792_v38 }
0x1861   :  { %7212 = vmatmul.mubr.msk.bf16.vlgmr.msra.gmra.mrb[108].mxu1 %vm3200_vm15, %v3794_v39 }
0x1862   :  { %7216 = vmatpush3.bf16.msra.mxu1 %v3679_v9  ;;  %7217 = vmatprep.mubr.msk.bf16.mxu1 %vm7849_vm0, %v7848_v11  ;;  %v7627_v9 = vld [vmem:[%s7938_s20 + $0xb0] sm:$0xff]  }
0x1863   :  { %7229 = vmatprep.subr.bf16.mxu1 %v7848_v11 }
0x1864   :  { %v7768_v52 = vpop.eup %7767 }
0x1865   :  { %v3793_v40 = vmul.f32 %v7768_v52, %v7764_v25  ;;  %v6154_v52 = vld [vmem:[%s8902_s21 + $0x2] ss:$0 sm:$0xff] }
0x1867   :  { %v3795_v45 = vpack.c.bf16 %v3793_v40, %v3793_v40 }
0x1869   :  { %7218 = vmatmul.mubr.msk.bf16.vlgmr.msra.gmra.mrb[112].mxu1 %vm3200_vm15, %v3795_v45 }
0x186a   :  { %7230 = vmatpush3.bf16.msra.mxu1 %v7609_v43  ;;  %7233 = vmatprep.mubr.msk.bf16.mxu1 %vm7849_vm0, %v7848_v11 }
0x186b   :  { %7231 = vmatprep.subr.bf16.mxu1 %v7848_v11 }
0x186e   :  { %7232 = vmatpush3.bf16.msra.mxu1 %v7610_v47 }
0x186f   :  { %7257 = vmatprep.subr.bf16.mxu1 %v7611_v19 }
0x1871   :  { %7234 = vmatmul.mubr.msk.bf16.vlgmr.msra.gmra.mrb[116].mxu1 %vm540_vm5, %v3311_v16  ;;  %v7620_v16 = vld [vmem:[%s7948_s4 + $0xa8] sm:$0xff]  }
0x1872   :  { %7258 = vmatpush3.bf16.msra.mxu1 %v7611_v19  ;;  %7273 = vmatprep.mubr.bf16.mxu1 %v8489_v61 }
0x1873   :  { %7259 = vmatprep.subr.bf16.mxu1 %v7612_v37 }
0x1876   :  { %7260 = vmatpush3.bf16.msra.mxu1 %v7612_v37 }
0x1877   :  { %7261 = vmatprep.subr.bf16.mxu1 %v7614_v21 }
0x187a   :  { %7262 = vmatpush3.bf16.msra.mxu1 %v7614_v21 }
0x187b   :  { %7263 = vmatprep.subr.bf16.mxu1 %v7616_v46 }
0x187e   :  { %7264 = vmatpush3.bf16.msra.mxu1 %v7616_v46  ;;  %v7629_v46 = vld [vmem:[%s8898_s0 + $0x80] sm:$0xff]  }
0x187f   :  { %7265 = vmatprep.subr.bf16.mxu1 %v7618_v15 }
0x1882   :  { %7266 = vmatpush3.bf16.msra.mxu1 %v7618_v15  ;;  %v7630_v15 = vld [vmem:[%s8898_s0 + $0x88] sm:$0xff]  }
0x1883   :  { %7267 = vmatprep.subr.bf16.mxu1 %v7620_v16 }
0x1886   :  { %7268 = vmatpush3.bf16.msra.mxu1 %v7620_v16  ;;  %v7631_v16 = vld [vmem:[%s8898_s0 + $0x90] sm:$0xff]  }
0x1887   :  { %7269 = vmatprep.subr.bf16.mxu1 %v7622_v49 }
0x188a   :  { %7270 = vmatpush3.bf16.msra.mxu1 %v7622_v49  ;;  %v7632_v49 = vld [vmem:[%s8898_s0 + $0x98] sm:$0xff]  }
0x188b   :  { %7271 = vmatprep.subr.bf16.mxu1 %v7624_v51 }
0x188e   :  { %7272 = vmatpush3.bf16.msra.mxu1 %v7624_v51  ;;  %v7633_v51 = vld [vmem:[%s8898_s0 + $0xa0] sm:$0xff]  }
0x188f   :  { %7297 = vmatprep.subr.bf16.mxu1 %v7848_v11 }
0x1891   :  { %7274 = vmatmul.mubr.bf16.vlgmr.msra.gmra.mrb[120].mxu1 %v8493_v0 }
0x1892   :  { %7299 = vmatprep.mubr.msk.bf16.mxu1 %vm7849_vm0, %v7848_v11 }
0x1934   :  { %v3833_v53 = vpop.f32.mrb[108].mxu1 }
0x1935   :  { %v7213_v55 = vpop.f32.mrb[109].mxu1 }
0x1936   :  { %v3836_v57 = vpop.f32.mrb[110].mxu1  ;;  %v7635_v55 = vld [vmem:[%s8898_s0 + $0xb0] sm:$0xff]  }
0x1937   :  { %v7214_v58 = vpop.f32.mrb[111].mxu1  ;;  %v7636_v57 = vld [vmem:[%s8898_s0 + $0xb8] sm:$0xff]  }
0x193c   :  { %v3876_v60 = vpop.f32.mrb[112].mxu1 }
0x193d   :  { %v3882_v63 = vpack.c.bf16 %v3876_v60, %v3833_v53  ;;  %v7219_v59 = vpop.f32.mrb[113].mxu1  ;;  %v7634_v53 = vld [vmem:[%s8898_s0 + $0xa8] sm:$0xff]  }
0x193e   :  { %v3879_v1 = vpop.f32.mrb[114].mxu1 }
0x193f   :  { %v7220_v2 = vpop.f32.mrb[115].mxu1  ;;  %7226 = vmatmul.mubr.msk.bf16.vlgmr.msra.gmra.mrb[68].mxu0 %vm540_vm5, %v3882_v63 }
0x1940   :  { %7238 = vmatpush3.bf16.msra.mxu0 %v7617_v62  ;;  %7253 = vmatprep.mubr.msk.bf16.mxu0 %vm7849_vm0, %v7848_v11 }
0x1941   :  { %7239 = vmatprep.subr.bf16.mxu0 %v7848_v11 }
0x1944   :  { %7240 = vmatpush3.bf16.msra.mxu0 %v7619_v3  ;;  %v3993_v4 = vpop.f32.mrb[116].mxu1 }
0x1945   :  { %v7235_v44 = vpop.f32.mrb[117].mxu1  ;;  %7241 = vmatprep.subr.bf16.mxu0 %v7848_v11 }
0x1946   :  { %v3996_v6 = vpop.f32.mrb[118].mxu1 }
0x1947   :  { %v7236_v7 = vpop.f32.mrb[119].mxu1 }
0x1948   :  { %7242 = vmatpush3.bf16.msra.mxu0 %v7621_v5  ;;  %v6206_v7 = vld [vmem:[%s8903_s25 + $0x2] ss:$0 sm:$0xff] }
0x1949   :  { %7243 = vmatprep.subr.bf16.mxu0 %v7848_v11 }
0x194c   :  { %7244 = vmatpush3.bf16.msra.mxu0 %v7623_v48 }
0x194d   :  { %7245 = vmatprep.subr.bf16.mxu0 %v7848_v11 }
0x1950   :  { %7246 = vmatpush3.bf16.msra.mxu0 %v7625_v50 }
0x1951   :  { %7247 = vmatprep.subr.bf16.mxu0 %v7848_v11 }
0x1954   :  { %7248 = vmatpush3.bf16.msra.mxu0 %v7626_v8 }
0x1955   :  { %7249 = vmatprep.subr.bf16.mxu0 %v7848_v11 }
0x1958   :  { %7250 = vmatpush3.bf16.msra.mxu0 %v7627_v9 }
0x1959   :  { %7251 = vmatprep.subr.bf16.mxu0 %v7848_v11 }
0x195c   :  { %7252 = vmatpush3.bf16.msra.mxu0 %v7628_v10 }
0x195d   :  { %7277 = vmatprep.subr.bf16.mxu0 %v7629_v46 }
0x195f   :  { %7254 = vmatmul.mubr.bf16.vlgmr.msra.gmra.mrb[72].mxu0 %v8511_v29 }
0x1960   :  { %7293 = vmatprep.mubr.bf16.mxu0 %v8489_v61  ;;  %7278 = vmatpush3.bf16.msra.mxu0 %v7629_v46  ;;  %v7640_v46 = vld [vmem:[%s7938_s20 + $0xd8] sm:$0xff]  }
0x1961   :  { %7279 = vmatprep.subr.bf16.mxu0 %v7630_v15 }
0x1964   :  { %v7275_v13 = vpop.f32.mrb[120].mxu1  ;;  %7280 = vmatpush3.bf16.msra.mxu0 %v7630_v15  ;;  %v7641_v15 = vld [vmem:[%s7938_s20 + $0xe0] sm:$0xff]  }
0x1965   :  { %v4230_v54 = vadd.f32 %v7275_v13, %v6180_v12  ;;  %v4221_v18 = vpop.f32.mrb[121].mxu1  ;;  %7281 = vmatprep.subr.bf16.mxu0 %v7631_v16 }
0x1966   :  { %v4222_v20 = vadd.f32 %v6180_v12, %v4221_v18  ;;  %v7276_v22 = vpop.f32.mrb[122].mxu1 }
0x1967   :  { %v4233_v23 = vadd.f32 %v7276_v22, %v6180_v12  ;;  %v4224_v25 = vpop.f32.mrb[123].mxu1 }
0x1968   :  { %v4225_v26 = vadd.f32 %v6180_v12, %v4224_v25  ;;  %7282 = vmatpush3.bf16.msra.mxu0 %v7631_v16  ;;  %v7642_v16 = vld [vmem:[%s7938_s20 + $0xe8] sm:$0xff]  }
0x1969   :  { %v4361_v28 = vpack.c.bf16 %v4233_v23, %v4230_v54  ;;  %7283 = vmatprep.subr.bf16.mxu0 %v7632_v49 }
0x196a   :  { %v4360_v32 = vpack.c.bf16 %v4225_v26, %v4222_v20 }
0x196b   :  { %v4414_v41 = vsel %vm540_vm5, %v4361_v28, 0 }
0x196c   :  { %v4368_v33 = vsel %vm540_vm5, %v4360_v32, 0  ;;  %7284 = vmatpush3.bf16.msra.mxu0 %v7632_v49  ;;  %v7643_v49 = vld [vmem:[%s7938_s20 + $0xf0] sm:$0xff]  }
0x196d   :  { %7298 = vmatpush3.bf16.xpose.msra.mxu1 %v4368_v33  ;;  %7285 = vmatprep.subr.bf16.mxu0 %v7633_v51 }
0x196e   :  { %7303 = vmatprep.subr.bf16.mxu1 %v7848_v11 }
0x1970   :  { %7286 = vmatpush3.bf16.msra.mxu0 %v7633_v51  ;;  %v7644_v51 = vld [vmem:[%s7938_s20 + $0xf8] sm:$0xff]  }
0x1971   :  { %7287 = vmatprep.subr.bf16.mxu0 %v7634_v53 }
0x1974   :  { %7288 = vmatpush3.bf16.msra.mxu0 %v7634_v53  ;;  %v7645_v53 = vld [vmem:[%s8905_s3 + $0x20] sm:$0xff]  }
0x1975   :  { %7289 = vmatprep.subr.bf16.mxu0 %v7635_v55 }
0x1978   :  { %7290 = vmatpush3.bf16.msra.mxu0 %v7635_v55  ;;  %v7646_v55 = vld [vmem:[%s8905_s3 + $0x28] sm:$0xff]  }
0x1979   :  { %7291 = vmatprep.subr.bf16.mxu0 %v7636_v57 }
0x197c   :  { %7292 = vmatpush3.bf16.msra.mxu0 %v7636_v57  ;;  %v7647_v57 = vld [vmem:[%s7948_s4 + $0xc0] sm:$0xff]  }
0x197d   :  { %7321 = vmatprep.subr.bf16.mxu0 %v7848_v11 }
0x197f   :  { %7294 = vmatmul.mubr.bf16.vlgmr.msra.gmra.mrb[76].mxu0 %v8493_v0 }
0x1980   :  { %7325 = vmatprep.mubr.msk.bf16.mxu0 %vm7849_vm0, %v7848_v11  ;;  %7322 = vmatpush3.bf16.msra.mxu0 %v7645_v53 }
0x1981   :  { %7323 = vmatprep.subr.bf16.mxu0 %v7848_v11 }
0x1984   :  { %7324 = vmatpush3.bf16.msra.mxu0 %v7646_v55 }
0x1985   :  { %7349 = vmatprep.subr.bf16.mxu0 %v7647_v57 }
0x1a12   :  { %v3937_v14 = vpop.f32.mrb[68].mxu0 }
0x1a13   :  { %v8691_v17 = vadd.f32 %v3993_v4, %v3937_v14  ;;  %v7227_v34 = vpop.f32.mrb[69].mxu0 }
0x1a14   :  { %v3940_v35 = vpop.f32.mrb[70].mxu0 }
0x1a15   :  { %v8693_v38 = vadd.f32 %v3996_v6, %v3940_v35  ;;  %v7228_v39 = vpop.f32.mrb[71].mxu0 }
0x1a32   :  { %v4107_v40 = vpop.f32.mrb[72].mxu0 }
0x1a33   :  { %v4108_v43 = vadd.f32 %v6154_v52, %v4107_v40  ;;  %v7255_v45 = vpop.f32.mrb[73].mxu0 }
0x1a34   :  { %v4110_v47 = vpop.f32.mrb[74].mxu0 }
0x1a35   :  { %v4358_v19 = vpack.c.bf16 %v4108_v43, %v4108_v43  ;;  %v7256_v37 = vpop.f32.mrb[75].mxu0  ;;  %v4111_v21 = vadd.f32 %v6154_v52, %v4110_v47 }
0x1a36   :  { %v7637_v37 = vld [vmem:[%s7938_s20 + $0xc0] sm:$0xff]  }
0x1a37   :  { %7300 = vmatmul.mubr.msk.bf16.vlgmr.msra.gmra.mrb[124].mxu1 %vm540_vm5, %v4358_v19  ;;  %v4359_v42 = vpack.c.bf16 %v4111_v21, %v4111_v21  ;;  %v7638_v21 = vld [vmem:[%s7938_s20 + $0xc8] sm:$0xff]  }
0x1a38   :  { %7304 = vmatpush3.bf16.xpose.msra.mxu1 %v4414_v41  ;;  %7305 = vmatprep.mubr.msk.bf16.mxu1 %vm7849_vm0, %v7848_v11 }
0x1a39   :  { %7309 = vmatprep.subr.bf16.mxu1 %v7848_v11 }
0x1a3f   :  { %7306 = vmatmul.mubr.msk.bf16.vlgmr.msra.gmra.mrb[128].mxu1 %vm540_vm5, %v4359_v42  ;;  %v7639_v42 = vld [vmem:[%s7938_s20 + $0xd0] sm:$0xff]  }
0x1a40   :  { %7311 = vmatprep.mubr.msk.bf16.mxu1 %vm7849_vm0, %v7848_v11 }
0x1a52   :  { %v7295_v48 = vpop.f32.mrb[76].mxu0 }
0x1a53   :  { %v4352_v50 = vadd.f32 %v7295_v48, %v6206_v7  ;;  %v4343_v8 = vpop.f32.mrb[77].mxu0  ;;  %v7653_v48 = vld [vmem:[%s7948_s4 + $0xf0] sm:$0xff]  }
0x1a54   :  { %v7296_v9 = vpop.f32.mrb[78].mxu0  ;;  %v4344_v33 = vadd.f32 %v6206_v7, %v4343_v8 }
0x1a55   :  { %v4355_v10 = vadd.f32 %v7296_v9, %v6206_v7  ;;  %v4346_v14 = vpop.f32.mrb[79].mxu0 }
0x1a56   :  { %v4347_v34 = vadd.f32 %v6206_v7, %v4346_v14  ;;  %v7652_v7 = vld [vmem:[%s7948_s4 + $0xe8] sm:$0xff]  }
0x1a57   :  { %v4363_v12 = vpack.c.bf16 %v4355_v10, %v4352_v50  ;;  %v7654_v50 = vld [vmem:[%s7948_s4 + $0xf8] sm:$0xff]  }
0x1a58   :  { %v4362_v35 = vpack.c.bf16 %v4347_v34, %v4344_v33 }
0x1a5a   :  { %7310 = vmatpush3.bf16.msra.mxu1 %v4362_v35 }
0x1a5b   :  { %7315 = vmatprep.subr.bf16.mxu1 %v7848_v11 }
0x1b0a   :  { %v4404_v58 = vpop.f32.mrb[124].mxu1 }
0x1b0b   :  { %v4405_v60 = vadd.f32 %v4404_v58, %v8568_v27  ;;  %v7301_v62 = vpop.f32.mrb[125].mxu1 }
0x1b0c   :  { %v4407_v63 = vpop.f32.mrb[126].mxu1 }
0x1b0d   :  { %v7302_v59 = vpop.f32.mrb[127].mxu1  ;;  %v4456_v1 = vsel %vm3200_vm15, %v4405_v60, -inf }
0x1b0e   :  { %4457 = vmax.xlane.f32.xlu0 %v4456_v1 }
0x1b12   :  { %v4450_v2 = vpop.f32.mrb[128].mxu1 }
0x1b13   :  { %v4451_v3 = vadd.f32 %v4450_v2, %v8574_v36  ;;  %v7307_v4 = vpop.f32.mrb[129].mxu1  ;;  %v7648_v2 = vld [vmem:[%s7948_s4 + $0xc8] sm:$0xff]  }
0x1b14   :  { %v4453_v5 = vpop.f32.mrb[130].mxu1 }
0x1b15   :  { %v7308_v44 = vpop.f32.mrb[131].mxu1  ;;  %v4459_v6 = vsel %vm3200_vm15, %v4451_v3, -inf  ;;  %v7649_v5 = vld [vmem:[%s7948_s4 + $0xd0] sm:$0xff]  }
0x1b16   :  { %4460 = vmax.xlane.f32.xlu1 %v4459_v6  ;;  %v7650_v44 = vld [vmem:[%s7948_s4 + $0xd8] sm:$0xff]   ;;  %v7651_v6 = vld [vmem:[%s7948_s4 + $0xe0] sm:$0xff]  }
0x1b9b   :  { %v4458_v13 = vpop.xlane.xlu0 %4457 }
0x1b9c   :  { %v4462_v54 = vsub.f32 %v4405_v60, %v4458_v13 }
0x1b9e   :  { %v4464_v18 = vmul.f32 1.442695, %v4462_v54 }
0x1ba0   :  { %7769 = vpow2.f32 %v4464_v18 }
0x1ba3   :  { %v4461_v20 = vpop.xlane.xlu1 %4460 }
0x1ba4   :  { %v4463_v22 = vsub.f32 %v4451_v3, %v4461_v20 }
0x1ba6   :  { %v4466_v23 = vmul.f32 1.442695, %v4463_v22 }
0x1ba8   :  { %7771 = vpow2.f32 %v4466_v23 }
0x1baa   :  { %v7770_v25 = vpop.eup %7769 }
0x1bab   :  { %v4468_v26 = vsel %vm3200_vm15, %v7770_v25, 0.0 }
0x1bac   :  { %4469 = vadd.xlane.f32.xlu0 %v4468_v26 }
0x1bb2   :  { %v7772_v28 = vpop.eup %7771 }
0x1bb3   :  { %v4471_v32 = vsel %vm3200_vm15, %v7772_v28, 0.0 }
0x1bb4   :  { %4472 = vadd.xlane.f32.xlu1 %v4471_v32 }
0x1c39   :  { %v4470_v39 = vpop.xlane.xlu0 %4469 }
0x1c3a   :  { %7773 = vrcp.f32 %v4470_v39 }
0x1c41   :  { %v4473_v52 = vpop.xlane.xlu1 %4472 }
0x1c42   :  { %7775 = vrcp.f32 %v4473_v52 }
0x1c44   :  { %v7774_v40 = vpop.eup %7773 }
0x1c45   :  { %v4476_v43 = vmul.f32 %v7774_v40, %v7770_v25  ;;  %v6269_v25 = vld [vmem:[%s8901_s17 + $0x3] ss:$0 sm:$0xff] }
0x1c47   :  { %v4478_v45 = vpack.c.bf16 %v4476_v43, %v4476_v43 }
0x1c49   :  { %7312 = vmatmul.mubr.msk.bf16.vlgmr.msra.gmra.mrb[132].mxu1 %vm3200_vm15, %v4478_v45 }
0x1c4a   :  { %7316 = vmatpush3.bf16.msra.mxu1 %v4363_v12  ;;  %7317 = vmatprep.mubr.msk.bf16.mxu1 %vm7849_vm0, %v7848_v11 }
0x1c4b   :  { %7329 = vmatprep.subr.bf16.mxu1 %v7848_v11 }
0x1c4c   :  { %v7776_v47 = vpop.eup %7775 }
0x1c4d   :  { %v4477_v19 = vmul.f32 %v7776_v47, %v7772_v28 }
0x1c4f   :  { %v4479_v41 = vpack.c.bf16 %v4477_v19, %v4477_v19 }
0x1c51   :  { %7318 = vmatmul.mubr.msk.bf16.vlgmr.msra.gmra.mrb[136].mxu1 %vm3200_vm15, %v4479_v41  ;;  %v7656_v41 = vld [vmem:[%s8898_s0 + $0xc8] sm:$0xff]  }
0x1c52   :  { %7330 = vmatpush3.bf16.msra.mxu1 %v7637_v37  ;;  %7345 = vmatprep.mubr.msk.bf16.mxu1 %vm7849_vm0, %v7848_v11  ;;  %v7655_v37 = vld [vmem:[%s8898_s0 + $0xc0] sm:$0xff]  }
0x1c53   :  { %7331 = vmatprep.subr.bf16.mxu1 %v7848_v11 }
0x1c56   :  { %7332 = vmatpush3.bf16.msra.mxu1 %v7638_v21  ;;  %v7657_v21 = vld [vmem:[%s8898_s0 + $0xd0] sm:$0xff]  }
0x1c57   :  { %7333 = vmatprep.subr.bf16.mxu1 %v7848_v11 }
0x1c5a   :  { %7334 = vmatpush3.bf16.msra.mxu1 %v7639_v42  ;;  %v7658_v42 = vld [vmem:[%s8898_s0 + $0xd8] sm:$0xff]  }
0x1c5b   :  { %7335 = vmatprep.subr.bf16.mxu1 %v7848_v11 }
0x1c5e   :  { %7336 = vmatpush3.bf16.msra.mxu1 %v7640_v46  ;;  %v7659_v46 = vld [vmem:[%s8898_s0 + $0xe0] sm:$0xff]  }
0x1c5f   :  { %7337 = vmatprep.subr.bf16.mxu1 %v7848_v11 }
0x1c62   :  { %7338 = vmatpush3.bf16.msra.mxu1 %v7641_v15  ;;  %v7660_v15 = vld [vmem:[%s8898_s0 + $0xe8] sm:$0xff]  }
0x1c63   :  { %7339 = vmatprep.subr.bf16.mxu1 %v7848_v11 }
0x1c66   :  { %7340 = vmatpush3.bf16.msra.mxu1 %v7642_v16  ;;  %v7661_v16 = vld [vmem:[%s8898_s0 + $0xf0] sm:$0xff]  }
0x1c67   :  { %7341 = vmatprep.subr.bf16.mxu1 %v7848_v11 }
0x1c6a   :  { %7342 = vmatpush3.bf16.msra.mxu1 %v7643_v49  ;;  %v7662_v49 = vld [vmem:[%s8898_s0 + $0xf8] sm:$0xff]  }
0x1c6b   :  { %7343 = vmatprep.subr.bf16.mxu1 %v7848_v11 }
0x1c6e   :  { %7344 = vmatpush3.bf16.msra.mxu1 %v7644_v51 }
0x1c6f   :  { %7369 = vmatprep.subr.bf16.mxu1 %v7655_v37 }
0x1c71   :  { %7346 = vmatmul.mubr.bf16.vlgmr.msra.gmra.mrb[140].mxu1 %v8511_v29 }
0x1c72   :  { %7385 = vmatprep.mubr.bf16.mxu1 %v8489_v61  ;;  %7370 = vmatpush3.bf16.msra.mxu1 %v7655_v37 }
0x1c73   :  { %7371 = vmatprep.subr.bf16.mxu1 %v7656_v41 }
0x1c76   :  { %7372 = vmatpush3.bf16.msra.mxu1 %v7656_v41 }
0x1c77   :  { %7373 = vmatprep.subr.bf16.mxu1 %v7657_v21 }
0x1c7a   :  { %7374 = vmatpush3.bf16.msra.mxu1 %v7657_v21 }
0x1c7b   :  { %7375 = vmatprep.subr.bf16.mxu1 %v7658_v42 }
0x1c7e   :  { %7376 = vmatpush3.bf16.msra.mxu1 %v7658_v42 }
0x1c7f   :  { %7377 = vmatprep.subr.bf16.mxu1 %v7659_v46 }
0x1c82   :  { %7378 = vmatpush3.bf16.msra.mxu1 %v7659_v46  ;;  %v6315_v46 = vld [vmem:[%s8906_s8] ss:$0 sm:$0xff] }
0x1c83   :  { %7379 = vmatprep.subr.bf16.mxu1 %v7660_v15 }
0x1c86   :  { %7380 = vmatpush3.bf16.msra.mxu1 %v7660_v15 }
0x1c87   :  { %7381 = vmatprep.subr.bf16.mxu1 %v7661_v16 }
0x1c8a   :  { %7382 = vmatpush3.bf16.msra.mxu1 %v7661_v16 }
0x1c8b   :  { %7383 = vmatprep.subr.bf16.mxu1 %v7662_v49 }
0x1c8e   :  { %7384 = vmatpush3.bf16.msra.mxu1 %v7662_v49 }
0x1c8f   :  { %7413 = vmatprep.subr.bf16.mxu1 %v7848_v11 }
0x1c91   :  { %7386 = vmatmul.mubr.bf16.vlgmr.msra.gmra.mrb[144].mxu1 %v8493_v0 }
0x1c92   :  { %7417 = vmatprep.mubr.msk.bf16.mxu1 %vm7849_vm0, %v7848_v11 }
0x1d1c   :  { %v4517_v58 = vpop.f32.mrb[132].mxu1 }
0x1d1d   :  { %v7313_v60 = vpop.f32.mrb[133].mxu1 }
0x1d1e   :  { %v4520_v62 = vpop.f32.mrb[134].mxu1 }
0x1d1f   :  { %v7314_v63 = vpop.f32.mrb[135].mxu1 }
0x1d24   :  { %v4560_v59 = vpop.f32.mrb[136].mxu1 }
0x1d25   :  { %v4566_v29 = vpack.c.bf16 %v4560_v59, %v4517_v58  ;;  %v7319_v1 = vpop.f32.mrb[137].mxu1 }
0x1d26   :  { %v4563_v3 = vpop.f32.mrb[138].mxu1 }
0x1d27   :  { %v7320_v4 = vpop.f32.mrb[139].mxu1  ;;  %7326 = vmatmul.mubr.msk.bf16.vlgmr.msra.gmra.mrb[80].mxu0 %vm540_vm5, %v4566_v29 }
0x1d28   :  { %7350 = vmatpush3.bf16.msra.mxu0 %v7647_v57  ;;  %7365 = vmatprep.mubr.bf16.mxu0 %v8489_v61 }
0x1d29   :  { %7351 = vmatprep.subr.bf16.mxu0 %v7648_v2 }
0x1d2c   :  { %7352 = vmatpush3.bf16.msra.mxu0 %v7648_v2  ;;  %v6295_v2 = vld [vmem:[%s8903_s25 + $0x3] ss:$0 sm:$0xff] }
0x1d2d   :  { %7353 = vmatprep.subr.bf16.mxu0 %v7649_v5 }
0x1d30   :  { %7354 = vmatpush3.bf16.msra.mxu0 %v7649_v5 }
0x1d31   :  { %7355 = vmatprep.subr.bf16.mxu0 %v7650_v44 }
0x1d34   :  { %7356 = vmatpush3.bf16.msra.mxu0 %v7650_v44 }
0x1d35   :  { %7357 = vmatprep.subr.bf16.mxu0 %v7651_v6 }
0x1d38   :  { %7358 = vmatpush3.bf16.msra.mxu0 %v7651_v6 }
0x1d39   :  { %7359 = vmatprep.subr.bf16.mxu0 %v7652_v7 }
0x1d3c   :  { %7360 = vmatpush3.bf16.msra.mxu0 %v7652_v7 }
0x1d3d   :  { %7361 = vmatprep.subr.bf16.mxu0 %v7653_v48 }
0x1d40   :  { %7362 = vmatpush3.bf16.msra.mxu0 %v7653_v48 }
0x1d41   :  { %7363 = vmatprep.subr.bf16.mxu0 %v7654_v50 }
0x1d44   :  { %v4737_v61 = vpop.f32.mrb[140].mxu1  ;;  %7364 = vmatpush3.bf16.msra.mxu0 %v7654_v50 }
0x1d45   :  { %v7347_v8 = vpop.f32.mrb[141].mxu1  ;;  %7389 = vmatprep.subr.bf16.mxu0 %v7848_v11 }
0x1d46   :  { %v4740_v9 = vpop.f32.mrb[142].mxu1 }
0x1d47   :  { %v7348_v10 = vpop.f32.mrb[143].mxu1  ;;  %7366 = vmatmul.mubr.bf16.vlgmr.msra.gmra.mrb[84].mxu0 %v8493_v0 }
0x1d48   :  { %7391 = vmatprep.mubr.msk.bf16.mxu0 %vm7849_vm0, %v7848_v11 }
0x1d64   :  { %v7387_v3 = vpop.f32.mrb[144].mxu1 }
0x1d65   :  { %v4982_v4 = vadd.f32 %v7387_v3, %v6295_v2  ;;  %v4973_v5 = vpop.f32.mrb[145].mxu1  ;;  %v7673_v3 = vld [vmem:[%s8907_s14 + $0x24] ss:$8 sps:$4 sm:$0xff]  }
0x1d66   :  { %v4974_v10 = vadd.f32 %v6295_v2, %v4973_v5  ;;  %v7676_v5 = vld [vmem:[%s8907_s14 + $0x34] ss:$8 sps:$4 sm:$0xff]  }
0x1dfa   :  { %v4621_v12 = vpop.f32.mrb[80].mxu0 }
0x1dfb   :  { %v8766_v13 = vadd.f32 %v4621_v12, %v8691_v17  ;;  %v7327_v54 = vpop.f32.mrb[81].mxu0  ;;  %v6243_v17 = vld [vmem:[%s8902_s21 + $0x3] ss:$0 sm:$0xff]  ;;  %v7388_v12 = vpop.f32.mrb[146].mxu1 }
0x1dfc   :  { %v4624_v18 = vpop.f32.mrb[82].mxu0  ;;  %v4741_v47 = vadd.f32 %v6243_v17, %v4740_v9  ;;  %v4976_v54 = vpop.f32.mrb[147].mxu1 }
0x1dfd   :  { %v8769_v20 = vadd.f32 %v4624_v18, %v8693_v38  ;;  %v7328_v22 = vpop.f32.mrb[83].mxu0  ;;  %v4738_v38 = vadd.f32 %v6243_v17, %v4737_v61  ;;  %v4985_v18 = vadd.f32 %v7388_v12, %v6295_v2  ;;  %v7664_v17 = vld [vmem:[%s8905_s3 + $0x38] sm:$0xff]   ;;  %v7690_v12 = vld [vmem:[%s7998_s12] sm:$0xff]  }
0x1dfe   :  { %v4989_v19 = vpack.c.bf16 %v4741_v47, %v4741_v47  ;;  %v4977_v22 = vadd.f32 %v6295_v2, %v4976_v54  ;;  %v7668_v2 = vld [vmem:[%s8907_s14 + $0x10] ss:$8 sps:$4 sm:$0xff]   ;;  %v7691_v54 = vld [vmem:[%s7998_s12 + $0x48] sm:$0xff]  }
0x1dff   :  { %v4988_v43 = vpack.c.bf16 %v4738_v38, %v4738_v38 }
0x1e1a   :  { %v7367_v23 = vpop.f32.mrb[84].mxu0 }
0x1e1b   :  { %v4851_v26 = vpop.f32.mrb[85].mxu0  ;;  %v4860_v32 = vadd.f32 %v7367_v23, %v6269_v25  ;;  %v4993_v23 = vpack.c.bf16 %v4985_v18, %v4982_v4  ;;  %v7671_v4 = vld [vmem:[%s8907_s14 + $0x20] ss:$8 sps:$4 sm:$0xff]  }
0x1e1c   :  { %v7368_v28 = vpop.f32.mrb[86].mxu0  ;;  %v4852_v34 = vadd.f32 %v6269_v25, %v4851_v26  ;;  %v7692_v18 = vld [vmem:[%s7998_s12 + $0x8] sm:$0xff]  }
0x1e1d   :  { %v4863_v33 = vadd.f32 %v7368_v28, %v6269_v25  ;;  %v4854_v14 = vpop.f32.mrb[87].mxu0 }
0x1e1e   :  { %v4855_v35 = vadd.f32 %v6269_v25, %v4854_v14  ;;  %v4992_v25 = vpack.c.bf16 %v4977_v22, %v4974_v10  ;;  %v7689_v10 = vld [vmem:[%s7998_s12 + $0x40] sm:$0xff]   ;;  %v7693_v22 = vld [vmem:[%s7998_s12 + $0x50] sm:$0xff]  }
0x1e1f   :  { %v4991_v39 = vpack.c.bf16 %v4863_v33, %v4860_v32 }
0x1e20   :  { %v4990_v52 = vpack.c.bf16 %v4855_v35, %v4852_v34 }
0x1e21   :  { %v5044_v45 = vsel %vm540_vm5, %v4991_v39, 0 }
0x1e22   :  { %v4998_v40 = vsel %vm540_vm5, %v4990_v52, 0  ;;  %v7663_v52 = vld [vmem:[%s8905_s3 + $0x30] sm:$0xff]  }
0x1e23   :  { %7390 = vmatpush3.bf16.xpose.msra.mxu0 %v4998_v40  ;;  %7414 = vmatpush3.bf16.msra.mxu1 %v7663_v52 }
0x1e24   :  { %7395 = vmatprep.subr.bf16.mxu0 %v7848_v11  ;;  %7415 = vmatprep.subr.bf16.mxu1 %v7848_v11 }
0x1e27   :  { %7416 = vmatpush3.bf16.msra.mxu1 %v7664_v17 }
0x1e28   :  { %6663 = vmatprep.subr.bf16.mxu1 %v7689_v10 }
0x1e2a   :  { %7392 = vmatmul.mubr.msk.bf16.vlgmr.msra.gmra.mrb[88].mxu0 %vm540_vm5, %v4988_v43 }
0x1e2b   :  { %7396 = vmatpush3.bf16.xpose.msra.mxu0 %v5044_v45  ;;  %7397 = vmatprep.mubr.msk.bf16.mxu0 %vm7849_vm0, %v7848_v11 }
0x1e2c   :  { %7401 = vmatprep.subr.bf16.mxu0 %v7848_v11 }
0x1e32   :  { %7398 = vmatmul.mubr.msk.bf16.vlgmr.msra.gmra.mrb[92].mxu0 %vm540_vm5, %v4989_v19 }
0x1e33   :  { %7403 = vmatprep.mubr.msk.bf16.mxu0 %vm7849_vm0, %v7848_v11  ;;  %7402 = vmatpush3.bf16.msra.mxu0 %v4992_v25  ;;  %v7695_v25 = vld [vmem:[%s7998_s12 + $0x58] sm:$0xff]  }
0x1e34   :  { %7407 = vmatprep.subr.bf16.mxu0 %v7848_v11 }
0x1efd   :  { %v5034_v51 = vpop.f32.mrb[88].mxu0 }
0x1efe   :  { %v5035_v53 = vadd.f32 %v5034_v51, %v8568_v27  ;;  %v7393_v55 = vpop.f32.mrb[89].mxu0 }
0x1eff   :  { %v5037_v57 = vpop.f32.mrb[90].mxu0 }
0x1f00   :  { %v7394_v58 = vpop.f32.mrb[91].mxu0  ;;  %v5086_v60 = vsel %vm3200_vm15, %v5035_v53, -inf }
0x1f01   :  { %5087 = vmax.xlane.f32.xlu0 %v5086_v60 }
0x1f05   :  { %v5080_v62 = vpop.f32.mrb[92].mxu0 }
0x1f06   :  { %v5081_v63 = vadd.f32 %v5080_v62, %v8574_v36  ;;  %v7399_v59 = vpop.f32.mrb[93].mxu0 }
0x1f07   :  { %v5083_v29 = vpop.f32.mrb[94].mxu0 }
0x1f08   :  { %v7400_v1 = vpop.f32.mrb[95].mxu0  ;;  %v5089_v0 = vsel %vm3200_vm15, %v5081_v63, -inf  ;;  %v7667_v29 = vld [vmem:[%s8907_s14 + $0x4] ss:$8 sps:$4 sm:$0xff]  }
0x1f09   :  { %5090 = vmax.xlane.f32.xlu1 %v5089_v0  ;;  %v7665_v1 = vld [vmem:[%s8907_s14] ss:$8 sps:$4 sm:$0xff]   ;;  %v7670_v0 = vld [vmem:[%s8907_s14 + $0x14] ss:$8 sps:$4 sm:$0xff]  }
0x1f8e   :  { %v5088_v27 = vpop.xlane.xlu0 %5087 }
0x1f8f   :  { %v5092_v44 = vsub.f32 %v5035_v53, %v5088_v27  ;;  %v7674_v27 = vld [vmem:[%s8907_s14 + $0x30] ss:$8 sps:$4 sm:$0xff]  }
0x1f91   :  { %v5094_v6 = vmul.f32 1.442695, %v5092_v44  ;;  %v7679_v44 = vld [vmem:[%s8907_s14 + $0x44] ss:$8 sps:$4 sm:$0xff]  }
0x1f93   :  { %7777 = vpow2.f32 %v5094_v6  ;;  %v7677_v6 = vld [vmem:[%s8907_s14 + $0x40] ss:$8 sps:$4 sm:$0xff]  }
0x1f96   :  { %v5091_v7 = vpop.xlane.xlu1 %5090 }
0x1f97   :  { %v5093_v48 = vsub.f32 %v5081_v63, %v5091_v7  ;;  %v7682_v7 = vld [vmem:[%s8907_s14 + $0x54] ss:$8 sps:$4 sm:$0xff]  }
0x1f99   :  { %v5096_v50 = vmul.f32 1.442695, %v5093_v48  ;;  %v7680_v48 = vld [vmem:[%s8907_s14 + $0x50] ss:$8 sps:$4 sm:$0xff]  }
0x1f9b   :  { %7779 = vpow2.f32 %v5096_v50  ;;  %v7685_v50 = vld [vmem:[%s8907_s14 + $0x64] ss:$8 sps:$4 sm:$0xff]  }
0x1f9d   :  { %v7778_v61 = vpop.eup %7777 }
0x1f9e   :  { %v5098_v36 = vsel %vm3200_vm15, %v7778_v61, 0.0 }
0x1f9f   :  { %5099 = vadd.xlane.f32.xlu0 %v5098_v36  ;;  %v7683_v36 = vld [vmem:[%s8907_s14 + $0x60] ss:$8 sps:$4 sm:$0xff]  }
0x1fa5   :  { %v7780_v8 = vpop.eup %7779 }
0x1fa6   :  { %v5101_v9 = vsel %vm3200_vm15, %v7780_v8, 0.0 }
0x1fa7   :  { %5102 = vadd.xlane.f32.xlu1 %v5101_v9  ;;  %v7686_v9 = vld [vmem:[%s8907_s14 + $0x70] ss:$8 sps:$4 sm:$0xff]  }
0x202c   :  { %v5100_v26 = vpop.xlane.xlu0 %5099 }
0x202d   :  { %7781 = vrcp.f32 %v5100_v26  ;;  %v7696_v26 = vld [vmem:[%s7998_s12 + $0x18] sm:$0xff]  }
0x2034   :  { %v5103_v28 = vpop.xlane.xlu1 %5102 }
0x2035   :  { %7783 = vrcp.f32 %v5103_v28  ;;  %v7697_v28 = vld [vmem:[%s7998_s12 + $0x60] sm:$0xff]  }
0x2037   :  { %v7782_v32 = vpop.eup %7781 }
0x2038   :  { %v5106_v33 = vmul.f32 %v7782_v32, %v7778_v61  ;;  %v7851_v61 = vmov 0   ;;  %v7698_v32 = vld [vmem:[%s7998_s12 + $0x20] sm:$0xff]  }
0x203a   :  { %v5108_v14 = vpack.c.bf16 %v5106_v33, %v5106_v33  ;;  %v7699_v33 = vld [vmem:[%s7998_s12 + $0x68] sm:$0xff]  }
0x203c   :  { %7404 = vmatmul.mubr.msk.bf16.vlgmr.msra.gmra.mrb[96].mxu0 %vm3200_vm15, %v5108_v14 }
0x203d   :  { %7408 = vmatpush3.bf16.msra.mxu0 %v4993_v23  ;;  %7409 = vmatprep.mubr.msk.bf16.mxu0 %vm7849_vm0, %v7848_v11  ;;  %v7694_v23 = vld [vmem:[%s7998_s12 + $0x10] sm:$0xff]  }
0x203e   :  { %5434 = vmatprep.subr.bf16.mxu0 %v7667_v29  ;;  %v7704_v29 = vld [vmem:[%s7998_s12 + $0x38] sm:$0xff]  }
0x203f   :  { %v7784_v34 = vpop.eup %7783 }
0x2040   :  { %v5107_v35 = vmul.f32 %v7784_v34, %v7780_v8  ;;  %v7688_v8 = vld [vmem:[%s8907_s14 + $0x74] ss:$8 sps:$4 sm:$0xff]  }
0x2042   :  { %v5109_v39 = vpack.c.bf16 %v5107_v35, %v5107_v35 }
0x2044   :  { %7410 = vmatmul.mubr.msk.bf16.vlgmr.msra.gmra.mrb[100].mxu0 %vm3200_vm15, %v5109_v39 }
0x2045   :  { %5435 = vmatpush1.bf16.msra.mxu0 %v7665_v1  ;;  %5466 = vmatprep.mubr.bf16.mxu0 %v7851_v61  ;;  %v5350_v1 = vsub.s32 1, %v8154_v56 }
0x2046   :  { %5436 = vmatprep.subr.bf16.mxu0 %v7670_v0 }
0x2049   :  { %5437 = vmatpush1.bf16.msra.mxu0 %v7668_v2 }
0x204a   :  { %5438 = vmatprep.subr.bf16.mxu0 %v7673_v3 }
0x204d   :  { %5439 = vmatpush1.bf16.msra.mxu0 %v7671_v4 }
0x204e   :  { %5440 = vmatprep.subr.bf16.mxu0 %v7676_v5 }
0x2051   :  { %5441 = vmatpush1.bf16.msra.mxu0 %v7674_v27 }
0x2052   :  { %5442 = vmatprep.subr.bf16.mxu0 %v7679_v44 }
0x2055   :  { %5443 = vmatpush1.bf16.msra.mxu0 %v7677_v6 }
0x2056   :  { %5444 = vmatprep.subr.bf16.mxu0 %v7682_v7 }
0x2059   :  { %5445 = vmatpush1.bf16.msra.mxu0 %v7680_v48 }
0x205a   :  { %5446 = vmatprep.subr.bf16.mxu0 %v7685_v50 }
0x205d   :  { %5447 = vmatpush1.bf16.msra.mxu0 %v7683_v36 }
0x205e   :  { %5448 = vmatprep.subr.bf16.mxu0 %v7688_v8 }
0x2061   :  { %5449 = vmatpush1.bf16.msra.mxu0 %v7686_v9 }
0x210f   :  { %v5147_v40 = vpop.f32.mrb[96].mxu0 }
0x2110   :  { %v7405_v38 = vpop.f32.mrb[97].mxu0 }
0x2111   :  { %v5150_v43 = vpop.f32.mrb[98].mxu0 }
0x2112   :  { %v7406_v45 = vpop.f32.mrb[99].mxu0 }
0x2117   :  { %v5190_v47 = vpop.f32.mrb[100].mxu0 }
0x2118   :  { %v5196_v19 = vpack.c.bf16 %v5190_v47, %v5147_v40  ;;  %v7411_v37 = vpop.f32.mrb[101].mxu0 }
0x2119   :  { %v5193_v41 = vpop.f32.mrb[102].mxu0 }
0x211a   :  { %v7412_v21 = vpop.f32.mrb[103].mxu0  ;;  %7418 = vmatmul.mubr.msk.bf16.vlgmr.msra.gmra.mrb[148].mxu1 %vm540_vm5, %v5196_v19 }
0x211b   :  { %6664 = vmatpush3.bf16.msra.mxu1 %v7690_v12 }
0x211c   :  { %6665 = vmatprep.subr.bf16.mxu1 %v7691_v54 }
0x211f   :  { %6666 = vmatpush3.bf16.msra.mxu1 %v7692_v18 }
0x2120   :  { %6667 = vmatprep.subr.bf16.mxu1 %v7693_v22 }
0x2123   :  { %6668 = vmatpush3.bf16.msra.mxu1 %v7694_v23 }
0x2124   :  { %6669 = vmatprep.subr.bf16.mxu1 %v7695_v25 }
0x2127   :  { %6670 = vmatpush3.bf16.msra.mxu1 %v7696_v26 }
0x2128   :  { %6671 = vmatprep.subr.bf16.mxu1 %v7697_v28 }
0x212b   :  { %6672 = vmatpush3.bf16.msra.mxu1 %v7698_v32 }
0x212c   :  { %6673 = vmatprep.subr.bf16.mxu1 %v7699_v33 }
0x21ed   :  { %v5251_v42 = vpop.f32.mrb[148].mxu1 }
0x21ee   :  { %v5258_v15 = vadd.f32 %v5251_v42, %v8766_v13  ;;  %v7419_v16 = vpop.f32.mrb[149].mxu1 }
0x21ef   :  { %v5254_v49 = vpop.f32.mrb[150].mxu1 }
0x21f0   :  { %v5267_v11 = vadd.f32 %v6315_v46, %v5258_v15  ;;  %v5259_v51 = vadd.f32 %v5254_v49, %v8769_v20  ;;  %v7420_v53 = vpop.f32.mrb[151].mxu1 }
0x21f1   :  { %v6317_v53 = vld [vmem:[%s8909_s24] ss:$0 sm:$0xff] }
0x21f2   :  { %v5268_v55 = vadd.f32 %v6315_v46, %v5259_v51  ;;  %v8815_v57 = vadd.f32 %v5267_v11, %v8453_v30  ;;  %v6316_v46 = vld [vmem:[%s8908_s19] ss:$0 sm:$0xff] }
0x21f4   :  { %5271 = vadd.xlane.f32.xlu0 %v8815_v57  ;;  %v8819_v58 = vadd.f32 %v5268_v55, %v8457_v31 }
0x21f6   :  { %5273 = vadd.xlane.f32.xlu1 %v8819_v58 }
0x2281   :  { %v5272_v13 = vpop.xlane.xlu0 %5271 }
0x2282   :  { %v5275_v60 = vmul.f32 0.0078125, %v5272_v13 }
0x2283   :  { %v5274_v62 = vpop.xlane.xlu1 %5273 }
0x2284   :  { %v8823_v20 = vsub.f32 %v8815_v57, %v5275_v60  ;;  %v5276_v63 = vmul.f32 0.0078125, %v5274_v62 }
0x2286   :  { %v8826_v30 = vsub.f32 %v8819_v58, %v5276_v63  ;;  %v5279_v31 = vmul.f32 %v8823_v20, %v8823_v20  ;;  %v5294_v16 = vmul.f32 %v6316_v46, %v8823_v20  ;;  %v7700_v63 = vld [vmem:[%s7998_s12 + $0x28] sm:$0xff]   ;;  %v7703_v20 = vld [vmem:[%s7998_s12 + $0x78] sm:$0xff]  }
0x2287   :  { %6674 = vmatpush3.bf16.msra.mxu1 %v7700_v63 }
0x2288   :  { %5281 = vadd.xlane.f32.xlu0 %v5279_v31  ;;  %v5280_v59 = vmul.f32 %v8826_v30, %v8826_v30  ;;  %v5295_v49 = vmul.f32 %v6316_v46, %v8826_v30  ;;  %v7701_v31 = vld [vmem:[%s7998_s12 + $0x70] sm:$0xff]   ;;  %v5342_v30 = vld [vmem:[%s7993_s13] sm:$0x3]  ;;  %s7852_s13 = smov [#allocation2]  }
0x2289   :  { %6675 = vmatprep.subr.bf16.mxu1 %v7701_v31  ;;  %v5347_v0 = vrot.slane %v5342_v30, %v8563_v24  ;;  %v5351_v2 = vrot.slane %v5342_v30, %v5350_v1  ;;  %v6334_v24 = vld [vmem:[%s8003_s27] ss:$0 sm:$0xff]  ;;  %s5668_s30 = sshll.u32 %s7852_s13, 4  ;;  %s5669_s30 = int_to_ptr.vmem [resolvable:$true] %s5668_s30 }
0x228a   :  { %5283 = vadd.xlane.f32.xlu1 %v5280_v59  ;;  %v7702_v59 = vld [vmem:[%s7998_s12 + $0x30] sm:$0xff]   ;;  %s7795_s12 = scalar_lea.vmem %s5669_s30, 256  ;;  %p7800_p1 = scmp.lt.s32.totalorder %s5669_s30, %s5669_s30 }
0x228b   :  { %6676 = vmatpush3.bf16.msra.mxu1 %v7702_v59  ;;  %p7796_p0 = scmp.ne.s32.totalorder %s5669_s30, %s7795_s12  ;;  %p7801_p2 = scmp.lt.s32.totalorder %s7795_s12, %s7795_s12 }
0x228c   :  { %6677 = vmatprep.subr.bf16.mxu1 %v7703_v20 }
0x228d   :  { %p7802_p3 = por %p7801_p2, %p7800_p1 }
0x228f   :  { %6678 = vmatpush3.bf16.msra.mxu1 %v7704_v29  ;;  %p7803_p4 = pnand %p7802_p3, %p7796_p0 }
0x2315   :  { %v5282_v14 = vpop.xlane.xlu0 %5281 }
0x2316   :  { %v5285_v34 = vmul.f32 0.007874016, %v5282_v14 }
0x2317   :  { %v5284_v35 = vpop.xlane.xlu1 %5283 }
0x2318   :  { %7785 = vrsqrt.f32 %v5285_v34  ;;  %v5286_v39 = vmul.f32 0.007874016, %v5284_v35  ;;  %vm5298_vm0 = vcmp.eq.f32.partialorder %v5285_v34, inf  ;;  %v5301_v40 = vand.u32 2147483648, %v5285_v34 }
0x2319   :  { %vm5300_vm1 = vcmp.eq.f32.partialorder %v5285_v34, 0.0 }
0x231a   :  { %7787 = vrsqrt.f32 %v5286_v39  ;;  %vm5305_vm2 = vcmp.eq.f32.partialorder %v5286_v39, inf  ;;  %v5308_v37 = vand.u32 2147483648, %v5286_v39  ;;  %vm5307_vm3 = vcmp.eq.f32.partialorder %v5286_v39, 0.0 }
0x2322   :  { %v7786_v52 = vpop.eup %7785 }
0x2323   :  { %v5297_v17 = vmul.f32 %v7786_v52, %v5285_v34 }
0x2324   :  { %v7788_v38 = vpop.eup %7787 }
0x2325   :  { %v5299_v43 = vsel %vm5298_vm0, %v5285_v34, %v5297_v17  ;;  %v5304_v47 = vmul.f32 %v7788_v38, %v5286_v39 }
0x2326   :  { %v5302_v45 = vsel %vm5300_vm1, %v5301_v40, %v5299_v43 }
0x2327   :  { %v5310_v19 = vadd.f32 1e-05, %v5302_v45  ;;  %v5306_v41 = vsel %vm5305_vm2, %v5286_v39, %v5304_v47 }
0x2328   :  { %v5309_v21 = vsel %vm5307_vm3, %v5308_v37, %v5306_v41 }
0x2329   :  { %7789 = vrcp.f32 %v5310_v19  ;;  %v5311_v42 = vadd.f32 1e-05, %v5309_v21 }
0x232b   :  { %7791 = vrcp.f32 %v5311_v42 }
0x2333   :  { %v7790_v15 = vpop.eup %7789 }
0x2334   :  { %v5313_v11 = vmul.f32 %v7790_v15, %v5294_v16 }
0x2335   :  { %v7792_v51 = vpop.eup %7791 }
0x2336   :  { %v5315_v55 = vmul.f32 %v7792_v51, %v5295_v49  ;;  %v5323_v13 = vadd.f32 %v6317_v53, %v5313_v11 }
0x2338   :  { %v5324_v60 = vadd.f32 %v6317_v53, %v5315_v55 }
0x233a   :  { %v5325_v62 = vpack.c.bf16 %v5324_v60, %v5323_v13 }
0x233c   :  { %5467 = vmatmul.mubr.bf16.vlgmr.msra.gmra.mrb[104].mxu0 %v5325_v62 }
0x240f   :  { %v5468_v3 = vpop.f32.mrb[104].mxu0 }
0x2410   :  { %v5469_v4 = vadd.f32 %v5468_v3, %v5347_v0  ;;  %v5470_v5 = vpop.f32.mrb[105].mxu0 }
0x2411   :  { %v5471_v27 = vadd.f32 %v5470_v5, %v5351_v2  ;;  %v5472_v44 = vpop.f32.mrb[106].mxu0 }
0x2412   :  { %v5473_v6 = vadd.f32 %v5472_v44, %v5347_v0  ;;  %v5474_v7 = vpop.f32.mrb[107].mxu0  ;;  %v5477_v50 = vmax.f32 %v5469_v4, 0.0 }
0x2413   :  { %v5475_v48 = vadd.f32 %v5474_v7, %v5351_v2  ;;  %v5478_v36 = vmax.f32 %v5471_v27, 0.0 }
0x2414   :  { %v5479_v61 = vmax.f32 %v5473_v6, 0.0 }
0x2415   :  { %v5480_v8 = vmax.f32 %v5475_v48, 0.0 }
0x2416   :  { %v5481_v9 = vpack.c.bf16 %v5479_v61, %v5477_v50 }
0x2417   :  { %v5482_v10 = vpack.c.bf16 %v5480_v8, %v5478_v36 }
0x2419   :  { %5650 = vmatprep.mubr.bf16.mxu1 %v5482_v10 }
0x241a   :  { %5651 = vmatmul.mubr.bf16.vlgmr.msra.gmra.mrb[152].mxu1 %v5481_v9 }
0x24ed   :  { %v6679_v56 = vpop.f32.mrb[152].mxu1 }
0x24ee   :  { %v6680_v12 = vpop.f32.mrb[153].mxu1 }
0x24ef   :  { %v6681_v54 = vadd.f32 %v6680_v12, %v6679_v56  ;;  %v6682_v18 = vpop.f32.mrb[154].mxu1 }
0x24f0   :  { %v6683_v22 = vpop.f32.mrb[155].mxu1 }
0x24f1   :  { %v5653_v23 = vadd.f32 %v6681_v54, %v6334_v24  ;;  %v6684_v25 = vadd.f32 %v6683_v22, %v6682_v18 }
0x24f3   :  { %v5659_v26 = vadd.f32 %v5653_v23, %v8815_v57  ;;  %v5656_v28 = vadd.f32 %v6684_v25, %v6334_v24 }
0x24f5   :  { %5661 = vst [vmem:[#allocation2] sm:$0xff] %v5659_v26  ;;  %v5660_v32 = vadd.f32 %v5656_v28, %v8819_v58 }
0x24f7   :  { %5662 = vst [vmem:[#allocation2 + $0x8] sm:$0xff] %v5660_v32 }
0x24f8   :  { %7806 = shalt.err (!%p7803_p4)
}
0x24f9   :  { %s7807_s20 = scalar_lea.hbm %s8008_s6, 256 }
0x24fa   :  { %p7808_p5 = scmp.ne.s32.totalorder %s8008_s6, %s7807_s20  ;;  %p7811_p6 = scmp.lt.u32.totalorder %s7807_s20, %s8008_s6 }
0x24fc   :  { %p7813_p7 = pnand %p7811_p6, %p7808_p5 }
0x24fe   :  { %7816 = shalt.err (!%p7813_p7)
}
0x24ff   :  { %s7853_s27 = smov 128   ;;  %s7854_s4 = smov 8  }
0x2500   :  { %5674 = dma.vmem_to_hbm [thread:$0]  %s5669_s30, 256, %s8008_s6, [#allocation3], %s7853_s27, %s7853_s27, %s7854_s4  }
0x2501   :  { %7817 = dma.done.wait [#allocation3], 256  }
0x2502   :  { %7818 = vsyncadd [#allocation3], 4294967040 }
0x2503   :  { %5678 = vsyncpa [#allocation3], 1 }

</bundles_post_ra>
